<compile_context>
chip_gen: v5e
topology: v5e:2x2
jax: 0.10.0
libtpu: 0.0.40
codegen_flags: <defaults>
</compile_context>

<pallas_src>
import functools

import jax
import jax.numpy as jnp
from jax import lax
from jax.experimental import pallas as pl
from jax.experimental.pallas import tpu as pltpu

EPS = 1e-5
LANE = 128


def _round_up(x, m):
    return (x + m - 1) // m * m


def _vmem_limit(block_bytes, scratch_bytes=0):
    """Per-call VMEM budget: double-buffered blocks + scratch + slack, capped so
    compute kernels stay well under v7x's 64 MiB physical VMEM (128 MiB on v5e/v6e)."""
    need = 2 * block_bytes + scratch_bytes
    return int(min(max(2 * need, 8 * 2 ** 20), 28 * 2 ** 20))


def _pick_row_tile(m, target):
    """Largest divisor of m <= target, preferring multiples of 256 (keeps the
    mem-bound passes near the HBM roofline); falls back to multiples of 8."""
    t = min(target, m)
    for step in (256, 8):
        c = (t // step) * step
        while c >= step:
            if m % c == 0:
                return c
            c -= step
    return m


def _pick_strip_height(h, w, rate, min_gemm_rows=128, max_gemm_rows=4096):
    """Row-strip height for the 3x3 conv: a multiple of `rate` dividing H, sized
    so each strip is a decent MXU tile yet bounded in VMEM, preferring >= 2
    strips per image (pipelining / megacore) with bounded halo overhead."""
    cands = [t for t in range(rate, h + 1, rate) if h % t == 0]

    def ok(t):
        return min_gemm_rows <= t * w <= max_gemm_rows and (t * w) % 8 == 0

    pref = [t for t in cands if ok(t) and t < h and t >= min(8 * rate, h)]
    if pref:
        return min(pref)
    fit = [t for t in cands if ok(t)]
    if fit:
        return min(fit)
    return cands[-1]


# ----------------------------------------------------------------------------
# 1x1 convs as row-tiled GEMMs that also emit per-tile BN statistics.  The
# stage-3 variant fuses the previous stage's BN+ReLU into the prologue so the
# (M, Cp) pre-BN activation only round-trips HBM once, in bf16.
# ----------------------------------------------------------------------------
def _gemm_stats_kernel(x_ref, w_ref, y_ref, ssum_ref, ssq_ref):
    acc = jnp.dot(x_ref[...], w_ref[...], preferred_element_type=jnp.float32)
    y_bf = acc.astype(jnp.bfloat16)            # bf16 storage of the pre-BN output
    y_ref[...] = y_bf
    yf = y_bf.astype(jnp.float32)              # f32 stats of the stored values
    ssum_ref[0] = jnp.sum(yf, axis=0, keepdims=True)
    ssq_ref[0] = jnp.sum(yf * yf, axis=0, keepdims=True)


def _bn_relu_gemm_stats_kernel(x_ref, sc_ref, sh_ref, w_ref, y_ref, ssum_ref, ssq_ref):
    # Fused prologue: previous stage's BN (folded scale/shift) + ReLU in f32.
    a = jnp.maximum(x_ref[...].astype(jnp.float32) * sc_ref[...] + sh_ref[...], 0.0)
    acc = jnp.dot(a.astype(jnp.bfloat16), w_ref[...],
                  preferred_element_type=jnp.float32)
    y_bf = acc.astype(jnp.bfloat16)
    y_ref[...] = y_bf
    yf = y_bf.astype(jnp.float32)
    ssum_ref[0] = jnp.sum(yf, axis=0, keepdims=True)
    ssq_ref[0] = jnp.sum(yf * yf, axis=0, keepdims=True)


def gemm_stats(x_bf16, w_bf16, scale=None, shift=None, *, row_tile=256):
    m, k = x_bf16.shape
    c = w_bf16.shape[1]
    tm = _pick_row_tile(m, row_tile)
    nt = m // tm

    in_specs = [pl.BlockSpec((tm, k), lambda i: (i, 0))]
    args = [x_bf16]
    if scale is not None:
        in_specs += [pl.BlockSpec((1, k), lambda i: (0, 0)),
                     pl.BlockSpec((1, k), lambda i: (0, 0))]
        args += [scale, shift]
        kern = _bn_relu_gemm_stats_kernel
    else:
        kern = _gemm_stats_kernel
    # Weight: constant block index across the grid -> Pallas skips the re-DMA.
    in_specs.append(pl.BlockSpec((k, c), lambda i: (0, 0)))
    args.append(w_bf16)

    block_bytes = tm * k * 2 + 2 * k * 4 + k * c * 2 + tm * c * 2 + 2 * c * 4
    y, ssum, ssq = pl.pallas_call(
        kern,
        out_shape=(jax.ShapeDtypeStruct((m, c), jnp.bfloat16),
                   jax.ShapeDtypeStruct((nt, 1, c), jnp.float32),
                   jax.ShapeDtypeStruct((nt, 1, c), jnp.float32)),
        grid=(nt,),
        in_specs=in_specs,
        out_specs=(pl.BlockSpec((tm, c), lambda i: (i, 0)),
                   pl.BlockSpec((1, 1, c), lambda i: (i, 0, 0)),
                   pl.BlockSpec((1, 1, c), lambda i: (i, 0, 0))),
        compiler_params=pltpu.CompilerParams(
            dimension_semantics=("parallel",),
            vmem_limit_bytes=_vmem_limit(block_bytes)),
    )(*args)
    return y, jnp.sum(ssum, axis=(0, 1)), jnp.sum(ssq, axis=(0, 1))


# ----------------------------------------------------------------------------
# 3x3 dilated conv, tiled over (image, row-strip), with the stage-1 BN+ReLU
# fused into its prologue and per-strip BN2 statistics emitted.  Halo rows come
# straight from y1 via clamped BlockSpecs (no wrapper-side spatial pad copy).
# ----------------------------------------------------------------------------
def _conv3x3_bn_relu_stats_kernel(c_ref, up_ref, dn_ref, sc_ref, sh_ref, w_ref,
                                  y_ref, ssum_ref, ssq_ref, acc_ref,
                                  *, TH, W, rate):
    r = rate
    cin3 = w_ref.shape[1]                      # 3 * Cin_p (dx taps folded into K)
    s = pl.program_id(1)
    ns = pl.num_programs(1)

    def bn_relu(v):                            # fused BN1 + ReLU (f32)
        return jnp.maximum(v.astype(jnp.float32) * sc_ref[...] + sh_ref[...], 0.0)

    # Halo rows outside the image must be zeros of the *post* BN+ReLU activation
    # (conv2 zero-pads a1, not BN(0)), hence the mask is applied after bn_relu.
    a_up = bn_relu(up_ref[0]) * (s > 0).astype(jnp.float32)
    a_mid = bn_relu(c_ref[0])
    a_dn = bn_relu(dn_ref[0]) * (s < ns - 1).astype(jnp.float32)
    a = jnp.concatenate([a_up, a_mid, a_dn], axis=0).astype(jnp.bfloat16)
    zcol = jnp.zeros((TH + 2 * r, r, a.shape[-1]), jnp.bfloat16)
    a = jnp.concatenate([zcol, a, zcol], axis=1)        # (TH+2r, W+2r, Cin_p)

    # 3 dy taps; 3 dx taps folded into the contraction (K = 3*Cin_p >= 384).
    for dy in range(3):
        xdy = a[dy * r: dy * r + TH]                    # (TH, W+2r, Cin_p)
        xcat = jnp.concatenate(
            [xdy[:, dx * r: dx * r + W, :] for dx in range(3)], axis=-1)
        contrib = jnp.dot(xcat.reshape(TH * W, cin3), w_ref[dy],
                          preferred_element_type=jnp.float32)
        if dy == 0:
            acc_ref[...] = contrib
        else:
            acc_ref[...] += contrib

    y_bf = acc_ref[...].astype(jnp.bfloat16)            # bf16 pre-BN2 output
    y_ref[...] = y_bf
    yf = y_bf.astype(jnp.float32)
    ssum_ref[0] = jnp.sum(yf, axis=0, keepdims=True)
    ssq_ref[0] = jnp.sum(yf * yf, axis=0, keepdims=True)


def conv3x3_bn_relu_stats(y1_nhwc, scale1, shift1, w_taps, *, rate):
    n, h, w, cin = y1_nhwc.shape
    _, k3, cout = w_taps.shape
    r = rate
    if h % r:
        raise NotImplementedError("H must be a multiple of the dilation rate")
    th = _pick_strip_height(h, w, r)
    ns = h // th
    thr = th // r
    hb = h // r
    if (th * w) % 8:
        raise ValueError("strip_rows * W must be a multiple of 8")

    kern = functools.partial(_conv3x3_bn_relu_stats_kernel, TH=th, W=w, rate=r)
    block_bytes = (th * w * cin * 2 + 2 * (r * w * cin * 2) + 2 * (cin * 4)
                   + 3 * k3 * cout * 2 + th * w * cout * 2 + 2 * cout * 4)
    scratch_bytes = th * w * cout * 4

    y, ssum, ssq = pl.pallas_call(
        kern,
        out_shape=(jax.ShapeDtypeStruct((n * h * w, cout), jnp.bfloat16),
                   jax.ShapeDtypeStruct((n * ns, 1, cout), jnp.float32),
                   jax.ShapeDtypeStruct((n * ns, 1, cout), jnp.float32)),
        grid=(n, ns),
        in_specs=[
            # current strip
            pl.BlockSpec((1, th, w, cin), lambda i, s: (i, s, 0, 0)),
            # r-row halos from the adjacent strips (clamped at image borders,
            # masked to zero in-kernel) -- no wrapper-side spatial pad copy.
            pl.BlockSpec((1, r, w, cin),
                         lambda i, s: (i, jnp.maximum(s * thr - 1, 0), 0, 0)),
            pl.BlockSpec((1, r, w, cin),
                         lambda i, s: (i, jnp.minimum((s + 1) * thr, hb - 1), 0, 0)),
            pl.BlockSpec((1, cin), lambda i, s: (0, 0)),
            pl.BlockSpec((1, cin), lambda i, s: (0, 0)),
            pl.BlockSpec((3, k3, cout), lambda i, s: (0, 0, 0)),
        ],
        out_specs=(
            pl.BlockSpec((th * w, cout), lambda i, s: (i * ns + s, 0)),
            pl.BlockSpec((1, 1, cout), lambda i, s: (i * ns + s, 0, 0)),
            pl.BlockSpec((1, 1, cout), lambda i, s: (i * ns + s, 0, 0)),
        ),
        scratch_shapes=[pltpu.VMEM((th * w, cout), jnp.float32)],
        compiler_params=pltpu.CompilerParams(
            dimension_semantics=("parallel", "parallel"),
            vmem_limit_bytes=_vmem_limit(block_bytes, scratch_bytes)),
    )(y1_nhwc, y1_nhwc, y1_nhwc, scale1, shift1, w_taps)
    return y, jnp.sum(ssum, axis=(0, 1)), jnp.sum(ssq, axis=(0, 1))


# ----------------------------------------------------------------------------
# Final epilogue: BN3 (folded scale/shift) + identity residual (bf16 read) + ReLU.
# ----------------------------------------------------------------------------
def _bn_residual_relu_kernel(y_ref, sc_ref, sh_ref, res_ref, o_ref):
    y = y_ref[...].astype(jnp.float32) * sc_ref[...] + sh_ref[...]
    o_ref[...] = jnp.maximum(y + res_ref[...].astype(jnp.float32), 0.0)


def bn_residual_relu(y, scale, shift, residual, *, row_tile=512):
    m, c = y.shape
    tm = _pick_row_tile(m, row_tile)
    nt = m // tm
    block_bytes = 2 * tm * c * 2 + 2 * c * 4 + tm * c * 4
    return pl.pallas_call(
        _bn_residual_relu_kernel,
        out_shape=jax.ShapeDtypeStruct((m, c), jnp.float32),
        grid=(nt,),
        in_specs=[pl.BlockSpec((tm, c), lambda i: (i, 0)),
                  pl.BlockSpec((1, c), lambda i: (0, 0)),
                  pl.BlockSpec((1, c), lambda i: (0, 0)),
                  pl.BlockSpec((tm, c), lambda i: (i, 0))],
        out_specs=pl.BlockSpec((tm, c), lambda i: (i, 0)),
        compiler_params=pltpu.CompilerParams(
            dimension_semantics=("parallel",),
            vmem_limit_bytes=_vmem_limit(block_bytes)),
    )(y, scale, shift, residual)


def _bn_fold(ssum, ssq, count, gamma, beta, c_pad):
    """Fold training-mode batch stats (biased var) + affine into scale/shift (f32)."""
    mean = ssum / count
    var = jnp.maximum(ssq / count - mean * mean, 0.0)
    g = jnp.pad(gamma.astype(jnp.float32), (0, c_pad - gamma.shape[0]))
    b = jnp.pad(beta.astype(jnp.float32), (0, c_pad - beta.shape[0]))
    scale = g * lax.rsqrt(var + EPS)
    shift = b - mean * scale
    return scale.reshape(1, c_pad), shift.reshape(1, c_pad)


# ----------------------------------------------------------------------------
# Bottleneck forward (NCHW in / NCHW out, like the PyTorch module)
# ----------------------------------------------------------------------------
def bottleneck_forward(x_nchw, params, rate=1):
    # NOTE: in a full network keep activations NHWC and transpose once at the
    # model boundary; this per-block transpose only adapts the NCHW API.
    x = jnp.transpose(x_nchw, (0, 2, 3, 1))                  # -> NHWC
    n, h, w, cin = x.shape
    m = n * h * w

    w1, w2, w3 = params["w1_oihw"], params["w2_oihw"], params["w3_oihw"]
    planes = w1.shape[0]
    cout3 = 4 * planes
    if cout3 != cin:
        raise NotImplementedError(
            "identity residual requires planes*4 == inplanes (downsample not implemented)")
    if m % 8:
        raise ValueError("N*H*W must be a multiple of 8 (TPU sublane tiling)")

    cin_p = _round_up(cin, LANE)
    p_p = _round_up(planes, LANE)
    c4_p = _round_up(cout3, LANE)     # == cin_p for the identity-residual case
    # NOTE: real bottleneck widths (planes >= 64) already give K, N >= 256 here,
    # filling the 256-deep MXU on v6e/v7x; no extra padding added for toy sizes.

    # GEMM-layout, channel-padded bf16 weights.
    w1m = jnp.pad(w1[:, :, 0, 0].T,
                  ((0, cin_p - cin), (0, p_p - planes))).astype(jnp.bfloat16)
    w2_hwio = jnp.pad(jnp.transpose(w2, (2, 3, 1, 0)),
                      ((0, 0), (0, 0), (0, p_p - planes), (0, p_p - planes)))
    w2t = w2_hwio.reshape(3, 3 * p_p, p_p).astype(jnp.bfloat16)  # dy-major, dx folded in K
    w3m = jnp.pad(w3[:, :, 0, 0].T,
                  ((0, p_p - planes), (0, c4_p - cout3))).astype(jnp.bfloat16)

    # bf16, channel-padded input: stage-1 GEMM operand *and* the residual read.
    x2d = jnp.pad(x.reshape(m, cin), ((0, 0), (0, cin_p - cin))).astype(jnp.bfloat16)

    # ---- stage 1: 1x1 conv GEMM + BN1 batch stats (BN1+ReLU deferred to stage 2) ----
    y1, s1, q1 = gemm_stats(x2d, w1m)
    sc1, sh1 = _bn_fold(s1, q1, m, params["g1"], params["b1"], p_p)

    # ---- stage 2: fused [BN1+ReLU] -> 3x3 dilated conv + BN2 batch stats ----
    y2, s2, q2 = conv3x3_bn_relu_stats(y1.reshape(n, h, w, p_p), sc1, sh1, w2t,
                                       rate=rate)
    sc2, sh2 = _bn_fold(s2, q2, m, params["g2"], params["b2"], p_p)

    # ---- stage 3: fused [BN2+ReLU] -> 1x1 conv GEMM + BN3 batch stats ----
    y3, s3, q3 = gemm_stats(y2, w3m, scale=sc2, shift=sh2)
    sc3, sh3 = _bn_fold(s3, q3, m, params["g3"], params["b3"], c4_p)

    # ---- epilogue: BN3 + identity residual + ReLU ----
    out = bn_residual_relu(y3, sc3, sh3, x2d)

    out = out[:, :cout3].reshape(n, h, w, cout3)
    return jnp.transpose(out, (0, 3, 1, 2))                   # -> NCHW


# ----------------------------------------------------------------------------
# Pure-JAX reference (NCHW, lax.conv).  It mirrors the kernel's documented
# precision policy (bf16 MXU operands, bf16 storage of pre-BN conv outputs,
# bf16 residual read) while keeping all BN / epilogue math in f32, so the
# remaining differences are reduction order + scale/shift folding only.
# ----------------------------------------------------------------------------
def _bn_train_ref(y, gamma, beta):
    mean = jnp.mean(y, axis=(0, 2, 3), keepdims=True)
    var = jnp.mean((y - mean) ** 2, axis=(0, 2, 3), keepdims=True)
    yhat = (y - mean) * lax.rsqrt(var + EPS)
    return yhat * gamma.reshape(1, -1, 1, 1) + beta.reshape(1, -1, 1, 1)


def bottleneck_ref(x, p, rate=1):
    dn = ("NCHW", "OIHW", "NCHW")

    def conv(inp, wt, padding="VALID", rhs_dilation=None):
        y = lax.conv_general_dilated(
            inp.astype(jnp.bfloat16), wt.astype(jnp.bfloat16), (1, 1), padding,
            rhs_dilation=rhs_dilation, dimension_numbers=dn,
            preferred_element_type=jnp.float32)
        return y.astype(jnp.bfloat16).astype(jnp.float32)   # bf16 pre-BN storage

    out = conv(x, p["w1_oihw"])
    out = jnp.maximum(_bn_train_ref(out, p["g1"], p["b1"]), 0.0)
    out = conv(out, p["w2_oihw"], padding=((rate, rate), (rate, rate)),
               rhs_dilation=(rate, rate))
    out = jnp.maximum(_bn_train_ref(out, p["g2"], p["b2"]), 0.0)
    out = conv(out, p["w3_oihw"])
    out = _bn_train_ref(out, p["g3"], p["b3"]) + x.astype(jnp.bfloat16).astype(jnp.float32)
    return jnp.maximum(out, 0.0)


# ----------------------------------------------------------------------------
# Deterministic parameter construction (shapes from Bottleneck.__init__)
# ----------------------------------------------------------------------------
def make_params(inplanes, planes, key):
    ks = jax.random.split(key, 9)
    return {
        "w1_oihw": 0.1 * jax.random.normal(ks[0], (planes, inplanes, 1, 1), jnp.float32),
        "w2_oihw": 0.1 * jax.random.normal(ks[1], (planes, planes, 3, 3), jnp.float32),
        "w3_oihw": 0.1 * jax.random.normal(ks[2], (planes * 4, planes, 1, 1), jnp.float32),
        "g1": 1.0 + 0.1 * jax.random.normal(ks[3], (planes,), jnp.float32),
        "b1": 0.1 * jax.random.normal(ks[4], (planes,), jnp.float32),
        "g2": 1.0 + 0.1 * jax.random.normal(ks[5], (planes,), jnp.float32),
        "b2": 0.1 * jax.random.normal(ks[6], (planes,), jnp.float32),
        "g3": 1.0 + 0.1 * jax.random.normal(ks[7], (planes * 4,), jnp.float32),
        "b3": 0.1 * jax.random.normal(ks[8], (planes * 4,), jnp.float32),
    }


if __name__ == "__main__":
    # batch=2, inplanes=16, planes=4 (planes*4 == inplanes so the identity
    # residual is valid with downsample=None), spatial 16x16, stride=1, rate=1.
    n, inplanes, planes, h, w = 2, 16, 4, 16, 16
    rate = 1

    key = jax.random.PRNGKey(0)
    kx, kp = jax.random.split(key)
    x = jax.random.normal(kx, (n, inplanes, h, w), jnp.float32)   # NCHW, PyTorch layout
    params = make_params(inplanes, planes, kp)

    fwd = jax.jit(functools.partial(bottleneck_forward, rate=rate))
    out = jax.block_until_ready(fwd(x, params))

    ref = jax.block_until_ready(bottleneck_ref(x, params, rate=rate))
    assert out.shape == (n, inplanes, h, w)
    err = float(jnp.max(jnp.abs(out - ref)))
    # Typical error is ~1e-3; the tolerance allows for bf16 rounding of the
    # pre-BN activations being amplified by 1/sigma in BN at these toy channel
    # counts plus reduction-order differences vs. lax.conv.
    assert jnp.allclose(out, ref, rtol=3e-2, atol=3e-2), f"max abs err = {err}"

    print("KERNEL_OK")
</pallas_src>

<mosaic_0001>
module attributes {stable_mosaic.version = 11 : i64} {
  func.func @_gemm_stats_kernel(%arg0: i32, %arg1: memref<256x128xbf16, #tpu.memory_space<vmem>>, %arg2: memref<128x128xbf16, #tpu.memory_space<vmem>>, %arg3: memref<256x128xbf16, #tpu.memory_space<vmem>>, %arg4: memref<1x1x128xf32, #tpu.memory_space<vmem>>, %arg5: memref<1x1x128xf32, #tpu.memory_space<vmem>>) attributes {dimension_semantics = [#tpu.dimension_semantics<parallel>], iteration_bounds = array<i64: 2>, scalar_prefetch = 0 : i64, scratch_operands = 0 : i64, tpu.core_type = #tpu.core_type<tc>, window_params = [{transform_indices = @transform_0, window_bounds = array<i64: 256, 128>}, {pipeline_mode = #tpu.pipeline_mode<synchronous>, transform_indices = @transform_1, window_bounds = array<i64: 128, 128>}, {transform_indices = @transform_2, window_bounds = array<i64: 256, 128>}, {transform_indices = @transform_3, window_bounds = array<i64: 1, 1, 128>}, {transform_indices = @transform_4, window_bounds = array<i64: 1, 1, 128>}]} {
    %c0 = arith.constant 0 : index
    %c0_0 = arith.constant 0 : index
    %0 = vector.load %arg1[%c0, %c0_0] : memref<256x128xbf16, #tpu.memory_space<vmem>>, vector<256x128xbf16>
    %c0_1 = arith.constant 0 : index
    %c0_2 = arith.constant 0 : index
    %1 = vector.load %arg2[%c0_1, %c0_2] : memref<128x128xbf16, #tpu.memory_space<vmem>>, vector<128x128xbf16>
    %cst = arith.constant dense<0.000000e+00> : vector<256x128xf32>
    %2 = tpu.matmul %0, %1, %cst {dimension_numbers = #tpu.dot_dimension_numbers<[1], [0], [0], [1], [0, 0, 1, 1], [], []>} : vector<256x128xbf16>, vector<128x128xbf16>, vector<256x128xf32> -> vector<256x128xf32>
    %3 = arith.truncf %2 : vector<256x128xf32> to vector<256x128xbf16>
    %c0_3 = arith.constant 0 : index
    %c0_4 = arith.constant 0 : index
    %4 = vector.load %arg3[%c0_3, %c0_4] : memref<256x128xbf16, #tpu.memory_space<vmem>>, vector<256x128xbf16>
    tpu.vector_store %arg3[%c0_3, %c0_4], %3 {strides = array<i32>} : memref<256x128xbf16, #tpu.memory_space<vmem>>, vector<256x128xbf16>,
    %5 = arith.extf %3 : vector<256x128xbf16> to vector<256x128xf32>
    %cst_5 = arith.constant dense<0.000000e+00> : vector<128xf32>
    %6 = vector.multi_reduction <add>, %5, %cst_5 [0] : vector<256x128xf32> to vector<128xf32>
    %7 = vector.shape_cast %6 : vector<128xf32> to vector<1x128xf32>
    %c0_6 = arith.constant 0 : index
    %c0_7 = arith.constant 0 : index
    %c0_8 = arith.constant 0 : index
    %8 = vector.load %arg4[%c0_6, %c0_7, %c0_8] : memref<1x1x128xf32, #tpu.memory_space<vmem>>, vector<1x1x128xf32>
    %9 = vector.shape_cast %8 : vector<1x1x128xf32> to vector<1x128xf32>
    %10 = vector.shape_cast %7 : vector<1x128xf32> to vector<1x1x128xf32>
    tpu.vector_store %arg4[%c0_6, %c0_7, %c0_8], %10 {strides = array<i32>} : memref<1x1x128xf32, #tpu.memory_space<vmem>>, vector<1x1x128xf32>,
    %11 = arith.mulf %5, %5 : vector<256x128xf32>
    %cst_9 = arith.constant dense<0.000000e+00> : vector<128xf32>
    %12 = vector.multi_reduction <add>, %11, %cst_9 [0] : vector<256x128xf32> to vector<128xf32>
    %13 = vector.shape_cast %12 : vector<128xf32> to vector<1x128xf32>
    %c0_10 = arith.constant 0 : index
    %c0_11 = arith.constant 0 : index
    %c0_12 = arith.constant 0 : index
    %14 = vector.load %arg5[%c0_10, %c0_11, %c0_12] : memref<1x1x128xf32, #tpu.memory_space<vmem>>, vector<1x1x128xf32>
    %15 = vector.shape_cast %14 : vector<1x1x128xf32> to vector<1x128xf32>
    %16 = vector.shape_cast %13 : vector<1x128xf32> to vector<1x1x128xf32>
    tpu.vector_store %arg5[%c0_10, %c0_11, %c0_12], %16 {strides = array<i32>} : memref<1x1x128xf32, #tpu.memory_space<vmem>>, vector<1x1x128xf32>,
    return
  }
  func.func @transform_0(%arg0: i32) -> (i32, i32) {
    %c0_i32 = arith.constant 0 : i32
    %c0_i32_0 = arith.constant 0 : i32
    return %arg0, %c0_i32 : i32, i32
  }
  func.func @transform_1(%arg0: i32) -> (i32, i32) {
    %c0_i32 = arith.constant 0 : i32
    %c0_i32_0 = arith.constant 0 : i32
    %c0_i32_1 = arith.constant 0 : i32
    return %c0_i32, %c0_i32_0 : i32, i32
  }
  func.func @transform_2(%arg0: i32) -> (i32, i32) {
    %c0_i32 = arith.constant 0 : i32
    %c0_i32_0 = arith.constant 0 : i32
    return %arg0, %c0_i32 : i32, i32
  }
  func.func @transform_3(%arg0: i32) -> (i32, i32, i32) {
    %c0_i32 = arith.constant 0 : i32
    %c0_i32_0 = arith.constant 0 : i32
    %c0_i32_1 = arith.constant 0 : i32
    return %arg0, %c0_i32, %c0_i32_0 : i32, i32, i32
  }
  func.func @transform_4(%arg0: i32) -> (i32, i32, i32) {
    %c0_i32 = arith.constant 0 : i32
    %c0_i32_0 = arith.constant 0 : i32
    %c0_i32_1 = arith.constant 0 : i32
    return %arg0, %c0_i32, %c0_i32_0 : i32, i32, i32
  }
}

module attributes {stable_mosaic.version = 11 : i64} {
  func.func @_conv3x3_bn_relu_stats_kernel(%arg0: i32, %arg1: i32, %arg2: memref<1x8x16x128xbf16, #tpu.memory_space<vmem>>, %arg3: memref<1x1x16x128xbf16, #tpu.memory_space<vmem>>, %arg4: memref<1x1x16x128xbf16, #tpu.memory_space<vmem>>, %arg5: memref<1x128xf32, #tpu.memory_space<vmem>>, %arg6: memref<1x128xf32, #tpu.memory_space<vmem>>, %arg7: memref<3x384x128xbf16, #tpu.memory_space<vmem>>, %arg8: memref<128x128xbf16, #tpu.memory_space<vmem>>, %arg9: memref<1x1x128xf32, #tpu.memory_space<vmem>>, %arg10: memref<1x1x128xf32, #tpu.memory_space<vmem>>, %arg11: memref<128x128xf32, #tpu.memory_space<vmem>>) attributes {dimension_semantics = [#tpu.dimension_semantics<parallel>, #tpu.dimension_semantics<parallel>], iteration_bounds = array<i64: 2, 2>, scalar_prefetch = 0 : i64, scratch_operands = 1 : i64, tpu.core_type = #tpu.core_type<tc>, window_params = [{transform_indices = @transform_0, window_bounds = array<i64: 1, 8, 16, 128>}, {transform_indices = @transform_1, window_bounds = array<i64: 1, 1, 16, 128>}, {transform_indices = @transform_2, window_bounds = array<i64: 1, 1, 16, 128>}, {pipeline_mode = #tpu.pipeline_mode<synchronous>, transform_indices = @transform_3, window_bounds = array<i64: 1, 128>}, {pipeline_mode = #tpu.pipeline_mode<synchronous>, transform_indices = @transform_4, window_bounds = array<i64: 1, 128>}, {pipeline_mode = #tpu.pipeline_mode<synchronous>, transform_indices = @transform_5, window_bounds = array<i64: 3, 384, 128>}, {transform_indices = @transform_6, window_bounds = array<i64: 128, 128>}, {transform_indices = @transform_7, window_bounds = array<i64: 1, 1, 128>}, {transform_indices = @transform_8, window_bounds = array<i64: 1, 1, 128>}]} {
    %c0 = arith.constant 0 : index
    %c0_0 = arith.constant 0 : index
    %c0_1 = arith.constant 0 : index
    %c0_2 = arith.constant 0 : index
    %0 = vector.load %arg3[%c0, %c0_0, %c0_1, %c0_2] : memref<1x1x16x128xbf16, #tpu.memory_space<vmem>>, vector<1x1x16x128xbf16>
    %1 = vector.shape_cast %0 : vector<1x1x16x128xbf16> to vector<1x16x128xbf16>
    %2 = arith.extf %1 : vector<1x16x128xbf16> to vector<1x16x128xf32>
    %c0_3 = arith.constant 0 : index
    %c0_4 = arith.constant 0 : index
    %3 = vector.load %arg5[%c0_3, %c0_4] : memref<1x128xf32, #tpu.memory_space<vmem>>, vector<1x128xf32>
    %4 = vector.shape_cast %3 : vector<1x128xf32> to vector<1x1x128xf32>
    %5 = vector.broadcast %4 : vector<1x1x128xf32> to vector<1x16x128xf32>
    %6 = arith.mulf %2, %5 : vector<1x16x128xf32>
    %c0_5 = arith.constant 0 : index
    %c0_6 = arith.constant 0 : index
    %7 = vector.load %arg6[%c0_5, %c0_6] : memref<1x128xf32, #tpu.memory_space<vmem>>, vector<1x128xf32>
    %8 = vector.shape_cast %7 : vector<1x128xf32> to vector<1x1x128xf32>
    %9 = vector.broadcast %8 : vector<1x1x128xf32> to vector<1x16x128xf32>
    %10 = arith.addf %6, %9 : vector<1x16x128xf32>
    %cst = arith.constant 0.000000e+00 : f32
    %11 = vector.broadcast %cst : f32 to vector<1x16x128xf32>
    %12 = arith.maximumf %10, %11 : vector<1x16x128xf32>
    %c0_i32 = arith.constant 0 : i32
    %13 = arith.cmpi sgt, %arg1, %c0_i32 : i32
    %14 = arith.extui %13 : i1 to i32
    %15 = arith.sitofp %14 : i32 to f32
    %16 = vector.broadcast %15 : f32 to vector<1x16x128xf32>
    %17 = arith.mulf %12, %16 : vector<1x16x128xf32>
    %c0_7 = arith.constant 0 : index
    %c0_8 = arith.constant 0 : index
    %c0_9 = arith.constant 0 : index
    %c0_10 = arith.constant 0 : index
    %18 = vector.load %arg2[%c0_7, %c0_8, %c0_9, %c0_10] : memref<1x8x16x128xbf16, #tpu.memory_space<vmem>>, vector<1x8x16x128xbf16>
    %19 = vector.shape_cast %18 : vector<1x8x16x128xbf16> to vector<8x16x128xbf16>
    %20 = arith.extf %19 : vector<8x16x128xbf16> to vector<8x16x128xf32>
    %c0_11 = arith.constant 0 : index
    %c0_12 = arith.constant 0 : index
    %21 = vector.load %arg5[%c0_11, %c0_12] : memref<1x128xf32, #tpu.memory_space<vmem>>, vector<1x128xf32>
    %22 = vector.shape_cast %21 : vector<1x128xf32> to vector<1x1x128xf32>
    %23 = vector.broadcast %22 : vector<1x1x128xf32> to vector<8x16x128xf32>
    %24 = arith.mulf %20, %23 : vector<8x16x128xf32>
    %c0_13 = arith.constant 0 : index
    %c0_14 = arith.constant 0 : index
    %25 = vector.load %arg6[%c0_13, %c0_14] : memref<1x128xf32, #tpu.memory_space<vmem>>, vector<1x128xf32>
    %26 = vector.shape_cast %25 : vector<1x128xf32> to vector<1x1x128xf32>
    %27 = vector.broadcast %26 : vector<1x1x128xf32> to vector<8x16x128xf32>
    %28 = arith.addf %24, %27 : vector<8x16x128xf32>
    %cst_15 = arith.constant 0.000000e+00 : f32
    %29 = vector.broadcast %cst_15 : f32 to vector<8x16x128xf32>
    %30 = arith.maximumf %28, %29 : vector<8x16x128xf32>
    %c0_16 = arith.constant 0 : index
    %c0_17 = arith.constant 0 : index
    %c0_18 = arith.constant 0 : index
    %c0_19 = arith.constant 0 : index
    %31 = vector.load %arg4[%c0_16, %c0_17, %c0_18, %c0_19] : memref<1x1x16x128xbf16, #tpu.memory_space<vmem>>, vector<1x1x16x128xbf16>
    %32 = vector.shape_cast %31 : vector<1x1x16x128xbf16> to vector<1x16x128xbf16>
    %33 = arith.extf %32 : vector<1x16x128xbf16> to vector<1x16x128xf32>
    %c0_20 = arith.constant 0 : index
    %c0_21 = arith.constant 0 : index
    %34 = vector.load %arg5[%c0_20, %c0_21] : memref<1x128xf32, #tpu.memory_space<vmem>>, vector<1x128xf32>
    %35 = vector.shape_cast %34 : vector<1x128xf32> to vector<1x1x128xf32>
    %36 = vector.broadcast %35 : vector<1x1x128xf32> to vector<1x16x128xf32>
    %37 = arith.mulf %33, %36 : vector<1x16x128xf32>
    %c0_22 = arith.constant 0 : index
    %c0_23 = arith.constant 0 : index
    %38 = vector.load %arg6[%c0_22, %c0_23] : memref<1x128xf32, #tpu.memory_space<vmem>>, vector<1x128xf32>
    %39 = vector.shape_cast %38 : vector<1x128xf32> to vector<1x1x128xf32>
    %40 = vector.broadcast %39 : vector<1x1x128xf32> to vector<1x16x128xf32>
    %41 = arith.addf %37, %40 : vector<1x16x128xf32>
    %cst_24 = arith.constant 0.000000e+00 : f32
    %42 = vector.broadcast %cst_24 : f32 to vector<1x16x128xf32>
    %43 = arith.maximumf %41, %42 : vector<1x16x128xf32>
    %c1_i32 = arith.constant 1 : i32
    %44 = arith.cmpi slt, %arg1, %c1_i32 : i32
    %45 = arith.extui %44 : i1 to i32
    %46 = arith.sitofp %45 : i32 to f32
    %47 = vector.broadcast %46 : f32 to vector<1x16x128xf32>
    %48 = arith.mulf %43, %47 : vector<1x16x128xf32>
    %49 = tpu.concatenate %17, %30, %48 in 0 : vector<1x16x128xf32>, vector<8x16x128xf32>, vector<1x16x128xf32> -> vector<10x16x128xf32>
    %50 = arith.truncf %49 : vector<10x16x128xf32> to vector<10x16x128xbf16>
    %cst_25 = arith.constant 0.000000e+00 : bf16
    %51 = vector.broadcast %cst_25 : bf16 to vector<10x1x128xbf16>
    %52 = tpu.concatenate %51, %50, %51 in 1 : vector<10x1x128xbf16>, vector<10x16x128xbf16>, vector<10x1x128xbf16> -> vector<10x18x128xbf16>
    %53 = vector.extract_strided_slice %52 {offsets = [0, 0, 0], sizes = [8, 18, 128], strides = [1, 1, 1]} : vector<10x18x128xbf16> to vector<8x18x128xbf16>
    %54 = vector.extract_strided_slice %53 {offsets = [0, 0, 0], sizes = [8, 16, 128], strides = [1, 1, 1]} : vector<8x18x128xbf16> to vector<8x16x128xbf16>
    %55 = vector.extract_strided_slice %53 {offsets = [0, 1, 0], sizes = [8, 16, 128], strides = [1, 1, 1]} : vector<8x18x128xbf16> to vector<8x16x128xbf16>
    %56 = vector.extract_strided_slice %53 {offsets = [0, 2, 0], sizes = [8, 16, 128], strides = [1, 1, 1]} : vector<8x18x128xbf16> to vector<8x16x128xbf16>
    %57 = tpu.concatenate %54, %55, %56 in 2 : vector<8x16x128xbf16>, vector<8x16x128xbf16>, vector<8x16x128xbf16> -> vector<8x16x384xbf16>
    %58 = vector.shape_cast %57 : vector<8x16x384xbf16> to vector<128x384xbf16>
    %c0_26 = arith.constant 0 : index
    %c0_27 = arith.constant 0 : index
    %c0_28 = arith.constant 0 : index
    %59 = vector.load %arg7[%c0_26, %c0_27, %c0_28] : memref<3x384x128xbf16, #tpu.memory_space<vmem>>, vector<1x384x128xbf16>
    %60 = vector.shape_cast %59 : vector<1x384x128xbf16> to vector<384x128xbf16>
    %cst_29 = arith.constant dense<0.000000e+00> : vector<128x128xf32>
    %61 = tpu.matmul %58, %60, %cst_29 {dimension_numbers = #tpu.dot_dimension_numbers<[1], [0], [0], [1], [0, 0, 1, 1], [], []>} : vector<128x384xbf16>, vector<384x128xbf16>, vector<128x128xf32> -> vector<128x128xf32>
    %c0_30 = arith.constant 0 : index
    %c0_31 = arith.constant 0 : index
    %62 = vector.load %arg11[%c0_30, %c0_31] : memref<128x128xf32, #tpu.memory_space<vmem>>, vector<128x128xf32>
    tpu.vector_store %arg11[%c0_30, %c0_31], %61 {strides = array<i32>} : memref<128x128xf32, #tpu.memory_space<vmem>>, vector<128x128xf32>,
    %63 = vector.extract_strided_slice %52 {offsets = [1, 0, 0], sizes = [8, 18, 128], strides = [1, 1, 1]} : vector<10x18x128xbf16> to vector<8x18x128xbf16>
    %64 = vector.extract_strided_slice %63 {offsets = [0, 0, 0], sizes = [8, 16, 128], strides = [1, 1, 1]} : vector<8x18x128xbf16> to vector<8x16x128xbf16>
    %65 = vector.extract_strided_slice %63 {offsets = [0, 1, 0], sizes = [8, 16, 128], strides = [1, 1, 1]} : vector<8x18x128xbf16> to vector<8x16x128xbf16>
    %66 = vector.extract_strided_slice %63 {offsets = [0, 2, 0], sizes = [8, 16, 128], strides = [1, 1, 1]} : vector<8x18x128xbf16> to vector<8x16x128xbf16>
    %67 = tpu.concatenate %64, %65, %66 in 2 : vector<8x16x128xbf16>, vector<8x16x128xbf16>, vector<8x16x128xbf16> -> vector<8x16x384xbf16>
    %68 = vector.shape_cast %67 : vector<8x16x384xbf16> to vector<128x384xbf16>
    %c1 = arith.constant 1 : index
    %c0_32 = arith.constant 0 : index
    %c0_33 = arith.constant 0 : index
    %69 = vector.load %arg7[%c1, %c0_32, %c0_33] : memref<3x384x128xbf16, #tpu.memory_space<vmem>>, vector<1x384x128xbf16>
    %70 = vector.shape_cast %69 : vector<1x384x128xbf16> to vector<384x128xbf16>
    %cst_34 = arith.constant dense<0.000000e+00> : vector<128x128xf32>
    %71 = tpu.matmul %68, %70, %cst_34 {dimension_numbers = #tpu.dot_dimension_numbers<[1], [0], [0], [1], [0, 0, 1, 1], [], []>} : vector<128x384xbf16>, vector<384x128xbf16>, vector<128x128xf32> -> vector<128x128xf32>
    %c0_35 = arith.constant 0 : index
    %c0_36 = arith.constant 0 : index
    %72 = vector.load %arg11[%c0_35, %c0_36] : memref<128x128xf32, #tpu.memory_space<vmem>>, vector<128x128xf32>
    %73 = arith.addf %72, %71 : vector<128x128xf32>
    %c0_37 = arith.constant 0 : index
    %c0_38 = arith.constant 0 : index
    %74 = vector.load %arg11[%c0_37, %c0_38] : memref<128x128xf32, #tpu.memory_space<vmem>>, vector<128x128xf32>
    tpu.vector_store %arg11[%c0_37, %c0_38], %73 {strides = array<i32>} : memref<128x128xf32, #tpu.memory_space<vmem>>, vector<128x128xf32>,
    %75 = vector.extract_strided_slice %52 {offsets = [2, 0, 0], sizes = [8, 18, 128], strides = [1, 1, 1]} : vector<10x18x128xbf16> to vector<8x18x128xbf16>
    %76 = vector.extract_strided_slice %75 {offsets = [0, 0, 0], sizes = [8, 16, 128], strides = [1, 1, 1]} : vector<8x18x128xbf16> to vector<8x16x128xbf16>
    %77 = vector.extract_strided_slice %75 {offsets = [0, 1, 0], sizes = [8, 16, 128], strides = [1, 1, 1]} : vector<8x18x128xbf16> to vector<8x16x128xbf16>
    %78 = vector.extract_strided_slice %75 {offsets = [0, 2, 0], sizes = [8, 16, 128], strides = [1, 1, 1]} : vector<8x18x128xbf16> to vector<8x16x128xbf16>
    %79 = tpu.concatenate %76, %77, %78 in 2 : vector<8x16x128xbf16>, vector<8x16x128xbf16>, vector<8x16x128xbf16> -> vector<8x16x384xbf16>
    %80 = vector.shape_cast %79 : vector<8x16x384xbf16> to vector<128x384xbf16>
    %c2 = arith.constant 2 : index
    %c0_39 = arith.constant 0 : index
    %c0_40 = arith.constant 0 : index
    %81 = vector.load %arg7[%c2, %c0_39, %c0_40] : memref<3x384x128xbf16, #tpu.memory_space<vmem>>, vector<1x384x128xbf16>
    %82 = vector.shape_cast %81 : vector<1x384x128xbf16> to vector<384x128xbf16>
    %cst_41 = arith.constant dense<0.000000e+00> : vector<128x128xf32>
    %83 = tpu.matmul %80, %82, %cst_41 {dimension_numbers = #tpu.dot_dimension_numbers<[1], [0], [0], [1], [0, 0, 1, 1], [], []>} : vector<128x384xbf16>, vector<384x128xbf16>, vector<128x128xf32> -> vector<128x128xf32>
    %c0_42 = arith.constant 0 : index
    %c0_43 = arith.constant 0 : index
    %84 = vector.load %arg11[%c0_42, %c0_43] : memref<128x128xf32, #tpu.memory_space<vmem>>, vector<128x128xf32>
    %85 = arith.addf %84, %83 : vector<128x128xf32>
    %c0_44 = arith.constant 0 : index
    %c0_45 = arith.constant 0 : index
    %86 = vector.load %arg11[%c0_44, %c0_45] : memref<128x128xf32, #tpu.memory_space<vmem>>, vector<128x128xf32>
    tpu.vector_store %arg11[%c0_44, %c0_45], %85 {strides = array<i32>} : memref<128x128xf32, #tpu.memory_space<vmem>>, vector<128x128xf32>,
    %c0_46 = arith.constant 0 : index
    %c0_47 = arith.constant 0 : index
    %87 = vector.load %arg11[%c0_46, %c0_47] : memref<128x128xf32, #tpu.memory_space<vmem>>, vector<128x128xf32>
    %88 = arith.truncf %87 : vector<128x128xf32> to vector<128x128xbf16>
    %c0_48 = arith.constant 0 : index
    %c0_49 = arith.constant 0 : index
    %89 = vector.load %arg8[%c0_48, %c0_49] : memref<128x128xbf16, #tpu.memory_space<vmem>>, vector<128x128xbf16>
    tpu.vector_store %arg8[%c0_48, %c0_49], %88 {strides = array<i32>} : memref<128x128xbf16, #tpu.memory_space<vmem>>, vector<128x128xbf16>,
    %90 = arith.extf %88 : vector<128x128xbf16> to vector<128x128xf32>
    %cst_50 = arith.constant dense<0.000000e+00> : vector<128xf32>
    %91 = vector.multi_reduction <add>, %90, %cst_50 [0] : vector<128x128xf32> to vector<128xf32>
    %92 = vector.shape_cast %91 : vector<128xf32> to vector<1x128xf32>
    %c0_51 = arith.constant 0 : index
    %c0_52 = arith.constant 0 : index
    %c0_53 = arith.constant 0 : index
    %93 = vector.load %arg9[%c0_51, %c0_52, %c0_53] : memref<1x1x128xf32, #tpu.memory_space<vmem>>, vector<1x1x128xf32>
    %94 = vector.shape_cast %93 : vector<1x1x128xf32> to vector<1x128xf32>
    %95 = vector.shape_cast %92 : vector<1x128xf32> to vector<1x1x128xf32>
    tpu.vector_store %arg9[%c0_51, %c0_52, %c0_53], %95 {strides = array<i32>} : memref<1x1x128xf32, #tpu.memory_space<vmem>>, vector<1x1x128xf32>,
    %96 = arith.mulf %90, %90 : vector<128x128xf32>
    %cst_54 = arith.constant dense<0.000000e+00> : vector<128xf32>
    %97 = vector.multi_reduction <add>, %96, %cst_54 [0] : vector<128x128xf32> to vector<128xf32>
    %98 = vector.shape_cast %97 : vector<128xf32> to vector<1x128xf32>
    %c0_55 = arith.constant 0 : index
    %c0_56 = arith.constant 0 : index
    %c0_57 = arith.constant 0 : index
    %99 = vector.load %arg10[%c0_55, %c0_56, %c0_57] : memref<1x1x128xf32, #tpu.memory_space<vmem>>, vector<1x1x128xf32>
    %100 = vector.shape_cast %99 : vector<1x1x128xf32> to vector<1x128xf32>
    %101 = vector.shape_cast %98 : vector<1x128xf32> to vector<1x1x128xf32>
    tpu.vector_store %arg10[%c0_55, %c0_56, %c0_57], %101 {strides = array<i32>} : memref<1x1x128xf32, #tpu.memory_space<vmem>>, vector<1x1x128xf32>,
    return
  }
  func.func @transform_0(%arg0: i32, %arg1: i32) -> (i32, i32, i32, i32) {
    %c0_i32 = arith.constant 0 : i32
    %c0_i32_0 = arith.constant 0 : i32
    %c0_i32_1 = arith.constant 0 : i32
    return %arg0, %arg1, %c0_i32, %c0_i32_0 : i32, i32, i32, i32
  }
  func.func @transform_1(%arg0: i32, %arg1: i32) -> (i32, i32, i32, i32) {
    %c8_i32 = arith.constant 8 : i32
    %0 = arith.muli %arg1, %c8_i32 : i32
    %c1_i32 = arith.constant 1 : i32
    %1 = arith.subi %0, %c1_i32 : i32
    %c0_i32 = arith.constant 0 : i32
    %2 = arith.maxsi %1, %c0_i32 : i32
    %c0_i32_0 = arith.constant 0 : i32
    %c0_i32_1 = arith.constant 0 : i32
    %c0_i32_2 = arith.constant 0 : i32
    return %arg0, %2, %c0_i32_0, %c0_i32_1 : i32, i32, i32, i32
  }
  func.func @transform_2(%arg0: i32, %arg1: i32) -> (i32, i32, i32, i32) {
    %c1_i32 = arith.constant 1 : i32
    %0 = arith.addi %arg1, %c1_i32 : i32
    %c8_i32 = arith.constant 8 : i32
    %1 = arith.muli %0, %c8_i32 : i32
    %c15_i32 = arith.constant 15 : i32
    %2 = arith.minsi %1, %c15_i32 : i32
    %c0_i32 = arith.constant 0 : i32
    %c0_i32_0 = arith.constant 0 : i32
    %c0_i32_1 = arith.constant 0 : i32
    return %arg0, %2, %c0_i32, %c0_i32_0 : i32, i32, i32, i32
  }
  func.func @transform_3(%arg0: i32, %arg1: i32) -> (i32, i32) {
    %c0_i32 = arith.constant 0 : i32
    %c0_i32_0 = arith.constant 0 : i32
    %c0_i32_1 = arith.constant 0 : i32
    return %c0_i32, %c0_i32_0 : i32, i32
  }
  func.func @transform_4(%arg0: i32, %arg1: i32) -> (i32, i32) {
    %c0_i32 = arith.constant 0 : i32
    %c0_i32_0 = arith.constant 0 : i32
    %c0_i32_1 = arith.constant 0 : i32
    return %c0_i32, %c0_i32_0 : i32, i32
  }
  func.func @transform_5(%arg0: i32, %arg1: i32) -> (i32, i32, i32) {
    %c0_i32 = arith.constant 0 : i32
    %c0_i32_0 = arith.constant 0 : i32
    %c0_i32_1 = arith.constant 0 : i32
    %c0_i32_2 = arith.constant 0 : i32
    return %c0_i32, %c0_i32_0, %c0_i32_1 : i32, i32, i32
  }
  func.func @transform_6(%arg0: i32, %arg1: i32) -> (i32, i32) {
    %c2_i32 = arith.constant 2 : i32
    %0 = arith.muli %arg0, %c2_i32 : i32
    %1 = arith.addi %0, %arg1 : i32
    %c0_i32 = arith.constant 0 : i32
    %c0_i32_0 = arith.constant 0 : i32
    return %1, %c0_i32 : i32, i32
  }
  func.func @transform_7(%arg0: i32, %arg1: i32) -> (i32, i32, i32) {
    %c2_i32 = arith.constant 2 : i32
    %0 = arith.muli %arg0, %c2_i32 : i32
    %1 = arith.addi %0, %arg1 : i32
    %c0_i32 = arith.constant 0 : i32
    %c0_i32_0 = arith.constant 0 : i32
    %c0_i32_1 = arith.constant 0 : i32
    return %1, %c0_i32, %c0_i32_0 : i32, i32, i32
  }
  func.func @transform_8(%arg0: i32, %arg1: i32) -> (i32, i32, i32) {
    %c2_i32 = arith.constant 2 : i32
    %0 = arith.muli %arg0, %c2_i32 : i32
    %1 = arith.addi %0, %arg1 : i32
    %c0_i32 = arith.constant 0 : i32
    %c0_i32_0 = arith.constant 0 : i32
    %c0_i32_1 = arith.constant 0 : i32
    return %1, %c0_i32, %c0_i32_0 : i32, i32, i32
  }
}

module attributes {stable_mosaic.version = 11 : i64} {
  func.func @_bn_relu_gemm_stats_kernel(%arg0: i32, %arg1: memref<256x128xbf16, #tpu.memory_space<vmem>>, %arg2: memref<1x128xf32, #tpu.memory_space<vmem>>, %arg3: memref<1x128xf32, #tpu.memory_space<vmem>>, %arg4: memref<128x128xbf16, #tpu.memory_space<vmem>>, %arg5: memref<256x128xbf16, #tpu.memory_space<vmem>>, %arg6: memref<1x1x128xf32, #tpu.memory_space<vmem>>, %arg7: memref<1x1x128xf32, #tpu.memory_space<vmem>>) attributes {dimension_semantics = [#tpu.dimension_semantics<parallel>], iteration_bounds = array<i64: 2>, scalar_prefetch = 0 : i64, scratch_operands = 0 : i64, tpu.core_type = #tpu.core_type<tc>, window_params = [{transform_indices = @transform_0, window_bounds = array<i64: 256, 128>}, {pipeline_mode = #tpu.pipeline_mode<synchronous>, transform_indices = @transform_1, window_bounds = array<i64: 1, 128>}, {pipeline_mode = #tpu.pipeline_mode<synchronous>, transform_indices = @transform_2, window_bounds = array<i64: 1, 128>}, {pipeline_mode = #tpu.pipeline_mode<synchronous>, transform_indices = @transform_3, window_bounds = array<i64: 128, 128>}, {transform_indices = @transform_4, window_bounds = array<i64: 256, 128>}, {transform_indices = @transform_5, window_bounds = array<i64: 1, 1, 128>}, {transform_indices = @transform_6, window_bounds = array<i64: 1, 1, 128>}]} {
    %c0 = arith.constant 0 : index
    %c0_0 = arith.constant 0 : index
    %0 = vector.load %arg1[%c0, %c0_0] : memref<256x128xbf16, #tpu.memory_space<vmem>>, vector<256x128xbf16>
    %1 = arith.extf %0 : vector<256x128xbf16> to vector<256x128xf32>
    %c0_1 = arith.constant 0 : index
    %c0_2 = arith.constant 0 : index
    %2 = vector.load %arg2[%c0_1, %c0_2] : memref<1x128xf32, #tpu.memory_space<vmem>>, vector<1x128xf32>
    %3 = vector.broadcast %2 : vector<1x128xf32> to vector<256x128xf32>
    %4 = arith.mulf %1, %3 : vector<256x128xf32>
    %c0_3 = arith.constant 0 : index
    %c0_4 = arith.constant 0 : index
    %5 = vector.load %arg3[%c0_3, %c0_4] : memref<1x128xf32, #tpu.memory_space<vmem>>, vector<1x128xf32>
    %6 = vector.broadcast %5 : vector<1x128xf32> to vector<256x128xf32>
    %7 = arith.addf %4, %6 : vector<256x128xf32>
    %cst = arith.constant 0.000000e+00 : f32
    %8 = vector.broadcast %cst : f32 to vector<256x128xf32>
    %9 = arith.maximumf %7, %8 : vector<256x128xf32>
    %10 = arith.truncf %9 : vector<256x128xf32> to vector<256x128xbf16>
    %c0_5 = arith.constant 0 : index
    %c0_6 = arith.constant 0 : index
    %11 = vector.load %arg4[%c0_5, %c0_6] : memref<128x128xbf16, #tpu.memory_space<vmem>>, vector<128x128xbf16>
    %cst_7 = arith.constant dense<0.000000e+00> : vector<256x128xf32>
    %12 = tpu.matmul %10, %11, %cst_7 {dimension_numbers = #tpu.dot_dimension_numbers<[1], [0], [0], [1], [0, 0, 1, 1], [], []>} : vector<256x128xbf16>, vector<128x128xbf16>, vector<256x128xf32> -> vector<256x128xf32>
    %13 = arith.truncf %12 : vector<256x128xf32> to vector<256x128xbf16>
    %c0_8 = arith.constant 0 : index
    %c0_9 = arith.constant 0 : index
    %14 = vector.load %arg5[%c0_8, %c0_9] : memref<256x128xbf16, #tpu.memory_space<vmem>>, vector<256x128xbf16>
    tpu.vector_store %arg5[%c0_8, %c0_9], %13 {strides = array<i32>} : memref<256x128xbf16, #tpu.memory_space<vmem>>, vector<256x128xbf16>,
    %15 = arith.extf %13 : vector<256x128xbf16> to vector<256x128xf32>
    %cst_10 = arith.constant dense<0.000000e+00> : vector<128xf32>
    %16 = vector.multi_reduction <add>, %15, %cst_10 [0] : vector<256x128xf32> to vector<128xf32>
    %17 = vector.shape_cast %16 : vector<128xf32> to vector<1x128xf32>
    %c0_11 = arith.constant 0 : index
    %c0_12 = arith.constant 0 : index
    %c0_13 = arith.constant 0 : index
    %18 = vector.load %arg6[%c0_11, %c0_12, %c0_13] : memref<1x1x128xf32, #tpu.memory_space<vmem>>, vector<1x1x128xf32>
    %19 = vector.shape_cast %18 : vector<1x1x128xf32> to vector<1x128xf32>
    %20 = vector.shape_cast %17 : vector<1x128xf32> to vector<1x1x128xf32>
    tpu.vector_store %arg6[%c0_11, %c0_12, %c0_13], %20 {strides = array<i32>} : memref<1x1x128xf32, #tpu.memory_space<vmem>>, vector<1x1x128xf32>,
    %21 = arith.mulf %15, %15 : vector<256x128xf32>
    %cst_14 = arith.constant dense<0.000000e+00> : vector<128xf32>
    %22 = vector.multi_reduction <add>, %21, %cst_14 [0] : vector<256x128xf32> to vector<128xf32>
    %23 = vector.shape_cast %22 : vector<128xf32> to vector<1x128xf32>
    %c0_15 = arith.constant 0 : index
    %c0_16 = arith.constant 0 : index
    %c0_17 = arith.constant 0 : index
    %24 = vector.load %arg7[%c0_15, %c0_16, %c0_17] : memref<1x1x128xf32, #tpu.memory_space<vmem>>, vector<1x1x128xf32>
    %25 = vector.shape_cast %24 : vector<1x1x128xf32> to vector<1x128xf32>
    %26 = vector.shape_cast %23 : vector<1x128xf32> to vector<1x1x128xf32>
    tpu.vector_store %arg7[%c0_15, %c0_16, %c0_17], %26 {strides = array<i32>} : memref<1x1x128xf32, #tpu.memory_space<vmem>>, vector<1x1x128xf32>,
    return
  }
  func.func @transform_0(%arg0: i32) -> (i32, i32) {
    %c0_i32 = arith.constant 0 : i32
    %c0_i32_0 = arith.constant 0 : i32
    return %arg0, %c0_i32 : i32, i32
  }
  func.func @transform_1(%arg0: i32) -> (i32, i32) {
    %c0_i32 = arith.constant 0 : i32
    %c0_i32_0 = arith.constant 0 : i32
    %c0_i32_1 = arith.constant 0 : i32
    return %c0_i32, %c0_i32_0 : i32, i32
  }
  func.func @transform_2(%arg0: i32) -> (i32, i32) {
    %c0_i32 = arith.constant 0 : i32
    %c0_i32_0 = arith.constant 0 : i32
    %c0_i32_1 = arith.constant 0 : i32
    return %c0_i32, %c0_i32_0 : i32, i32
  }
  func.func @transform_3(%arg0: i32) -> (i32, i32) {
    %c0_i32 = arith.constant 0 : i32
    %c0_i32_0 = arith.constant 0 : i32
    %c0_i32_1 = arith.constant 0 : i32
    return %c0_i32, %c0_i32_0 : i32, i32
  }
  func.func @transform_4(%arg0: i32) -> (i32, i32) {
    %c0_i32 = arith.constant 0 : i32
    %c0_i32_0 = arith.constant 0 : i32
    return %arg0, %c0_i32 : i32, i32
  }
  func.func @transform_5(%arg0: i32) -> (i32, i32, i32) {
    %c0_i32 = arith.constant 0 : i32
    %c0_i32_0 = arith.constant 0 : i32
    %c0_i32_1 = arith.constant 0 : i32
    return %arg0, %c0_i32, %c0_i32_0 : i32, i32, i32
  }
  func.func @transform_6(%arg0: i32) -> (i32, i32, i32) {
    %c0_i32 = arith.constant 0 : i32
    %c0_i32_0 = arith.constant 0 : i32
    %c0_i32_1 = arith.constant 0 : i32
    return %arg0, %c0_i32, %c0_i32_0 : i32, i32, i32
  }
}

module attributes {stable_mosaic.version = 11 : i64} {
  func.func @_bn_residual_relu_kernel(%arg0: i32, %arg1: memref<512x128xbf16, #tpu.memory_space<vmem>>, %arg2: memref<1x128xf32, #tpu.memory_space<vmem>>, %arg3: memref<1x128xf32, #tpu.memory_space<vmem>>, %arg4: memref<512x128xbf16, #tpu.memory_space<vmem>>, %arg5: memref<512x128xf32, #tpu.memory_space<vmem>>) attributes {dimension_semantics = [#tpu.dimension_semantics<parallel>], iteration_bounds = array<i64: 1>, scalar_prefetch = 0 : i64, scratch_operands = 0 : i64, tpu.core_type = #tpu.core_type<tc>, window_params = [{transform_indices = @transform_0, window_bounds = array<i64: 512, 128>}, {pipeline_mode = #tpu.pipeline_mode<synchronous>, transform_indices = @transform_1, window_bounds = array<i64: 1, 128>}, {pipeline_mode = #tpu.pipeline_mode<synchronous>, transform_indices = @transform_2, window_bounds = array<i64: 1, 128>}, {transform_indices = @transform_3, window_bounds = array<i64: 512, 128>}, {transform_indices = @transform_4, window_bounds = array<i64: 512, 128>}]} {
    %c0 = arith.constant 0 : index
    %c0_0 = arith.constant 0 : index
    %0 = vector.load %arg1[%c0, %c0_0] : memref<512x128xbf16, #tpu.memory_space<vmem>>, vector<512x128xbf16>
    %1 = arith.extf %0 : vector<512x128xbf16> to vector<512x128xf32>
    %c0_1 = arith.constant 0 : index
    %c0_2 = arith.constant 0 : index
    %2 = vector.load %arg2[%c0_1, %c0_2] : memref<1x128xf32, #tpu.memory_space<vmem>>, vector<1x128xf32>
    %3 = vector.broadcast %2 : vector<1x128xf32> to vector<512x128xf32>
    %4 = arith.mulf %1, %3 : vector<512x128xf32>
    %c0_3 = arith.constant 0 : index
    %c0_4 = arith.constant 0 : index
    %5 = vector.load %arg3[%c0_3, %c0_4] : memref<1x128xf32, #tpu.memory_space<vmem>>, vector<1x128xf32>
    %6 = vector.broadcast %5 : vector<1x128xf32> to vector<512x128xf32>
    %7 = arith.addf %4, %6 : vector<512x128xf32>
    %c0_5 = arith.constant 0 : index
    %c0_6 = arith.constant 0 : index
    %8 = vector.load %arg4[%c0_5, %c0_6] : memref<512x128xbf16, #tpu.memory_space<vmem>>, vector<512x128xbf16>
    %9 = arith.extf %8 : vector<512x128xbf16> to vector<512x128xf32>
    %10 = arith.addf %7, %9 : vector<512x128xf32>
    %cst = arith.constant 0.000000e+00 : f32
    %11 = vector.broadcast %cst : f32 to vector<512x128xf32>
    %12 = arith.maximumf %10, %11 : vector<512x128xf32>
    %c0_7 = arith.constant 0 : index
    %c0_8 = arith.constant 0 : index
    %13 = vector.load %arg5[%c0_7, %c0_8] : memref<512x128xf32, #tpu.memory_space<vmem>>, vector<512x128xf32>
    tpu.vector_store %arg5[%c0_7, %c0_8], %12 {strides = array<i32>} : memref<512x128xf32, #tpu.memory_space<vmem>>, vector<512x128xf32>,
    return
  }
  func.func @transform_0(%arg0: i32) -> (i32, i32) {
    %c0_i32 = arith.constant 0 : i32
    %c0_i32_0 = arith.constant 0 : i32
    return %arg0, %c0_i32 : i32, i32
  }
  func.func @transform_1(%arg0: i32) -> (i32, i32) {
    %c0_i32 = arith.constant 0 : i32
    %c0_i32_0 = arith.constant 0 : i32
    %c0_i32_1 = arith.constant 0 : i32
    return %c0_i32, %c0_i32_0 : i32, i32
  }
  func.func @transform_2(%arg0: i32) -> (i32, i32) {
    %c0_i32 = arith.constant 0 : i32
    %c0_i32_0 = arith.constant 0 : i32
    %c0_i32_1 = arith.constant 0 : i32
    return %c0_i32, %c0_i32_0 : i32, i32
  }
  func.func @transform_3(%arg0: i32) -> (i32, i32) {
    %c0_i32 = arith.constant 0 : i32
    %c0_i32_0 = arith.constant 0 : i32
    return %arg0, %c0_i32 : i32, i32
  }
  func.func @transform_4(%arg0: i32) -> (i32, i32) {
    %c0_i32 = arith.constant 0 : i32
    %c0_i32_0 = arith.constant 0 : i32
    return %arg0, %c0_i32 : i32, i32
  }
}

</mosaic_0001>

<bundles_post_ra>
// kernel: bottleneck_forward.4
= control target key start
LH: loop header
LB: loop body
LE: loop exit
PB: predicated region body
PF: predicated region fallthrough
CT: control target
= control target key end

     0   :  { %s1100_s15 = smov 0   ;;  %s1310_s0 = inlined_call_operand.vmem [shape: bf16[512,128], index: 0, kind: input, shape index: {}]   ;;  %s1311_s1 = inlined_call_operand.vmem [shape: bf16[128,128], index: 1, kind: input, shape index: {}]   ;;  %s1312_s2 = inlined_call_operand.vmem [shape: bf16[512,128], index: 2, kind: output, shape index: {0}]   ;;  %s1313_s3 = inlined_call_operand.vmem [shape: f32[2,1,128], index: 3, kind: output, shape index: {1}]   ;;  %s1314_s4 = inlined_call_operand.vmem [shape: f32[2,1,128], index: 4, kind: output, shape index: {2}]  }
   0x1 LB: > { %s1106_s16 = sadd.s32 4294967295, %s1073_s15   ;;  %p813_p0 = scmp.ge.s32.totalorder %s1073_s15, 1  ;;  %s1073_s15 = sphi %s1100_s15, %s15_s15  }
   0x2   : > { %p168_p1 = scmp.lt.s32.totalorder %s1073_s15, 3 }
   0x4   : > { %p169_p2 = pnand %p813_p0, %p168_p1 }
   0x5   : > { %s814_s25 = sshll.u32 (!%p169_p2), %s1106_s16, 5  ;;  %p212_p4 = scmp.lt.s32.totalorder (!%p169_p2), %s1106_s16, 1 }
   0x6   : > { %172 = sbr.rel (%p169_p2) target bundleno = 294 (0x126), region = 28  ;;  %p201_p3 = scmp.lt.s32.totalorder (!%p169_p2), %s814_s25, 63 }
   0xb   : > { %v939_v0 = vld [vmem:[%s1311_s1 + $0x38] sm:$0xff]  ;;  %v938_v1 = vld [vmem:[%s1311_s1 + $0x30] sm:$0xff]  ;;  %v937_v2 = vld [vmem:[%s1311_s1 + $0x28] sm:$0xff]  ;;  %s1316_s25 = smov (!%p201_p3, %s814_s25), 63  ;;  %s1318_s16 = smov (!%p212_p4, %s1106_s16), 1 }
   0xc   : > { %410 = vmatpush.bf16.msra.mxu0 %v939_v0  ;;  %1035 = vmatpush.bf16.msra.mxu1 %v939_v0  ;;  %v936_v3 = vld [vmem:[%s1311_s1 + $0x20] sm:$0xff]  ;;  %v935_v4 = vld [vmem:[%s1311_s1 + $0x18] sm:$0xff]  ;;  %v934_v5 = vld [vmem:[%s1311_s1 + $0x10] sm:$0xff]  ;;  %s815_s6 = sshll.u32 %s1316_s25, 2  ;;  %s214_s19 = scalar_lea.vmem %s1313_s3, %s1318_s16 }
   0xd   : > { %1036 = vmatpush.bf16.msra.mxu2 %v939_v0  ;;  %1037 = vmatpush.bf16.msra.mxu3 %v939_v0  ;;  %v933_v6 = vld [vmem:[%s1311_s1 + $0x8] sm:$0xff]  ;;  %v932_v7 = vld [vmem:[%s1311_s1] sm:$0xff]  ;;  %s1143_s11 = scalar_lea.vmem %s1310_s0, %s815_s6  ;;  %s1170_s14 = scalar_lea.vmem %s1312_s2, %s815_s6 }
   0xe   : > { %v916_v8 = vld [vmem:[%s1143_s11] sm:$0xff]  ;;  %v917_v12 = vld [vmem:[%s1143_s11 + $0x8] sm:$0xff]  ;;  %v918_v16 = vld [vmem:[%s1143_s11 + $0x10] sm:$0xff]  ;;  %s217_s22 = scalar_lea.vmem %s1314_s4, %s1318_s16 }
   0xf   : > { %v920_v9 = vld [vmem:[%s1143_s11 + $0x20] sm:$0xff]  ;;  %v921_v13 = vld [vmem:[%s1143_s11 + $0x28] sm:$0xff]  ;;  %v922_v17 = vld [vmem:[%s1143_s11 + $0x30] sm:$0xff] }
  0x10   : > { %411 = vmatpush.bf16.msra.mxu0 %v938_v1  ;;  %1038 = vmatpush.bf16.msra.mxu1 %v938_v1  ;;  %v924_v10 = vld [vmem:[%s1143_s11 + $0x40] sm:$0xff]  ;;  %v925_v14 = vld [vmem:[%s1143_s11 + $0x48] sm:$0xff]  ;;  %v926_v18 = vld [vmem:[%s1143_s11 + $0x50] sm:$0xff] }
  0x11   : > { %1039 = vmatpush.bf16.msra.mxu2 %v938_v1  ;;  %1040 = vmatpush.bf16.msra.mxu3 %v938_v1  ;;  %v928_v11 = vld [vmem:[%s1143_s11 + $0x60] sm:$0xff]  ;;  %v929_v15 = vld [vmem:[%s1143_s11 + $0x68] sm:$0xff]  ;;  %v930_v19 = vld [vmem:[%s1143_s11 + $0x70] sm:$0xff] }
  0x12   : > { %v919_v20 = vld [vmem:[%s1143_s11 + $0x18] sm:$0xff] }
  0x13   : > { %v923_v21 = vld [vmem:[%s1143_s11 + $0x38] sm:$0xff] }
  0x14   : > { %412 = vmatpush.bf16.msra.mxu0 %v937_v2  ;;  %1041 = vmatpush.bf16.msra.mxu1 %v937_v2  ;;  %v927_v22 = vld [vmem:[%s1143_s11 + $0x58] sm:$0xff] }
  0x15   : > { %1042 = vmatpush.bf16.msra.mxu2 %v937_v2  ;;  %1043 = vmatpush.bf16.msra.mxu3 %v937_v2  ;;  %v931_v23 = vld [vmem:[%s1143_s11 + $0x78] sm:$0xff] }
  0x18   : > { %413 = vmatpush.bf16.msra.mxu0 %v936_v3  ;;  %1044 = vmatpush.bf16.msra.mxu1 %v936_v3 }
  0x19   : > { %1045 = vmatpush.bf16.msra.mxu2 %v936_v3  ;;  %1046 = vmatpush.bf16.msra.mxu3 %v936_v3 }
  0x1c   : > { %414 = vmatpush.bf16.msra.mxu0 %v935_v4  ;;  %1047 = vmatpush.bf16.msra.mxu1 %v935_v4 }
  0x1d   : > { %1048 = vmatpush.bf16.msra.mxu2 %v935_v4  ;;  %1049 = vmatpush.bf16.msra.mxu3 %v935_v4 }
  0x20   : > { %415 = vmatpush.bf16.msra.mxu0 %v934_v5  ;;  %1050 = vmatpush.bf16.msra.mxu1 %v934_v5 }
  0x21   : > { %1051 = vmatpush.bf16.msra.mxu2 %v934_v5  ;;  %1052 = vmatpush.bf16.msra.mxu3 %v934_v5 }
  0x24   : > { %416 = vmatpush.bf16.msra.mxu0 %v933_v6  ;;  %1053 = vmatpush.bf16.msra.mxu1 %v933_v6 }
  0x25   : > { %1054 = vmatpush.bf16.msra.mxu2 %v933_v6  ;;  %1055 = vmatpush.bf16.msra.mxu3 %v933_v6 }
  0x28   : > { %417 = vmatpush.bf16.msra.mxu0 %v932_v7  ;;  %1056 = vmatpush.bf16.msra.mxu1 %v932_v7 }
  0x29   : > { %1057 = vmatpush.bf16.msra.mxu2 %v932_v7  ;;  %1058 = vmatpush.bf16.msra.mxu3 %v932_v7 }
  0x2b   : > { %418 = vmatmul.bf16.vlgmr.msra.gmra.mxu0 %v916_v8  ;;  %438 = vmatmul.bf16.vlgmr.msra.gmra.mxu1 %v920_v9 }
  0x2c   : > { %458 = vmatmul.bf16.vlgmr.msra.gmra.mxu2 %v924_v10  ;;  %478 = vmatmul.bf16.vlgmr.msra.gmra.mxu3 %v928_v11 }
  0x3b   : > { %423 = vmatmul.bf16.gmra.mxu0 %v917_v12  ;;  %443 = vmatmul.bf16.gmra.mxu1 %v921_v13 }
  0x3c   : > { %463 = vmatmul.bf16.gmra.mxu2 %v925_v14  ;;  %483 = vmatmul.bf16.gmra.mxu3 %v929_v15 }
  0x4b   : > { %428 = vmatmul.bf16.gmra.mxu0 %v918_v16  ;;  %448 = vmatmul.bf16.gmra.mxu1 %v922_v17 }
  0x4c   : > { %468 = vmatmul.bf16.gmra.mxu2 %v926_v18  ;;  %488 = vmatmul.bf16.gmra.mxu3 %v930_v19 }
  0x5b   : > { %433 = vmatmul.bf16.gmra.mxu0 %v919_v20  ;;  %453 = vmatmul.bf16.gmra.mxu1 %v923_v21 }
  0x5c   : > { %473 = vmatmul.bf16.gmra.mxu2 %v927_v22  ;;  %493 = vmatmul.bf16.gmra.mxu3 %v931_v23 }
  0xa8   : > { %v419_v24 = vpop.f32.mrf.mxu0  ;;  %v1161_v25 = vpop.f32.mrf.mxu1 }
  0xa9   : > { %v499_v51 = vpack.c.bf16 %v419_v24, %v419_v24 }
  0xab   : > { %v563_v61 = vunpack.c.l.bf16 %v499_v51 }
  0xad   : > { %v633_v2 = vmul.f32 %v563_v61, %v563_v61 }
  0xaf   : > { %v1163_v26 = vpop.f32.mrf.mxu2  ;;  %v1176_v31 = vpop.f32.mrf.mxu3 }
  0xb0   : > { %v421_v27 = vpop.f32.mrf.mxu0  ;;  %v1172_v28 = vpop.f32.mrf.mxu1 }
  0xb1   : > { %v943_v29 = vpack.c.bf16 %v421_v27, %v419_v24  ;;  %v963_v30 = vpack.c.bf16 %v1172_v28, %v1161_v25  ;;  %v500_v50 = vpack.c.bf16 %v421_v27, %v421_v27  ;;  %v507_v24 = vpack.c.bf16 %v1161_v25, %v1161_v25 }
  0xb3   : > { %944 = vst [vmem:[%s1170_s14] sm:$0xff] %v943_v29   ;;  %v564_v59 = vunpack.c.l.bf16 %v500_v50  ;;  %v571_v50 = vunpack.c.l.bf16 %v507_v24 }
  0xb4   : > { %1023 = vst [vmem:[%s1170_s14 + $0x20] sm:$0xff] %v963_v30   ;;  %v508_v30 = vpack.c.bf16 %v1172_v28, %v1172_v28 }
  0xb5   : > { %v634_v0 = vmul.f32 %v564_v59, %v564_v59  ;;  %v595_v5 = vadd.f32 %v564_v59, %v563_v61 }
  0xb7   : > { %v1180_v32 = vpop.f32.mrf.mxu2  ;;  %v1186_v36 = vpop.f32.mrf.mxu3  ;;  %v665_v13 = vadd.f32 %v634_v0, %v633_v2 }
  0xb8   : > { %v424_v33 = vpop.f32.mrf.mxu0  ;;  %v1182_v34 = vpop.f32.mrf.mxu1  ;;  %v983_v35 = vpack.c.bf16 %v1180_v32, %v1163_v26  ;;  %v1003_v37 = vpack.c.bf16 %v1186_v36, %v1176_v31 }
  0xb9   : > { %v501_v53 = vpack.c.bf16 %v424_v33, %v424_v33  ;;  %v509_v25 = vpack.c.bf16 %v1182_v34, %v1182_v34 }
  0xba   : > { %1027 = vst [vmem:[%s1170_s14 + $0x40] sm:$0xff] %v983_v35  }
  0xbb   : > { %1031 = vst [vmem:[%s1170_s14 + $0x60] sm:$0xff] %v1003_v37   ;;  %v565_v62 = vunpack.c.l.bf16 %v501_v53  ;;  %v573_v61 = vunpack.c.l.bf16 %v509_v25 }
  0xbd   : > { %v635_v6 = vmul.f32 %v565_v62, %v565_v62  ;;  %v596_v14 = vadd.f32 %v595_v5, %v565_v62  ;;  %v641_v62 = vmul.f32 %v571_v50, %v571_v50 }
  0xbf   : > { %v1192_v38 = vpop.f32.mrf.mxu2  ;;  %v1198_v43 = vpop.f32.mrf.mxu3  ;;  %v666_v18 = vadd.f32 %v665_v13, %v635_v6 }
  0xc0   : > { %v426_v39 = vpop.f32.mrf.mxu0  ;;  %v1194_v40 = vpop.f32.mrf.mxu1 }
  0xc1   : > { %v948_v41 = vpack.c.bf16 %v426_v39, %v424_v33  ;;  %v968_v42 = vpack.c.bf16 %v1194_v40, %v1182_v34  ;;  %v502_v60 = vpack.c.bf16 %v426_v39, %v426_v39 }
  0xc3   : > { %1020 = vst [vmem:[%s1170_s14 + $0x8] sm:$0xff] %v948_v41   ;;  %v566_v1 = vunpack.c.l.bf16 %v502_v60 }
  0xc4   : > { %1024 = vst [vmem:[%s1170_s14 + $0x28] sm:$0xff] %v968_v42  }
  0xc5   : > { %v636_v15 = vmul.f32 %v566_v1, %v566_v1  ;;  %v597_v19 = vadd.f32 %v596_v14, %v566_v1 }
  0xc7   : > { %v1202_v44 = vpop.f32.mrf.mxu2  ;;  %v1208_v48 = vpop.f32.mrf.mxu3  ;;  %v667_v22 = vadd.f32 %v666_v18, %v636_v15 }
  0xc8   : > { %v429_v45 = vpop.f32.mrf.mxu0  ;;  %v1204_v46 = vpop.f32.mrf.mxu1  ;;  %v988_v47 = vpack.c.bf16 %v1202_v44, %v1192_v38  ;;  %v1008_v49 = vpack.c.bf16 %v1208_v48, %v1198_v43 }
  0xc9   : > { %v503_v63 = vpack.c.bf16 %v429_v45, %v429_v45 }
  0xca   : > { %1028 = vst [vmem:[%s1170_s14 + $0x48] sm:$0xff] %v988_v47  }
  0xcb   : > { %1032 = vst [vmem:[%s1170_s14 + $0x68] sm:$0xff] %v1008_v49   ;;  %v567_v7 = vunpack.c.l.bf16 %v503_v63  ;;  %v511_v63 = vpack.c.bf16 %v1204_v46, %v1204_v46 }
  0xcd   : > { %v637_v20 = vmul.f32 %v567_v7, %v567_v7  ;;  %v598_v23 = vadd.f32 %v597_v19, %v567_v7 }
  0xcf   : > { %v1214_v52 = vpop.f32.mrf.mxu2  ;;  %v1220_v58 = vpop.f32.mrf.mxu3  ;;  %v668_v33 = vadd.f32 %v667_v22, %v637_v20  ;;  %v515_v20 = vpack.c.bf16 %v1163_v26, %v1163_v26  ;;  %v518_v26 = vpack.c.bf16 %v1202_v44, %v1202_v44 }
  0xd0   : > { %v431_v54 = vpop.f32.mrf.mxu0  ;;  %v1216_v55 = vpop.f32.mrf.mxu1 }
  0xd1   : > { %v953_v56 = vpack.c.bf16 %v431_v54, %v429_v45  ;;  %v973_v57 = vpack.c.bf16 %v1216_v55, %v1204_v46  ;;  %v504_v3 = vpack.c.bf16 %v431_v54, %v431_v54  ;;  %v510_v54 = vpack.c.bf16 %v1194_v40, %v1194_v40 }
  0xd2   : > { %v512_v5 = vpack.c.bf16 %v1216_v55, %v1216_v55 }
  0xd3   : > { %1021 = vst [vmem:[%s1170_s14 + $0x10] sm:$0xff] %v953_v56   ;;  %v568_v17 = vunpack.c.l.bf16 %v504_v3  ;;  %v572_v56 = vunpack.c.l.bf16 %v508_v30  ;;  %v574_v2 = vunpack.c.l.bf16 %v510_v54 }
  0xd4   : > { %1025 = vst [vmem:[%s1170_s14 + $0x30] sm:$0xff] %v973_v57  }
  0xd5   : > { %v638_v27 = vmul.f32 %v568_v17, %v568_v17  ;;  %v599_v35 = vadd.f32 %v598_v23, %v568_v17  ;;  %v642_v3 = vmul.f32 %v572_v56, %v572_v56  ;;  %v576_v17 = vunpack.c.l.bf16 %v512_v5 }
  0xd7   : > { %v1224_v4 = vpop.f32.mrf.mxu2  ;;  %v1230_v12 = vpop.f32.mrf.mxu3  ;;  %v669_v51 = vadd.f32 %v668_v33, %v638_v27  ;;  %v516_v27 = vpack.c.bf16 %v1180_v32, %v1180_v32  ;;  %v646_v30 = vmul.f32 %v576_v17, %v576_v17 }
  0xd8   : > { %v434_v8 = vpop.f32.mrf.mxu0  ;;  %v1226_v9 = vpop.f32.mrf.mxu1  ;;  %v993_v10 = vpack.c.bf16 %v1224_v4, %v1214_v52  ;;  %v1013_v16 = vpack.c.bf16 %v1230_v12, %v1220_v58 }
  0xd9   : > { %v505_v11 = vpack.c.bf16 %v434_v8, %v434_v8  ;;  %v513_v15 = vpack.c.bf16 %v1226_v9, %v1226_v9 }
  0xda   : > { %1029 = vst [vmem:[%s1170_s14 + $0x50] sm:$0xff] %v993_v10   ;;  %v643_v10 = vmul.f32 %v573_v61, %v573_v61 }
  0xdb   : > { %1033 = vst [vmem:[%s1170_s14 + $0x70] sm:$0xff] %v1013_v16   ;;  %v569_v21 = vunpack.c.l.bf16 %v505_v11  ;;  %v575_v11 = vunpack.c.l.bf16 %v511_v63  ;;  %v644_v16 = vmul.f32 %v574_v2, %v574_v2  ;;  %v577_v22 = vunpack.c.l.bf16 %v513_v15 }
  0xdd   : > { %v639_v41 = vmul.f32 %v569_v21, %v569_v21  ;;  %v600_v53 = vadd.f32 %v599_v35, %v569_v21  ;;  %v645_v21 = vmul.f32 %v575_v11, %v575_v11 }
  0xdf   : > { %v1238_v29 = vpop.f32.mrf.mxu2  ;;  %v1243_v49 = vpop.f32.mrf.mxu3  ;;  %v670_v57 = vadd.f32 %v669_v51, %v639_v41  ;;  %v579_v41 = vunpack.c.l.bf16 %v515_v20 }
  0xe0   : > { %v436_v37 = vpop.f32.mrf.mxu0  ;;  %v456_v39 = vpop.f32.mrf.mxu1 }
  0xe1   : > { %v506_v42 = vpack.c.bf16 %v436_v37, %v436_v37  ;;  %v958_v45 = vpack.c.bf16 %v436_v37, %v434_v8  ;;  %v978_v47 = vpack.c.bf16 %v456_v39, %v1226_v9  ;;  %v514_v19 = vpack.c.bf16 %v456_v39, %v456_v39 }
  0xe2   : > { %v517_v37 = vpack.c.bf16 %v1192_v38, %v1192_v38  ;;  %v647_v39 = vmul.f32 %v577_v22, %v577_v22  ;;  %v649_v32 = vmul.f32 %v579_v41, %v579_v41 }
  0xe3   : > { %1022 = vst [vmem:[%s1170_s14 + $0x18] sm:$0xff] %v958_v45   ;;  %v570_v28 = vunpack.c.l.bf16 %v506_v42  ;;  %v578_v9 = vunpack.c.l.bf16 %v514_v19 }
  0xe4   : > { %1026 = vst [vmem:[%s1170_s14 + $0x38] sm:$0xff] %v978_v47   ;;  %v580_v47 = vunpack.c.l.bf16 %v516_v27 }
  0xe5   : > { %v601_v59 = vadd.f32 %v600_v53, %v570_v28  ;;  %v640_v60 = vmul.f32 %v570_v28, %v570_v28  ;;  %v648_v51 = vmul.f32 %v578_v9, %v578_v9  ;;  %v581_v53 = vunpack.c.l.bf16 %v517_v37 }
  0xe6   : > { %v519_v28 = vpack.c.bf16 %v1214_v52, %v1214_v52  ;;  %v650_v38 = vmul.f32 %v580_v47, %v580_v47  ;;  %v528_v37 = vpack.c.bf16 %v1230_v12, %v1230_v12 }
  0xe7   : > { %v602_v34 = vadd.f32 %v601_v59, %v571_v50  ;;  %v671_v0 = vadd.f32 %v670_v57, %v640_v60  ;;  %v1253_v1 = vpop.f32.mrf.mxu2  ;;  %v1259_v8 = vpop.f32.mrf.mxu3  ;;  %v582_v57 = vunpack.c.l.bf16 %v518_v26 }
  0xe8   : > { %v998_v40 = vpack.c.bf16 %v1253_v1, %v1238_v29  ;;  %v1018_v46 = vpack.c.bf16 %v1259_v8, %v1243_v49  ;;  %v583_v44 = vunpack.c.l.bf16 %v519_v28  ;;  %v522_v5 = vpack.c.bf16 %v1253_v1, %v1253_v1 }
  0xe9   : > { %v603_v6 = vadd.f32 %v602_v34, %v572_v56  ;;  %v672_v7 = vadd.f32 %v671_v0, %v641_v62  ;;  %v651_v62 = vmul.f32 %v581_v53, %v581_v53  ;;  %v521_v0 = vpack.c.bf16 %v1238_v29, %v1238_v29 }
  0xea   : > { %1030 = vst [vmem:[%s1170_s14 + $0x58] sm:$0xff] %v998_v40   ;;  %v586_v15 = vunpack.c.l.bf16 %v522_v5 }
  0xeb   : > { %v604_v13 = vadd.f32 %v603_v6, %v573_v61  ;;  %v673_v14 = vadd.f32 %v672_v7, %v642_v3  ;;  %1034 = vst [vmem:[%s1170_s14 + $0x78] sm:$0xff] %v1018_v46   ;;  %v520_v61 = vpack.c.bf16 %v1224_v4, %v1224_v4  ;;  %v523_v6 = vpack.c.bf16 %v1176_v31, %v1176_v31 }
  0xec   : > { %v653_v7 = vmul.f32 %v583_v44, %v583_v44  ;;  %v585_v46 = vunpack.c.l.bf16 %v521_v0  ;;  %v526_v31 = vpack.c.bf16 %v1208_v48, %v1208_v48 }
  0xed   : > { %v674_v18 = vadd.f32 %v673_v14, %v643_v10  ;;  %v605_v55 = vadd.f32 %v604_v13, %v574_v2  ;;  %v652_v2 = vmul.f32 %v582_v57, %v582_v57  ;;  %v584_v3 = vunpack.c.l.bf16 %v520_v61 }
  0xef   : > { %v606_v23 = vadd.f32 %v605_v55, %v575_v11  ;;  %v675_v24 = vadd.f32 %v674_v18, %v644_v16  ;;  %v524_v11 = vpack.c.bf16 %v1186_v36, %v1186_v36  ;;  %v654_v14 = vmul.f32 %v584_v3, %v584_v3 }
  0xf0   : > { %v525_v16 = vpack.c.bf16 %v1198_v43, %v1198_v43  ;;  %v655_v55 = vmul.f32 %v585_v46, %v585_v46 }
  0xf1   : > { %v607_v33 = vadd.f32 %v606_v23, %v576_v17  ;;  %v676_v35 = vadd.f32 %v675_v24, %v645_v21  ;;  %v587_v17 = vunpack.c.l.bf16 %v523_v6  ;;  %v588_v19 = vunpack.c.l.bf16 %v524_v11 }
  0xf2   : > { %v589_v23 = vunpack.c.l.bf16 %v525_v16  ;;  %v527_v24 = vpack.c.bf16 %v1220_v58, %v1220_v58 }
  0xf3   : > { %v608_v42 = vadd.f32 %v607_v33, %v577_v22  ;;  %v677_v45 = vadd.f32 %v676_v35, %v646_v30  ;;  %v656_v22 = vmul.f32 %v586_v15, %v586_v15  ;;  %v657_v36 = vmul.f32 %v587_v17, %v587_v17 }
  0xf4   : > { %v590_v33 = vunpack.c.l.bf16 %v526_v31  ;;  %v658_v43 = vmul.f32 %v588_v19, %v588_v19  ;;  %v591_v48 = vunpack.c.l.bf16 %v527_v24 }
  0xf5   : > { %v678_v25 = vadd.f32 %v677_v45, %v647_v39  ;;  %v609_v50 = vadd.f32 %v608_v42, %v578_v9  ;;  %v529_v45 = vpack.c.bf16 %v1243_v49, %v1243_v49 }
  0xf6   : > { %v660_v26 = vmul.f32 %v590_v33, %v590_v33 }
  0xf7   : > { %v610_v54 = vadd.f32 %v609_v50, %v579_v41  ;;  %v679_v56 = vadd.f32 %v678_v25, %v648_v51  ;;  %v659_v41 = vmul.f32 %v589_v23, %v589_v23  ;;  %v592_v25 = vunpack.c.l.bf16 %v528_v37 }
  0xf8   : > { %v530_v50 = vpack.c.bf16 %v1259_v8, %v1259_v8  ;;  %v661_v51 = vmul.f32 %v591_v48, %v591_v48  ;;  %v593_v28 = vunpack.c.l.bf16 %v529_v45 }
  0xf9   : > { %v611_v59 = vadd.f32 %v610_v54, %v580_v47  ;;  %v680_v60 = vadd.f32 %v679_v56, %v649_v32  ;;  %v662_v54 = vmul.f32 %v592_v25, %v592_v25 }
  0xfa   : > { %v663_v49 = vmul.f32 %v593_v28, %v593_v28 }
  0xfb   : > { %v612_v63 = vadd.f32 %v611_v59, %v581_v53  ;;  %v681_v34 = vadd.f32 %v680_v60, %v650_v38 }
  0xfd   : > { %v682_v40 = vadd.f32 %v681_v34, %v651_v62  ;;  %v613_v52 = vadd.f32 %v612_v63, %v582_v57  ;;  %v594_v57 = vunpack.c.l.bf16 %v530_v50 }
  0xff   : > { %v614_v10 = vadd.f32 %v613_v52, %v583_v44  ;;  %v683_v4 = vadd.f32 %v682_v40, %v652_v2  ;;  %v664_v62 = vmul.f32 %v594_v57, %v594_v57 }
 0x101   : > { %v615_v13 = vadd.f32 %v614_v10, %v584_v3  ;;  %v684_v29 = vadd.f32 %v683_v4, %v653_v7 }
 0x103   : > { %v685_v18 = vadd.f32 %v684_v29, %v654_v14  ;;  %v616_v1 = vadd.f32 %v615_v13, %v585_v46 }
 0x105   : > { %v686_v20 = vadd.f32 %v685_v18, %v655_v55  ;;  %v617_v21 = vadd.f32 %v616_v1, %v586_v15 }
 0x107   : > { %v618_v27 = vadd.f32 %v617_v21, %v587_v17  ;;  %v687_v30 = vadd.f32 %v686_v20, %v656_v22 }
 0x109   : > { %v619_v35 = vadd.f32 %v618_v27, %v588_v19  ;;  %v688_v9 = vadd.f32 %v687_v30, %v657_v36 }
 0x10b   : > { %v620_v42 = vadd.f32 %v619_v35, %v589_v23  ;;  %v689_v39 = vadd.f32 %v688_v9, %v658_v43 }
 0x10d   : > { %v690_v47 = vadd.f32 %v689_v39, %v659_v41  ;;  %v621_v58 = vadd.f32 %v620_v42, %v590_v33 }
 0x10f   : > { %v622_v53 = vadd.f32 %v621_v58, %v591_v48  ;;  %v691_v32 = vadd.f32 %v690_v47, %v660_v26 }
 0x111   : > { %v623_v12 = vadd.f32 %v622_v53, %v592_v25  ;;  %v692_v56 = vadd.f32 %v691_v32, %v661_v51 }
 0x113   : > { %v693_v38 = vadd.f32 %v692_v56, %v662_v54  ;;  %v624_v59 = vadd.f32 %v623_v12, %v593_v28 }
 0x115   : > { %v694_v60 = vadd.f32 %v693_v38, %v663_v49  ;;  %v625_v61 = vadd.f32 %v624_v59, %v594_v57 }
 0x117   : > { %v626_v44 = vrot.slane %v625_v61, 4  ;;  %v695_v63 = vadd.f32 %v694_v60, %v664_v62 }
 0x119   : > { %v627_v8 = vadd.f32 %v626_v44, %v625_v61  ;;  %v696_v34 = vrot.slane %v695_v63, 4 }
 0x11b   : > { %v628_v0 = vrot.slane %v627_v8, 2  ;;  %v697_v2 = vadd.f32 %v696_v34, %v695_v63 }
 0x11d   : > { %v629_v40 = vadd.f32 %v628_v0, %v627_v8  ;;  %v698_v3 = vrot.slane %v697_v2, 2 }
 0x11f   : > { %v630_v52 = vrot.slane %v629_v40, 1  ;;  %v699_v5 = vadd.f32 %v698_v3, %v697_v2 }
 0x121   : > { %v631_v6 = vadd.f32 %v630_v52, %v629_v40  ;;  %v700_v7 = vrot.slane %v699_v5, 1 }
 0x123   : > { %632 = vst [vmem:[%s214_s19] sm:$0x1] %v631_v6  ;;  %v701_v10 = vadd.f32 %v700_v7, %v699_v5 }
 0x125   : > { %702 = vst [vmem:[%s217_s22] sm:$0x1] %v701_v10 }
 0x126 PF: > { %s15_s15 = sadd.s32 1, %s1073_s15  }
 0x127   : > { %p12_p5 = scmp.ge.s32.totalorder %s15_s15, 4  }
 0x129   :  { %14 = sbr.rel (!%p12_p5) target bundleno = 1 (0x1), region = 82 }

// kernel: bottleneck_forward.6
= control target key start
LH: loop header
LB: loop body
LE: loop exit
PB: predicated region body
PF: predicated region fallthrough
CT: control target
= control target key end

     0   :  { %s1221_s21 = smov 0   ;;  %s1505_s0 = inlined_call_operand.vmem [shape: bf16[512,128], index: 0, kind: input, shape index: {}]   ;;  %s1506_s1 = inlined_call_operand.vmem [shape: f32[1,128], index: 1, kind: input, shape index: {}]   ;;  %s1507_s2 = inlined_call_operand.vmem [shape: f32[1,128], index: 2, kind: input, shape index: {}]   ;;  %s1508_s3 = inlined_call_operand.vmem [shape: bf16[128,128], index: 3, kind: input, shape index: {}]   ;;  %s1509_s4 = inlined_call_operand.vmem [shape: bf16[512,128], index: 4, kind: output, shape index: {0}]   ;;  %s1510_s5 = inlined_call_operand.vmem [shape: f32[2,1,128], index: 5, kind: output, shape index: {1}]   ;;  %s1511_s6 = inlined_call_operand.vmem [shape: f32[2,1,128], index: 6, kind: output, shape index: {2}]  }
   0x1 LB: > { %s1227_s22 = sadd.s32 4294967295, %s1184_s21   ;;  %p923_p0 = scmp.ge.s32.totalorder %s1184_s21, 1  ;;  %s1184_s21 = sphi %s1221_s21, %s17_s21  }
   0x2   : > { %p218_p1 = scmp.lt.s32.totalorder %s1184_s21, 3 }
   0x4   : > { %p219_p2 = pnand %p923_p0, %p218_p1 }
   0x5   : > { %s924_s25 = sshll.u32 (!%p219_p2), %s1227_s22, 5  ;;  %p266_p4 = scmp.lt.s32.totalorder (!%p219_p2), %s1227_s22, 1 }
   0x6   : > { %222 = sbr.rel (%p219_p2) target bundleno = 294 (0x126), region = 36  ;;  %p255_p3 = scmp.lt.s32.totalorder (!%p219_p2), %s924_s25, 63 }
   0xb   : > { %v969_v0 = vld [vmem:[%s1508_s3 + $0x38] sm:$0xff]  ;;  %v968_v1 = vld [vmem:[%s1508_s3 + $0x30] sm:$0xff]  ;;  %s1513_s25 = smov (!%p255_p3, %s924_s25), 63  ;;  %v967_v2 = vld [vmem:[%s1508_s3 + $0x28] sm:$0xff]  ;;  %s1515_s22 = smov (!%p266_p4, %s1227_s22), 1 }
   0xc   : > { %520 = vmatpush.bf16.msra.mxu0 %v969_v0  ;;  %1144 = vmatpush.bf16.msra.mxu1 %v969_v0  ;;  %s925_s28 = sshll.u32 %s1513_s25, 2  ;;  %v966_v4 = vld [vmem:[%s1508_s3 + $0x20] sm:$0xff]  ;;  %v965_v12 = vld [vmem:[%s1508_s3 + $0x18] sm:$0xff]  ;;  %v964_v20 = vld [vmem:[%s1508_s3 + $0x10] sm:$0xff]  ;;  %s268_s7 = scalar_lea.vmem %s1510_s5, %s1515_s22 }
   0xd   : > { %1145 = vmatpush.bf16.msra.mxu2 %v969_v0  ;;  %1146 = vmatpush.bf16.msra.mxu3 %v969_v0  ;;  %s1249_s9 = scalar_lea.vmem %s1505_s0, %s925_s28  ;;  %v1260_v9 = vld [vmem:[%s1506_s1] ss:$0 sm:$0xff]  ;;  %v963_v27 = vld [vmem:[%s1508_s3 + $0x8] sm:$0xff]  ;;  %s1365_s30 = scalar_lea.vmem %s1509_s4, %s925_s28 }
   0xe   : > { %v971_v3 = vld [vmem:[%s1249_s9] sm:$0xff]   ;;  %v1114_v32 = vld [vmem:[%s1249_s9 + $0x8] sm:$0xff]   ;;  %s271_s10 = scalar_lea.vmem %s1511_s6, %s1515_s22 }
   0xf   : > { %v1117_v5 = vld [vmem:[%s1249_s9 + $0x20] sm:$0xff]   ;;  %v972_v7 = vunpack.c.l.bf16 %v971_v3  ;;  %v973_v8 = vunpack.c.h.bf16 %v971_v3  ;;  %v1118_v36 = vld [vmem:[%s1249_s9 + $0x28] sm:$0xff]   ;;  %v976_v42 = vunpack.c.l.bf16 %v1114_v32  ;;  %v977_v45 = vunpack.c.h.bf16 %v1114_v32 }
  0x10   : > { %521 = vmatpush.bf16.msra.mxu0 %v968_v1  ;;  %1147 = vmatpush.bf16.msra.mxu1 %v968_v1  ;;  %v1121_v6 = vld [vmem:[%s1249_s9 + $0x40] sm:$0xff]   ;;  %v988_v10 = vunpack.c.l.bf16 %v1117_v5  ;;  %v989_v11 = vunpack.c.h.bf16 %v1117_v5  ;;  %v1122_v43 = vld [vmem:[%s1249_s9 + $0x48] sm:$0xff]   ;;  %v992_v46 = vunpack.c.l.bf16 %v1118_v36  ;;  %v993_v47 = vunpack.c.h.bf16 %v1118_v36 }
  0x11   : > { %1148 = vmatpush.bf16.msra.mxu2 %v968_v1  ;;  %1149 = vmatpush.bf16.msra.mxu3 %v968_v1  ;;  %v1004_v13 = vunpack.c.l.bf16 %v1121_v6  ;;  %v1005_v14 = vunpack.c.h.bf16 %v1121_v6  ;;  %v340_v15 = vmul.f32 %v1260_v9, %v972_v7  ;;  %v341_v16 = vmul.f32 %v1260_v9, %v973_v8  ;;  %v1270_v17 = vld [vmem:[%s1507_s2] ss:$0 sm:$0xff] }
  0x12   : > { %v348_v18 = vmul.f32 %v1260_v9, %v988_v10  ;;  %v349_v19 = vmul.f32 %v1260_v9, %v989_v11  ;;  %v1125_v33 = vld [vmem:[%s1249_s9 + $0x60] sm:$0xff]   ;;  %v1008_v53 = vunpack.c.l.bf16 %v1122_v43  ;;  %v1009_v54 = vunpack.c.h.bf16 %v1122_v43  ;;  %v1127_v43 = vld [vmem:[%s1249_s9 + $0x70] sm:$0xff]  }
  0x13   : > { %v356_v21 = vmul.f32 %v1260_v9, %v1004_v13  ;;  %v357_v22 = vmul.f32 %v1260_v9, %v1005_v14  ;;  %v376_v23 = vadd.f32 %v1270_v17, %v340_v15  ;;  %v377_v24 = vadd.f32 %v1270_v17, %v341_v16  ;;  %v962_v39 = vld [vmem:[%s1508_s3] sm:$0xff]  ;;  %v1115_v13 = vld [vmem:[%s1249_s9 + $0x10] sm:$0xff]  }
  0x14   : > { %522 = vmatpush.bf16.msra.mxu0 %v967_v2  ;;  %1150 = vmatpush.bf16.msra.mxu1 %v967_v2  ;;  %v384_v25 = vadd.f32 %v1270_v17, %v348_v18  ;;  %v385_v26 = vadd.f32 %v1270_v17, %v349_v19  ;;  %v1020_v37 = vunpack.c.l.bf16 %v1125_v33  ;;  %v1021_v38 = vunpack.c.h.bf16 %v1125_v33  ;;  %v1119_v19 = vld [vmem:[%s1249_s9 + $0x30] sm:$0xff]  }
  0x15   : > { %1151 = vmatpush.bf16.msra.mxu2 %v967_v2  ;;  %1152 = vmatpush.bf16.msra.mxu3 %v967_v2  ;;  %v392_v28 = vadd.f32 %v1270_v17, %v356_v21  ;;  %v393_v29 = vadd.f32 %v1270_v17, %v357_v22  ;;  %v408_v30 = vmax.f32 %v376_v23, 0.0  ;;  %v409_v31 = vmax.f32 %v377_v24, 0.0 }
  0x16   : > { %v416_v34 = vmax.f32 %v384_v25, 0.0  ;;  %v417_v35 = vmax.f32 %v385_v26, 0.0  ;;  %v364_v44 = vmul.f32 %v1260_v9, %v1020_v37  ;;  %v365_v48 = vmul.f32 %v1260_v9, %v1021_v38 }
  0x17   : > { %v424_v40 = vmax.f32 %v392_v28, 0.0  ;;  %v425_v41 = vmax.f32 %v393_v29, 0.0  ;;  %v440_v49 = vpack.c.bf16 %v409_v31, %v408_v30  ;;  %v342_v56 = vmul.f32 %v1260_v9, %v976_v42 }
  0x18   : > { %523 = vmatpush.bf16.msra.mxu0 %v966_v4  ;;  %1153 = vmatpush.bf16.msra.mxu1 %v966_v4  ;;  %v444_v50 = vpack.c.bf16 %v417_v35, %v416_v34  ;;  %v400_v51 = vadd.f32 %v1270_v17, %v364_v44  ;;  %v401_v55 = vadd.f32 %v1270_v17, %v365_v48  ;;  %v980_v25 = vunpack.c.l.bf16 %v1115_v13 }
  0x19   : > { %1154 = vmatpush.bf16.msra.mxu2 %v966_v4  ;;  %1155 = vmatpush.bf16.msra.mxu3 %v966_v4  ;;  %v448_v52 = vpack.c.bf16 %v425_v41, %v424_v40  ;;  %v343_v58 = vmul.f32 %v1260_v9, %v977_v45  ;;  %v350_v59 = vmul.f32 %v1260_v9, %v992_v46  ;;  %v981_v26 = vunpack.c.h.bf16 %v1115_v13 }
  0x1a   : > { %v432_v57 = vmax.f32 %v400_v51, 0.0  ;;  %v351_v60 = vmul.f32 %v1260_v9, %v993_v47  ;;  %v433_v61 = vmax.f32 %v401_v55, 0.0  ;;  %v358_v62 = vmul.f32 %v1260_v9, %v1008_v53 }
  0x1b   : > { %v359_v63 = vmul.f32 %v1260_v9, %v1009_v54  ;;  %v378_v1 = vadd.f32 %v1270_v17, %v342_v56  ;;  %v379_v2 = vadd.f32 %v1270_v17, %v343_v58  ;;  %v386_v3 = vadd.f32 %v1270_v17, %v350_v59 }
  0x1c   : > { %524 = vmatpush.bf16.msra.mxu0 %v965_v12  ;;  %1156 = vmatpush.bf16.msra.mxu1 %v965_v12  ;;  %v452_v0 = vpack.c.bf16 %v433_v61, %v432_v57  ;;  %v387_v4 = vadd.f32 %v1270_v17, %v351_v60  ;;  %v394_v5 = vadd.f32 %v1270_v17, %v358_v62  ;;  %v997_v28 = vunpack.c.h.bf16 %v1119_v19  ;;  %v1116_v60 = vld [vmem:[%s1249_s9 + $0x18] sm:$0xff]  }
  0x1d   : > { %1157 = vmatpush.bf16.msra.mxu2 %v965_v12  ;;  %1158 = vmatpush.bf16.msra.mxu3 %v965_v12  ;;  %v395_v6 = vadd.f32 %v1270_v17, %v359_v63  ;;  %v410_v7 = vmax.f32 %v378_v1, 0.0  ;;  %v411_v8 = vmax.f32 %v379_v2, 0.0  ;;  %v418_v10 = vmax.f32 %v386_v3, 0.0  ;;  %v1126_v12 = vld [vmem:[%s1249_s9 + $0x68] sm:$0xff]   ;;  %v1120_v63 = vld [vmem:[%s1249_s9 + $0x38] sm:$0xff]  }
  0x1e   : > { %v419_v11 = vmax.f32 %v387_v4, 0.0  ;;  %v1024_v14 = vunpack.c.l.bf16 %v1126_v12  ;;  %v1025_v15 = vunpack.c.h.bf16 %v1126_v12  ;;  %v426_v16 = vmax.f32 %v394_v5, 0.0 }
  0x1f   : > { %v427_v18 = vmax.f32 %v395_v6, 0.0  ;;  %v441_v23 = vpack.c.bf16 %v411_v8, %v410_v7  ;;  %v344_v36 = vmul.f32 %v1260_v9, %v980_v25  ;;  %v345_v37 = vmul.f32 %v1260_v9, %v981_v26 }
  0x20   : > { %525 = vmatpush.bf16.msra.mxu0 %v964_v20  ;;  %1159 = vmatpush.bf16.msra.mxu1 %v964_v20  ;;  %v366_v21 = vmul.f32 %v1260_v9, %v1024_v14  ;;  %v367_v22 = vmul.f32 %v1260_v9, %v1025_v15  ;;  %v445_v24 = vpack.c.bf16 %v419_v11, %v418_v10  ;;  %v1028_v44 = vunpack.c.l.bf16 %v1127_v43  ;;  %v1128_v10 = vld [vmem:[%s1249_s9 + $0x78] sm:$0xff]  }
  0x21   : > { %1160 = vmatpush.bf16.msra.mxu2 %v964_v20  ;;  %1161 = vmatpush.bf16.msra.mxu3 %v964_v20  ;;  %v1123_v20 = vld [vmem:[%s1249_s9 + $0x50] sm:$0xff]   ;;  %v449_v31 = vpack.c.bf16 %v427_v18, %v426_v16  ;;  %v1029_v45 = vunpack.c.h.bf16 %v1127_v43  ;;  %v380_v46 = vadd.f32 %v1270_v17, %v344_v36  ;;  %v381_v47 = vadd.f32 %v1270_v17, %v345_v37 }
  0x22   : > { %v402_v29 = vadd.f32 %v1270_v17, %v366_v21  ;;  %v403_v30 = vadd.f32 %v1270_v17, %v367_v22  ;;  %v1012_v32 = vunpack.c.l.bf16 %v1123_v20  ;;  %v1013_v33 = vunpack.c.h.bf16 %v1123_v20 }
  0x23   : > { %v369_v51 = vmul.f32 %v1260_v9, %v1029_v45  ;;  %v412_v54 = vmax.f32 %v380_v46, 0.0  ;;  %v413_v55 = vmax.f32 %v381_v47, 0.0  ;;  %v984_v2 = vunpack.c.l.bf16 %v1116_v60 }
  0x24   : > { %526 = vmatpush.bf16.msra.mxu0 %v963_v27  ;;  %1162 = vmatpush.bf16.msra.mxu1 %v963_v27  ;;  %v434_v34 = vmax.f32 %v402_v29, 0.0  ;;  %v435_v35 = vmax.f32 %v403_v30, 0.0  ;;  %v360_v41 = vmul.f32 %v1260_v9, %v1012_v32  ;;  %v361_v42 = vmul.f32 %v1260_v9, %v1013_v33 }
  0x25   : > { %1163 = vmatpush.bf16.msra.mxu2 %v963_v27  ;;  %1164 = vmatpush.bf16.msra.mxu3 %v963_v27  ;;  %v996_v27 = vunpack.c.l.bf16 %v1119_v19  ;;  %v405_v57 = vadd.f32 %v1270_v17, %v369_v51  ;;  %v442_v1 = vpack.c.bf16 %v413_v55, %v412_v54  ;;  %v985_v6 = vunpack.c.h.bf16 %v1116_v60 }
  0x26   : > { %v453_v40 = vpack.c.bf16 %v435_v35, %v434_v34  ;;  %v397_v53 = vadd.f32 %v1270_v17, %v361_v42  ;;  %v1000_v7 = vunpack.c.l.bf16 %v1120_v63  ;;  %v1001_v8 = vunpack.c.h.bf16 %v1120_v63 }
  0x27   : > { %v352_v38 = vmul.f32 %v1260_v9, %v996_v27  ;;  %v437_v4 = vmax.f32 %v405_v57, 0.0  ;;  %v346_v14 = vmul.f32 %v1260_v9, %v984_v2  ;;  %v1032_v16 = vunpack.c.l.bf16 %v1128_v10 }
  0x28   : > { %527 = vmatpush.bf16.msra.mxu0 %v962_v39  ;;  %1165 = vmatpush.bf16.msra.mxu1 %v962_v39  ;;  %v429_v62 = vmax.f32 %v397_v53, 0.0  ;;  %v1033_v18 = vunpack.c.h.bf16 %v1128_v10  ;;  %v347_v19 = vmul.f32 %v1260_v9, %v985_v6  ;;  %v354_v20 = vmul.f32 %v1260_v9, %v1000_v7 }
  0x29   : > { %1166 = vmatpush.bf16.msra.mxu2 %v962_v39  ;;  %1167 = vmatpush.bf16.msra.mxu3 %v962_v39  ;;  %v353_v39 = vmul.f32 %v1260_v9, %v997_v28  ;;  %v388_v48 = vadd.f32 %v1270_v17, %v352_v38  ;;  %v355_v21 = vmul.f32 %v1260_v9, %v1001_v8 }
  0x2a   : > { %v371_v25 = vmul.f32 %v1260_v9, %v1033_v18  ;;  %v382_v26 = vadd.f32 %v1270_v17, %v346_v14  ;;  %v383_v27 = vadd.f32 %v1270_v17, %v347_v19  ;;  %v390_v28 = vadd.f32 %v1270_v17, %v354_v20 }
  0x2b   : > { %528 = vmatmul.bf16.vlgmr.msra.gmra.mxu0 %v440_v49  ;;  %548 = vmatmul.bf16.vlgmr.msra.gmra.mxu1 %v444_v50  ;;  %v389_v49 = vadd.f32 %v1270_v17, %v353_v39  ;;  %v368_v50 = vmul.f32 %v1260_v9, %v1028_v44  ;;  %v420_v58 = vmax.f32 %v388_v48, 0.0  ;;  %v391_v29 = vadd.f32 %v1270_v17, %v355_v21 }
  0x2c   : > { %568 = vmatmul.bf16.vlgmr.msra.gmra.mxu2 %v448_v52  ;;  %588 = vmatmul.bf16.vlgmr.msra.gmra.mxu3 %v452_v0  ;;  %v396_v52 = vadd.f32 %v1270_v17, %v360_v41  ;;  %v1124_v0 = vld [vmem:[%s1249_s9 + $0x58] sm:$0xff]   ;;  %v407_v33 = vadd.f32 %v1270_v17, %v371_v25  ;;  %v414_v34 = vmax.f32 %v382_v26, 0.0  ;;  %v415_v35 = vmax.f32 %v383_v27, 0.0 }
  0x2d   : > { %v404_v56 = vadd.f32 %v1270_v17, %v368_v50  ;;  %v421_v59 = vmax.f32 %v389_v49, 0.0  ;;  %v1016_v12 = vunpack.c.l.bf16 %v1124_v0  ;;  %v1017_v13 = vunpack.c.h.bf16 %v1124_v0 }
  0x2e   : > { %v428_v61 = vmax.f32 %v396_v52, 0.0  ;;  %v422_v36 = vmax.f32 %v390_v28, 0.0  ;;  %v443_v41 = vpack.c.bf16 %v415_v35, %v414_v34 }
  0x2f   : > { %v436_v3 = vmax.f32 %v404_v56, 0.0  ;;  %v446_v5 = vpack.c.bf16 %v421_v59, %v420_v58  ;;  %v362_v22 = vmul.f32 %v1260_v9, %v1016_v12 }
  0x30   : > { %v450_v11 = vpack.c.bf16 %v429_v62, %v428_v61 }
  0x31   : > { %v454_v15 = vpack.c.bf16 %v437_v4, %v436_v3  ;;  %v398_v30 = vadd.f32 %v1270_v17, %v362_v22 }
  0x33   : > { %v430_v37 = vmax.f32 %v398_v30, 0.0 }
  0x3b   : > { %533 = vmatmul.bf16.gmra.mxu0 %v441_v23  ;;  %553 = vmatmul.bf16.gmra.mxu1 %v445_v24  ;;  %v363_v23 = vmul.f32 %v1260_v9, %v1017_v13  ;;  %v370_v24 = vmul.f32 %v1260_v9, %v1032_v16  ;;  %v423_v9 = vmax.f32 %v391_v29, 0.0 }
  0x3c   : > { %573 = vmatmul.bf16.gmra.mxu2 %v449_v31  ;;  %593 = vmatmul.bf16.gmra.mxu3 %v453_v40  ;;  %v439_v40 = vmax.f32 %v407_v33, 0.0 }
  0x3d   : > { %v399_v31 = vadd.f32 %v1270_v17, %v363_v23  ;;  %v406_v32 = vadd.f32 %v1270_v17, %v370_v24  ;;  %v447_v42 = vpack.c.bf16 %v423_v9, %v422_v36 }
  0x3f   : > { %v431_v38 = vmax.f32 %v399_v31, 0.0  ;;  %v438_v39 = vmax.f32 %v406_v32, 0.0 }
  0x41   : > { %v451_v43 = vpack.c.bf16 %v431_v38, %v430_v37  ;;  %v455_v44 = vpack.c.bf16 %v439_v40, %v438_v39 }
  0x4b   : > { %538 = vmatmul.bf16.gmra.mxu0 %v442_v1  ;;  %558 = vmatmul.bf16.gmra.mxu1 %v446_v5 }
  0x4c   : > { %578 = vmatmul.bf16.gmra.mxu2 %v450_v11  ;;  %598 = vmatmul.bf16.gmra.mxu3 %v454_v15 }
  0x5b   : > { %543 = vmatmul.bf16.gmra.mxu0 %v443_v41  ;;  %563 = vmatmul.bf16.gmra.mxu1 %v447_v42 }
  0x5c   : > { %583 = vmatmul.bf16.gmra.mxu2 %v451_v43  ;;  %603 = vmatmul.bf16.gmra.mxu3 %v455_v44 }
  0xa8   : > { %v529_v45 = vpop.f32.mrf.mxu0  ;;  %v1356_v46 = vpop.f32.mrf.mxu1 }
  0xa9   : > { %v609_v7 = vpack.c.bf16 %v529_v45, %v529_v45 }
  0xab   : > { %v673_v19 = vunpack.c.l.bf16 %v609_v7 }
  0xad   : > { %v743_v24 = vmul.f32 %v673_v19, %v673_v19 }
  0xaf   : > { %v1358_v17 = vpop.f32.mrf.mxu2  ;;  %v1371_v51 = vpop.f32.mrf.mxu3 }
  0xb0   : > { %v531_v47 = vpop.f32.mrf.mxu0  ;;  %v1367_v48 = vpop.f32.mrf.mxu1 }
  0xb1   : > { %v1037_v49 = vpack.c.bf16 %v531_v47, %v529_v45  ;;  %v1057_v50 = vpack.c.bf16 %v1367_v48, %v1356_v46  ;;  %v610_v6 = vpack.c.bf16 %v531_v47, %v531_v47  ;;  %v617_v45 = vpack.c.bf16 %v1356_v46, %v1356_v46 }
  0xb3   : > { %1038 = vst [vmem:[%s1365_s30] sm:$0xff] %v1037_v49   ;;  %v674_v16 = vunpack.c.l.bf16 %v610_v6  ;;  %v681_v6 = vunpack.c.l.bf16 %v617_v45 }
  0xb4   : > { %1132 = vst [vmem:[%s1365_s30 + $0x20] sm:$0xff] %v1057_v50   ;;  %v618_v50 = vpack.c.bf16 %v1367_v48, %v1367_v48 }
  0xb5   : > { %v744_v22 = vmul.f32 %v674_v16, %v674_v16  ;;  %v705_v27 = vadd.f32 %v674_v16, %v673_v19 }
  0xb7   : > { %v1375_v52 = vpop.f32.mrf.mxu2  ;;  %v1381_v56 = vpop.f32.mrf.mxu3  ;;  %v775_v35 = vadd.f32 %v744_v22, %v743_v24 }
  0xb8   : > { %v534_v53 = vpop.f32.mrf.mxu0  ;;  %v1377_v54 = vpop.f32.mrf.mxu1  ;;  %v1077_v55 = vpack.c.bf16 %v1375_v52, %v1358_v17  ;;  %v1097_v57 = vpack.c.bf16 %v1381_v56, %v1371_v51 }
  0xb9   : > { %v611_v10 = vpack.c.bf16 %v534_v53, %v534_v53  ;;  %v619_v46 = vpack.c.bf16 %v1377_v54, %v1377_v54 }
  0xba   : > { %1136 = vst [vmem:[%s1365_s30 + $0x40] sm:$0xff] %v1077_v55  }
  0xbb   : > { %1140 = vst [vmem:[%s1365_s30 + $0x60] sm:$0xff] %v1097_v57   ;;  %v675_v20 = vunpack.c.l.bf16 %v611_v10  ;;  %v683_v19 = vunpack.c.l.bf16 %v619_v46 }
  0xbd   : > { %v745_v28 = vmul.f32 %v675_v20, %v675_v20  ;;  %v706_v36 = vadd.f32 %v705_v27, %v675_v20  ;;  %v751_v20 = vmul.f32 %v681_v6, %v681_v6 }
  0xbf   : > { %v1387_v58 = vpop.f32.mrf.mxu2  ;;  %v1393_v63 = vpop.f32.mrf.mxu3  ;;  %v776_v39 = vadd.f32 %v775_v35, %v745_v28 }
  0xc0   : > { %v536_v59 = vpop.f32.mrf.mxu0  ;;  %v1389_v60 = vpop.f32.mrf.mxu1 }
  0xc1   : > { %v1042_v61 = vpack.c.bf16 %v536_v59, %v534_v53  ;;  %v1062_v62 = vpack.c.bf16 %v1389_v60, %v1377_v54  ;;  %v612_v18 = vpack.c.bf16 %v536_v59, %v536_v59 }
  0xc3   : > { %1129 = vst [vmem:[%s1365_s30 + $0x8] sm:$0xff] %v1042_v61   ;;  %v676_v23 = vunpack.c.l.bf16 %v612_v18 }
  0xc4   : > { %1133 = vst [vmem:[%s1365_s30 + $0x28] sm:$0xff] %v1062_v62  }
  0xc5   : > { %v746_v9 = vmul.f32 %v676_v23, %v676_v23  ;;  %v707_v40 = vadd.f32 %v706_v36, %v676_v23 }
  0xc7   : > { %v1397_v0 = vpop.f32.mrf.mxu2  ;;  %v1403_v4 = vpop.f32.mrf.mxu3  ;;  %v777_v43 = vadd.f32 %v776_v39, %v746_v9 }
  0xc8   : > { %v539_v1 = vpop.f32.mrf.mxu0  ;;  %v1399_v2 = vpop.f32.mrf.mxu1  ;;  %v1082_v3 = vpack.c.bf16 %v1397_v0, %v1387_v58  ;;  %v1102_v5 = vpack.c.bf16 %v1403_v4, %v1393_v63 }
  0xc9   : > { %v613_v21 = vpack.c.bf16 %v539_v1, %v539_v1 }
  0xca   : > { %1137 = vst [vmem:[%s1365_s30 + $0x48] sm:$0xff] %v1082_v3  }
  0xcb   : > { %1141 = vst [vmem:[%s1365_s30 + $0x68] sm:$0xff] %v1102_v5   ;;  %v677_v29 = vunpack.c.l.bf16 %v613_v21  ;;  %v621_v21 = vpack.c.bf16 %v1399_v2, %v1399_v2 }
  0xcd   : > { %v747_v41 = vmul.f32 %v677_v29, %v677_v29  ;;  %v708_v44 = vadd.f32 %v707_v40, %v677_v29 }
  0xcf   : > { %v1409_v8 = vpop.f32.mrf.mxu2  ;;  %v1415_v15 = vpop.f32.mrf.mxu3  ;;  %v778_v53 = vadd.f32 %v777_v43, %v747_v41  ;;  %v625_v41 = vpack.c.bf16 %v1358_v17, %v1358_v17  ;;  %v628_v17 = vpack.c.bf16 %v1397_v0, %v1397_v0 }
  0xd0   : > { %v541_v11 = vpop.f32.mrf.mxu0  ;;  %v1411_v12 = vpop.f32.mrf.mxu1 }
  0xd1   : > { %v1047_v13 = vpack.c.bf16 %v541_v11, %v539_v1  ;;  %v1067_v14 = vpack.c.bf16 %v1411_v12, %v1399_v2  ;;  %v614_v25 = vpack.c.bf16 %v541_v11, %v541_v11  ;;  %v620_v11 = vpack.c.bf16 %v1389_v60, %v1389_v60 }
  0xd2   : > { %v622_v27 = vpack.c.bf16 %v1411_v12, %v1411_v12 }
  0xd3   : > { %1130 = vst [vmem:[%s1365_s30 + $0x10] sm:$0xff] %v1047_v13   ;;  %v678_v38 = vunpack.c.l.bf16 %v614_v25  ;;  %v682_v13 = vunpack.c.l.bf16 %v618_v50  ;;  %v684_v24 = vunpack.c.l.bf16 %v620_v11 }
  0xd4   : > { %1134 = vst [vmem:[%s1365_s30 + $0x30] sm:$0xff] %v1067_v14  }
  0xd5   : > { %v748_v47 = vmul.f32 %v678_v38, %v678_v38  ;;  %v709_v55 = vadd.f32 %v708_v44, %v678_v38  ;;  %v752_v25 = vmul.f32 %v682_v13, %v682_v13  ;;  %v686_v38 = vunpack.c.l.bf16 %v622_v27 }
  0xd7   : > { %v1419_v26 = vpop.f32.mrf.mxu2  ;;  %v1425_v34 = vpop.f32.mrf.mxu3  ;;  %v779_v7 = vadd.f32 %v778_v53, %v748_v47  ;;  %v626_v47 = vpack.c.bf16 %v1375_v52, %v1375_v52  ;;  %v756_v50 = vmul.f32 %v686_v38, %v686_v38 }
  0xd8   : > { %v544_v30 = vpop.f32.mrf.mxu0  ;;  %v1421_v31 = vpop.f32.mrf.mxu1  ;;  %v1087_v32 = vpack.c.bf16 %v1419_v26, %v1409_v8  ;;  %v1107_v37 = vpack.c.bf16 %v1425_v34, %v1415_v15 }
  0xd9   : > { %v615_v33 = vpack.c.bf16 %v544_v30, %v544_v30  ;;  %v623_v9 = vpack.c.bf16 %v1421_v31, %v1421_v31 }
  0xda   : > { %1138 = vst [vmem:[%s1365_s30 + $0x50] sm:$0xff] %v1087_v32   ;;  %v753_v32 = vmul.f32 %v683_v19, %v683_v19 }
  0xdb   : > { %1142 = vst [vmem:[%s1365_s30 + $0x70] sm:$0xff] %v1107_v37   ;;  %v679_v42 = vunpack.c.l.bf16 %v615_v33  ;;  %v685_v33 = vunpack.c.l.bf16 %v621_v21  ;;  %v754_v37 = vmul.f32 %v684_v24, %v684_v24  ;;  %v687_v43 = vunpack.c.l.bf16 %v623_v9 }
  0xdd   : > { %v749_v61 = vmul.f32 %v679_v42, %v679_v42  ;;  %v710_v10 = vadd.f32 %v709_v55, %v679_v42  ;;  %v755_v42 = vmul.f32 %v685_v33, %v685_v33 }
  0xdf   : > { %v1433_v49 = vpop.f32.mrf.mxu2  ;;  %v1438_v5 = vpop.f32.mrf.mxu3  ;;  %v780_v14 = vadd.f32 %v779_v7, %v749_v61  ;;  %v689_v61 = vunpack.c.l.bf16 %v625_v41 }
  0xe0   : > { %v546_v57 = vpop.f32.mrf.mxu0  ;;  %v566_v59 = vpop.f32.mrf.mxu1 }
  0xe1   : > { %v616_v62 = vpack.c.bf16 %v546_v57, %v546_v57  ;;  %v1052_v1 = vpack.c.bf16 %v546_v57, %v544_v30  ;;  %v1072_v3 = vpack.c.bf16 %v566_v59, %v1421_v31  ;;  %v624_v40 = vpack.c.bf16 %v566_v59, %v566_v59 }
  0xe2   : > { %v627_v57 = vpack.c.bf16 %v1387_v58, %v1387_v58  ;;  %v757_v59 = vmul.f32 %v687_v43, %v687_v43  ;;  %v759_v52 = vmul.f32 %v689_v61, %v689_v61 }
  0xe3   : > { %1131 = vst [vmem:[%s1365_s30 + $0x18] sm:$0xff] %v1052_v1   ;;  %v680_v48 = vunpack.c.l.bf16 %v616_v62  ;;  %v688_v31 = vunpack.c.l.bf16 %v624_v40 }
  0xe4   : > { %1135 = vst [vmem:[%s1365_s30 + $0x38] sm:$0xff] %v1072_v3   ;;  %v690_v3 = vunpack.c.l.bf16 %v626_v47 }
  0xe5   : > { %v711_v16 = vadd.f32 %v710_v10, %v680_v48  ;;  %v750_v18 = vmul.f32 %v680_v48, %v680_v48  ;;  %v758_v7 = vmul.f32 %v688_v31, %v688_v31  ;;  %v691_v10 = vunpack.c.l.bf16 %v627_v57 }
  0xe6   : > { %v629_v48 = vpack.c.bf16 %v1409_v8, %v1409_v8  ;;  %v760_v58 = vmul.f32 %v690_v3, %v690_v3  ;;  %v638_v57 = vpack.c.bf16 %v1425_v34, %v1425_v34 }
  0xe7   : > { %v712_v54 = vadd.f32 %v711_v16, %v681_v6  ;;  %v781_v22 = vadd.f32 %v780_v14, %v750_v18  ;;  %v1448_v23 = vpop.f32.mrf.mxu2  ;;  %v1454_v30 = vpop.f32.mrf.mxu3  ;;  %v692_v14 = vunpack.c.l.bf16 %v628_v17 }
  0xe8   : > { %v1092_v60 = vpack.c.bf16 %v1448_v23, %v1433_v49  ;;  %v1112_v2 = vpack.c.bf16 %v1454_v30, %v1438_v5  ;;  %v693_v0 = vunpack.c.l.bf16 %v629_v48  ;;  %v632_v27 = vpack.c.bf16 %v1448_v23, %v1448_v23 }
  0xe9   : > { %v713_v28 = vadd.f32 %v712_v54, %v682_v13  ;;  %v782_v29 = vadd.f32 %v781_v22, %v751_v20  ;;  %v761_v20 = vmul.f32 %v691_v10, %v691_v10  ;;  %v631_v22 = vpack.c.bf16 %v1433_v49, %v1433_v49 }
  0xea   : > { %1139 = vst [vmem:[%s1365_s30 + $0x58] sm:$0xff] %v1092_v60   ;;  %v696_v9 = vunpack.c.l.bf16 %v632_v27 }
  0xeb   : > { %v714_v35 = vadd.f32 %v713_v28, %v683_v19  ;;  %v783_v36 = vadd.f32 %v782_v29, %v752_v25  ;;  %1143 = vst [vmem:[%s1365_s30 + $0x78] sm:$0xff] %v1112_v2   ;;  %v630_v19 = vpack.c.bf16 %v1419_v26, %v1419_v26  ;;  %v633_v28 = vpack.c.bf16 %v1371_v51, %v1371_v51 }
  0xec   : > { %v763_v29 = vmul.f32 %v693_v0, %v693_v0  ;;  %v695_v2 = vunpack.c.l.bf16 %v631_v22  ;;  %v636_v51 = vpack.c.bf16 %v1403_v4, %v1403_v4 }
  0xed   : > { %v784_v39 = vadd.f32 %v783_v36, %v753_v32  ;;  %v715_v12 = vadd.f32 %v714_v35, %v684_v24  ;;  %v762_v24 = vmul.f32 %v692_v14, %v692_v14  ;;  %v694_v25 = vunpack.c.l.bf16 %v630_v19 }
  0xef   : > { %v716_v44 = vadd.f32 %v715_v12, %v685_v33  ;;  %v785_v45 = vadd.f32 %v784_v39, %v754_v37  ;;  %v634_v33 = vpack.c.bf16 %v1381_v56, %v1381_v56  ;;  %v764_v36 = vmul.f32 %v694_v25, %v694_v25 }
  0xf0   : > { %v635_v37 = vpack.c.bf16 %v1393_v63, %v1393_v63  ;;  %v765_v12 = vmul.f32 %v695_v2, %v695_v2 }
  0xf1   : > { %v717_v53 = vadd.f32 %v716_v44, %v686_v38  ;;  %v786_v55 = vadd.f32 %v785_v45, %v755_v42  ;;  %v697_v38 = vunpack.c.l.bf16 %v633_v28  ;;  %v698_v40 = vunpack.c.l.bf16 %v634_v33 }
  0xf2   : > { %v699_v44 = vunpack.c.l.bf16 %v635_v37  ;;  %v637_v45 = vpack.c.bf16 %v1415_v15, %v1415_v15 }
  0xf3   : > { %v718_v62 = vadd.f32 %v717_v53, %v687_v43  ;;  %v787_v1 = vadd.f32 %v786_v55, %v756_v50  ;;  %v766_v43 = vmul.f32 %v696_v9, %v696_v9  ;;  %v767_v56 = vmul.f32 %v697_v38, %v697_v38 }
  0xf4   : > { %v700_v53 = vunpack.c.l.bf16 %v636_v51  ;;  %v768_v63 = vmul.f32 %v698_v40, %v698_v40  ;;  %v701_v4 = vunpack.c.l.bf16 %v637_v45 }
  0xf5   : > { %v788_v46 = vadd.f32 %v787_v1, %v757_v59  ;;  %v719_v6 = vadd.f32 %v718_v62, %v688_v31  ;;  %v639_v1 = vpack.c.bf16 %v1438_v5, %v1438_v5 }
  0xf6   : > { %v770_v17 = vmul.f32 %v700_v53, %v700_v53 }
  0xf7   : > { %v720_v11 = vadd.f32 %v719_v6, %v689_v61  ;;  %v789_v13 = vadd.f32 %v788_v46, %v758_v7  ;;  %v769_v61 = vmul.f32 %v699_v44, %v699_v44  ;;  %v702_v46 = vunpack.c.l.bf16 %v638_v57 }
  0xf8   : > { %v640_v6 = vpack.c.bf16 %v1454_v30, %v1454_v30  ;;  %v771_v7 = vmul.f32 %v701_v4, %v701_v4  ;;  %v703_v48 = vunpack.c.l.bf16 %v639_v1 }
  0xf9   : > { %v721_v16 = vadd.f32 %v720_v11, %v690_v3  ;;  %v790_v18 = vadd.f32 %v789_v13, %v759_v52  ;;  %v772_v11 = vmul.f32 %v702_v46, %v702_v46 }
  0xfa   : > { %v773_v5 = vmul.f32 %v703_v48, %v703_v48 }
  0xfb   : > { %v722_v21 = vadd.f32 %v721_v16, %v691_v10  ;;  %v791_v54 = vadd.f32 %v790_v18, %v760_v58 }
  0xfd   : > { %v792_v60 = vadd.f32 %v791_v54, %v761_v20  ;;  %v723_v8 = vadd.f32 %v722_v21, %v692_v14  ;;  %v704_v14 = vunpack.c.l.bf16 %v640_v6 }
  0xff   : > { %v724_v32 = vadd.f32 %v723_v8, %v693_v0  ;;  %v793_v26 = vadd.f32 %v792_v60, %v762_v24  ;;  %v774_v20 = vmul.f32 %v704_v14, %v704_v14 }
 0x101   : > { %v725_v35 = vadd.f32 %v724_v32, %v694_v25  ;;  %v794_v49 = vadd.f32 %v793_v26, %v763_v29 }
 0x103   : > { %v795_v39 = vadd.f32 %v794_v49, %v764_v36  ;;  %v726_v23 = vadd.f32 %v725_v35, %v695_v2 }
 0x105   : > { %v796_v41 = vadd.f32 %v795_v39, %v765_v12  ;;  %v727_v42 = vadd.f32 %v726_v23, %v696_v9 }
 0x107   : > { %v728_v47 = vadd.f32 %v727_v42, %v697_v38  ;;  %v797_v50 = vadd.f32 %v796_v41, %v766_v43 }
 0x109   : > { %v729_v55 = vadd.f32 %v728_v47, %v698_v40  ;;  %v798_v31 = vadd.f32 %v797_v50, %v767_v56 }
 0x10b   : > { %v730_v62 = vadd.f32 %v729_v55, %v699_v44  ;;  %v799_v59 = vadd.f32 %v798_v31, %v768_v63 }
 0x10d   : > { %v800_v3 = vadd.f32 %v799_v59, %v769_v61  ;;  %v731_v15 = vadd.f32 %v730_v62, %v700_v53 }
 0x10f   : > { %v732_v10 = vadd.f32 %v731_v15, %v701_v4  ;;  %v801_v52 = vadd.f32 %v800_v3, %v770_v17 }
 0x111   : > { %v733_v34 = vadd.f32 %v732_v10, %v702_v46  ;;  %v802_v13 = vadd.f32 %v801_v52, %v771_v7 }
 0x113   : > { %v803_v58 = vadd.f32 %v802_v13, %v772_v11  ;;  %v734_v16 = vadd.f32 %v733_v34, %v703_v48 }
 0x115   : > { %v804_v18 = vadd.f32 %v803_v58, %v773_v5  ;;  %v735_v19 = vadd.f32 %v734_v16, %v704_v14 }
 0x117   : > { %v736_v0 = vrot.slane %v735_v19, 4  ;;  %v805_v21 = vadd.f32 %v804_v18, %v774_v20 }
 0x119   : > { %v737_v30 = vadd.f32 %v736_v0, %v735_v19  ;;  %v806_v54 = vrot.slane %v805_v21, 4 }
 0x11b   : > { %v738_v22 = vrot.slane %v737_v30, 2  ;;  %v807_v24 = vadd.f32 %v806_v54, %v805_v21 }
 0x11d   : > { %v739_v60 = vadd.f32 %v738_v22, %v737_v30  ;;  %v808_v25 = vrot.slane %v807_v24, 2 }
 0x11f   : > { %v740_v8 = vrot.slane %v739_v60, 1  ;;  %v809_v27 = vadd.f32 %v808_v25, %v807_v24 }
 0x121   : > { %v741_v28 = vadd.f32 %v740_v8, %v739_v60  ;;  %v810_v29 = vrot.slane %v809_v27, 1 }
 0x123   : > { %742 = vst [vmem:[%s268_s7] sm:$0x1] %v741_v28  ;;  %v811_v32 = vadd.f32 %v810_v29, %v809_v27 }
 0x125   : > { %812 = vst [vmem:[%s271_s10] sm:$0x1] %v811_v32 }
 0x126 PF: > { %s17_s21 = sadd.s32 1, %s1184_s21  }
 0x127   : > { %p14_p5 = scmp.ge.s32.totalorder %s17_s21, 4  }
 0x129   :  { %16 = sbr.rel (!%p14_p5) target bundleno = 1 (0x1), region = 90 }

// kernel: bottleneck_forward.7
= control target key start
LH: loop header
LB: loop body
LE: loop exit
PB: predicated region body
PF: predicated region fallthrough
CT: control target
= control target key end

     0   :  { %s1472_s0 = inlined_call_operand.vmem [shape: bf16[512,128], index: 0, kind: input, shape index: {}]   ;;  %s1473_s1 = inlined_call_operand.vmem [shape: f32[1,128], index: 1, kind: input, shape index: {}]   ;;  %s1474_s2 = inlined_call_operand.vmem [shape: f32[1,128], index: 2, kind: input, shape index: {}]   ;;  %s1475_s3 = inlined_call_operand.vmem [shape: bf16[512,128], index: 3, kind: input, shape index: {}]   ;;  %s1476_s4 = inlined_call_operand.vmem [shape: f32[512,128], index: 4, kind: output, shape index: {}]  }
   0x1   :  { %v606_v0 = vld [vmem:[%s1472_s0] sm:$0xff]   ;;  %v861_v8 = vld [vmem:[%s1472_s0 + $0x8] sm:$0xff]   ;;  %v862_v10 = vld [vmem:[%s1472_s0 + $0x10] sm:$0xff]  }
   0x2   :  { %v956_v1 = vld [vmem:[%s1473_s1] ss:$0 sm:$0xff]  ;;  %v607_v2 = vunpack.c.l.bf16 %v606_v0  ;;  %v608_v5 = vunpack.c.h.bf16 %v606_v0  ;;  %v892_v9 = vld [vmem:[%s1475_s3 + $0x8] sm:$0xff]   ;;  %v611_v13 = vunpack.c.l.bf16 %v861_v8  ;;  %v893_v15 = vld [vmem:[%s1475_s3 + $0x10] sm:$0xff]   ;;  %v612_v17 = vunpack.c.h.bf16 %v861_v8 }
   0x3   :  { %v961_v3 = vld [vmem:[%s1474_s2] ss:$0 sm:$0xff]  ;;  %v739_v14 = vunpack.c.l.bf16 %v892_v9  ;;  %v863_v16 = vld [vmem:[%s1472_s0 + $0x18] sm:$0xff]   ;;  %v740_v18 = vunpack.c.h.bf16 %v892_v9  ;;  %v615_v19 = vunpack.c.l.bf16 %v862_v10  ;;  %v743_v20 = vunpack.c.l.bf16 %v893_v15  ;;  %v865_v52 = vld [vmem:[%s1472_s0 + $0x28] sm:$0xff]  }
   0x4   :  { %v734_v4 = vld [vmem:[%s1475_s3] sm:$0xff]   ;;  %v149_v11 = vmul.f32 %v956_v1, %v607_v2  ;;  %v150_v12 = vmul.f32 %v956_v1, %v608_v5  ;;  %v151_v23 = vmul.f32 %v956_v1, %v611_v13  ;;  %v616_v24 = vunpack.c.h.bf16 %v862_v10  ;;  %v894_v25 = vld [vmem:[%s1475_s3 + $0x18] sm:$0xff]   ;;  %v896_v57 = vld [vmem:[%s1475_s3 + $0x28] sm:$0xff]  }
   0x5   :  { %v735_v6 = vunpack.c.l.bf16 %v734_v4  ;;  %v736_v7 = vunpack.c.h.bf16 %v734_v4  ;;  %v152_v26 = vmul.f32 %v956_v1, %v612_v17  ;;  %v153_v27 = vmul.f32 %v956_v1, %v615_v19  ;;  %v864_v38 = vld [vmem:[%s1472_s0 + $0x20] sm:$0xff]   ;;  %v866_v62 = vld [vmem:[%s1472_s0 + $0x30] sm:$0xff]  }
   0x6   :  { %v217_v21 = vadd.f32 %v961_v3, %v149_v11  ;;  %v218_v22 = vadd.f32 %v961_v3, %v150_v12  ;;  %v744_v28 = vunpack.c.h.bf16 %v893_v15  ;;  %v619_v29 = vunpack.c.l.bf16 %v863_v16  ;;  %v895_v47 = vld [vmem:[%s1475_s3 + $0x20] sm:$0xff]   ;;  %v897_v5 = vld [vmem:[%s1475_s3 + $0x30] sm:$0xff]  }
   0x7   :  { %v219_v32 = vadd.f32 %v961_v3, %v151_v23  ;;  %v154_v33 = vmul.f32 %v956_v1, %v616_v24  ;;  %v220_v34 = vadd.f32 %v961_v3, %v152_v26  ;;  %v221_v35 = vadd.f32 %v961_v3, %v153_v27  ;;  %v898_v23 = vld [vmem:[%s1475_s3 + $0x38] sm:$0xff]  }
   0x8   :  { %v409_v30 = vadd.f32 %v735_v6, %v217_v21  ;;  %v410_v31 = vadd.f32 %v736_v7, %v218_v22  ;;  %v155_v36 = vmul.f32 %v956_v1, %v619_v29  ;;  %v747_v37 = vunpack.c.l.bf16 %v894_v25 }
   0x9   :  { %v411_v41 = vadd.f32 %v739_v14, %v219_v32  ;;  %v222_v42 = vadd.f32 %v961_v3, %v154_v33  ;;  %v412_v43 = vadd.f32 %v740_v18, %v220_v34  ;;  %v413_v44 = vadd.f32 %v743_v20, %v221_v35  ;;  %v867_v18 = vld [vmem:[%s1472_s0 + $0x38] sm:$0xff]   ;;  %v868_v32 = vld [vmem:[%s1472_s0 + $0x40] sm:$0xff]  }
   0xa   :  { %v473_v39 = vmax.f32 %v409_v30, 0.0  ;;  %v474_v40 = vmax.f32 %v410_v31, 0.0  ;;  %v223_v45 = vadd.f32 %v961_v3, %v155_v36  ;;  %v620_v46 = vunpack.c.h.bf16 %v863_v16 }
   0xb   :  { %v475_v48 = vmax.f32 %v411_v41, 0.0  ;;  %v414_v49 = vadd.f32 %v744_v28, %v222_v42  ;;  %v748_v50 = vunpack.c.h.bf16 %v894_v25  ;;  %v623_v51 = vunpack.c.l.bf16 %v864_v38 }
   0xc   :  { %537 = vst [vmem:[%s1476_s4] sm:$0xff] %v473_v39  ;;  %v476_v53 = vmax.f32 %v412_v43, 0.0  ;;  %v477_v54 = vmax.f32 %v413_v44, 0.0  ;;  %v415_v55 = vadd.f32 %v747_v37, %v223_v45  ;;  %v156_v56 = vmul.f32 %v956_v1, %v620_v46  ;;  %v899_v37 = vld [vmem:[%s1475_s3 + $0x40] sm:$0xff]   ;;  %v869_v46 = vld [vmem:[%s1472_s0 + $0x48] sm:$0xff]  }
   0xd   :  { %538 = vst [vmem:[%s1476_s4 + $0x8] sm:$0xff] %v474_v40  ;;  %v478_v58 = vmax.f32 %v414_v49, 0.0  ;;  %v157_v59 = vmul.f32 %v956_v1, %v623_v51  ;;  %v751_v60 = vunpack.c.l.bf16 %v895_v47  ;;  %v624_v61 = vunpack.c.h.bf16 %v864_v38 }
   0xe   :  { %539 = vst [vmem:[%s1476_s4 + $0x10] sm:$0xff] %v475_v48  ;;  %v479_v63 = vmax.f32 %v415_v55, 0.0  ;;  %v224_v0 = vadd.f32 %v961_v3, %v156_v56  ;;  %v752_v2 = vunpack.c.h.bf16 %v895_v47  ;;  %v627_v4 = vunpack.c.l.bf16 %v865_v52  ;;  %v900_v47 = vld [vmem:[%s1475_s3 + $0x48] sm:$0xff]   ;;  %v870_v56 = vld [vmem:[%s1472_s0 + $0x50] sm:$0xff]  }
   0xf   :  { %540 = vst [vmem:[%s1476_s4 + $0x18] sm:$0xff] %v476_v53  ;;  %v225_v6 = vadd.f32 %v961_v3, %v157_v59  ;;  %v158_v7 = vmul.f32 %v956_v1, %v624_v61  ;;  %v755_v8 = vunpack.c.l.bf16 %v896_v57  ;;  %v628_v9 = vunpack.c.h.bf16 %v865_v52 }
  0x10   :  { %541 = vst [vmem:[%s1476_s4 + $0x20] sm:$0xff] %v477_v54  ;;  %v416_v10 = vadd.f32 %v748_v50, %v224_v0  ;;  %v159_v11 = vmul.f32 %v956_v1, %v627_v4  ;;  %v756_v12 = vunpack.c.h.bf16 %v896_v57  ;;  %v631_v13 = vunpack.c.l.bf16 %v866_v62 }
  0x11   :  { %542 = vst [vmem:[%s1476_s4 + $0x28] sm:$0xff] %v478_v58  ;;  %v417_v14 = vadd.f32 %v751_v60, %v225_v6  ;;  %v226_v15 = vadd.f32 %v961_v3, %v158_v7  ;;  %v160_v16 = vmul.f32 %v956_v1, %v628_v9  ;;  %v759_v17 = vunpack.c.l.bf16 %v897_v5 }
  0x12   :  { %543 = vst [vmem:[%s1476_s4 + $0x30] sm:$0xff] %v479_v63  ;;  %v480_v19 = vmax.f32 %v416_v10, 0.0  ;;  %v227_v20 = vadd.f32 %v961_v3, %v159_v11  ;;  %v161_v21 = vmul.f32 %v956_v1, %v631_v13  ;;  %v632_v22 = vunpack.c.h.bf16 %v866_v62 }
  0x13   :  { %v481_v24 = vmax.f32 %v417_v14, 0.0  ;;  %v418_v25 = vadd.f32 %v752_v2, %v226_v15  ;;  %v228_v26 = vadd.f32 %v961_v3, %v160_v16  ;;  %v760_v27 = vunpack.c.h.bf16 %v897_v5  ;;  %v901_v2 = vld [vmem:[%s1475_s3 + $0x50] sm:$0xff]  }
  0x14   :  { %544 = vst [vmem:[%s1476_s4 + $0x38] sm:$0xff] %v480_v19  ;;  %v419_v28 = vadd.f32 %v755_v8, %v227_v20  ;;  %v229_v29 = vadd.f32 %v961_v3, %v161_v21  ;;  %v162_v30 = vmul.f32 %v956_v1, %v632_v22  ;;  %v635_v31 = vunpack.c.l.bf16 %v867_v18 }
  0x15   :  { %545 = vst [vmem:[%s1476_s4 + $0x40] sm:$0xff] %v481_v24  ;;  %v482_v33 = vmax.f32 %v418_v25, 0.0  ;;  %v420_v34 = vadd.f32 %v756_v12, %v228_v26  ;;  %v763_v35 = vunpack.c.l.bf16 %v898_v23  ;;  %v636_v36 = vunpack.c.h.bf16 %v867_v18  ;;  %v871_v12 = vld [vmem:[%s1472_s0 + $0x58] sm:$0xff]   ;;  %v872_v26 = vld [vmem:[%s1472_s0 + $0x60] sm:$0xff]  }
  0x16   :  { %v483_v38 = vmax.f32 %v419_v28, 0.0  ;;  %v421_v39 = vadd.f32 %v759_v17, %v229_v29  ;;  %v230_v40 = vadd.f32 %v961_v3, %v162_v30  ;;  %v163_v41 = vmul.f32 %v956_v1, %v635_v31  ;;  %v902_v17 = vld [vmem:[%s1475_s3 + $0x58] sm:$0xff]   ;;  %v903_v31 = vld [vmem:[%s1475_s3 + $0x60] sm:$0xff]  }
  0x17   :  { %546 = vst [vmem:[%s1476_s4 + $0x48] sm:$0xff] %v482_v33  ;;  %v484_v42 = vmax.f32 %v420_v34, 0.0  ;;  %v164_v43 = vmul.f32 %v956_v1, %v636_v36  ;;  %v764_v44 = vunpack.c.h.bf16 %v898_v23  ;;  %v639_v45 = vunpack.c.l.bf16 %v868_v32 }
  0x18   :  { %547 = vst [vmem:[%s1476_s4 + $0x50] sm:$0xff] %v483_v38  ;;  %v485_v48 = vmax.f32 %v421_v39, 0.0  ;;  %v422_v49 = vadd.f32 %v760_v27, %v230_v40  ;;  %v231_v50 = vadd.f32 %v961_v3, %v163_v41  ;;  %v767_v51 = vunpack.c.l.bf16 %v899_v37  ;;  %v873_v40 = vld [vmem:[%s1472_s0 + $0x68] sm:$0xff]  }
  0x19   :  { %548 = vst [vmem:[%s1476_s4 + $0x58] sm:$0xff] %v484_v42  ;;  %v232_v52 = vadd.f32 %v961_v3, %v164_v43  ;;  %v165_v53 = vmul.f32 %v956_v1, %v639_v45  ;;  %v640_v54 = vunpack.c.h.bf16 %v868_v32  ;;  %v768_v55 = vunpack.c.h.bf16 %v899_v37  ;;  %v904_v41 = vld [vmem:[%s1475_s3 + $0x68] sm:$0xff]  }
  0x1a   :  { %549 = vst [vmem:[%s1476_s4 + $0x60] sm:$0xff] %v485_v48  ;;  %v486_v57 = vmax.f32 %v422_v49, 0.0  ;;  %v423_v58 = vadd.f32 %v763_v35, %v231_v50  ;;  %v643_v59 = vunpack.c.l.bf16 %v869_v46  ;;  %v771_v60 = vunpack.c.l.bf16 %v900_v47  ;;  %v874_v50 = vld [vmem:[%s1472_s0 + $0x70] sm:$0xff]  }
  0x1b   :  { %v424_v61 = vadd.f32 %v764_v44, %v232_v52  ;;  %v233_v62 = vadd.f32 %v961_v3, %v165_v53  ;;  %v166_v63 = vmul.f32 %v956_v1, %v640_v54  ;;  %v644_v0 = vunpack.c.h.bf16 %v869_v46 }
  0x1c   :  { %550 = vst [vmem:[%s1476_s4 + $0x68] sm:$0xff] %v486_v57  ;;  %v487_v4 = vmax.f32 %v423_v58, 0.0  ;;  %v167_v5 = vmul.f32 %v956_v1, %v643_v59  ;;  %v772_v6 = vunpack.c.h.bf16 %v900_v47  ;;  %v647_v7 = vunpack.c.l.bf16 %v870_v56  ;;  %v905_v59 = vld [vmem:[%s1475_s3 + $0x70] sm:$0xff]  }
  0x1d   :  { %v488_v8 = vmax.f32 %v424_v61, 0.0  ;;  %v425_v9 = vadd.f32 %v767_v51, %v233_v62  ;;  %v234_v10 = vadd.f32 %v961_v3, %v166_v63  ;;  %v168_v11 = vmul.f32 %v956_v1, %v644_v0 }
  0x1e   :  { %551 = vst [vmem:[%s1476_s4 + $0x70] sm:$0xff] %v487_v4  ;;  %v235_v13 = vadd.f32 %v961_v3, %v167_v5  ;;  %v169_v14 = vmul.f32 %v956_v1, %v647_v7  ;;  %v775_v15 = vunpack.c.l.bf16 %v901_v2  ;;  %v648_v16 = vunpack.c.h.bf16 %v870_v56 }
  0x1f   :  { %552 = vst [vmem:[%s1476_s4 + $0x78] sm:$0xff] %v488_v8  ;;  %v489_v18 = vmax.f32 %v425_v9, 0.0  ;;  %v426_v19 = vadd.f32 %v768_v55, %v234_v10  ;;  %v236_v20 = vadd.f32 %v961_v3, %v168_v11  ;;  %v776_v21 = vunpack.c.h.bf16 %v901_v2  ;;  %v906_v11 = vld [vmem:[%s1475_s3 + $0x78] sm:$0xff]  }
  0x20   :  { %v427_v22 = vadd.f32 %v771_v60, %v235_v13  ;;  %v237_v23 = vadd.f32 %v961_v3, %v169_v14  ;;  %v170_v24 = vmul.f32 %v956_v1, %v648_v16  ;;  %v651_v25 = vunpack.c.l.bf16 %v871_v12 }
  0x21   :  { %553 = vst [vmem:[%s1476_s4 + $0x80] sm:$0xff] %v489_v18  ;;  %v490_v27 = vmax.f32 %v426_v19, 0.0  ;;  %v428_v28 = vadd.f32 %v772_v6, %v236_v20  ;;  %v779_v29 = vunpack.c.l.bf16 %v902_v17  ;;  %v652_v30 = vunpack.c.h.bf16 %v871_v12  ;;  %v875_v6 = vld [vmem:[%s1472_s0 + $0x78] sm:$0xff]   ;;  %v876_v20 = vld [vmem:[%s1472_s0 + $0x80] sm:$0xff]  }
  0x22   :  { %v491_v32 = vmax.f32 %v427_v22, 0.0  ;;  %v429_v33 = vadd.f32 %v775_v15, %v237_v23  ;;  %v238_v34 = vadd.f32 %v961_v3, %v170_v24  ;;  %v171_v35 = vmul.f32 %v956_v1, %v651_v25  ;;  %v907_v25 = vld [vmem:[%s1475_s3 + $0x80] sm:$0xff]  }
  0x23   :  { %554 = vst [vmem:[%s1476_s4 + $0x88] sm:$0xff] %v490_v27  ;;  %v492_v36 = vmax.f32 %v428_v28, 0.0  ;;  %v172_v37 = vmul.f32 %v956_v1, %v652_v30  ;;  %v780_v38 = vunpack.c.h.bf16 %v902_v17  ;;  %v655_v39 = vunpack.c.l.bf16 %v872_v26 }
  0x24   :  { %555 = vst [vmem:[%s1476_s4 + $0x90] sm:$0xff] %v491_v32  ;;  %v493_v42 = vmax.f32 %v429_v33, 0.0  ;;  %v430_v43 = vadd.f32 %v776_v21, %v238_v34  ;;  %v239_v44 = vadd.f32 %v961_v3, %v171_v35  ;;  %v783_v45 = vunpack.c.l.bf16 %v903_v31  ;;  %v877_v34 = vld [vmem:[%s1472_s0 + $0x88] sm:$0xff]  }
  0x25   :  { %556 = vst [vmem:[%s1476_s4 + $0x98] sm:$0xff] %v492_v36  ;;  %v240_v46 = vadd.f32 %v961_v3, %v172_v37  ;;  %v173_v47 = vmul.f32 %v956_v1, %v655_v39  ;;  %v656_v48 = vunpack.c.h.bf16 %v872_v26  ;;  %v784_v49 = vunpack.c.h.bf16 %v903_v31  ;;  %v908_v35 = vld [vmem:[%s1475_s3 + $0x88] sm:$0xff]  }
  0x26   :  { %557 = vst [vmem:[%s1476_s4 + $0xa0] sm:$0xff] %v493_v42  ;;  %v494_v51 = vmax.f32 %v430_v43, 0.0  ;;  %v431_v52 = vadd.f32 %v779_v29, %v239_v44  ;;  %v659_v53 = vunpack.c.l.bf16 %v873_v40  ;;  %v787_v54 = vunpack.c.l.bf16 %v904_v41  ;;  %v878_v44 = vld [vmem:[%s1472_s0 + $0x90] sm:$0xff]  }
  0x27   :  { %v432_v55 = vadd.f32 %v780_v38, %v240_v46  ;;  %v241_v56 = vadd.f32 %v961_v3, %v173_v47  ;;  %v174_v57 = vmul.f32 %v956_v1, %v656_v48  ;;  %v660_v58 = vunpack.c.h.bf16 %v873_v40 }
  0x28   :  { %558 = vst [vmem:[%s1476_s4 + $0xa8] sm:$0xff] %v494_v51  ;;  %v495_v60 = vmax.f32 %v431_v52, 0.0  ;;  %v175_v61 = vmul.f32 %v956_v1, %v659_v53  ;;  %v788_v62 = vunpack.c.h.bf16 %v904_v41  ;;  %v663_v63 = vunpack.c.l.bf16 %v874_v50  ;;  %v909_v53 = vld [vmem:[%s1475_s3 + $0x90] sm:$0xff]  }
  0x29   :  { %v496_v0 = vmax.f32 %v432_v55, 0.0  ;;  %v433_v2 = vadd.f32 %v783_v45, %v241_v56  ;;  %v242_v4 = vadd.f32 %v961_v3, %v174_v57  ;;  %v176_v5 = vmul.f32 %v956_v1, %v660_v58 }
  0x2a   :  { %559 = vst [vmem:[%s1476_s4 + $0xb0] sm:$0xff] %v495_v60  ;;  %v243_v7 = vadd.f32 %v961_v3, %v175_v61  ;;  %v177_v8 = vmul.f32 %v956_v1, %v663_v63  ;;  %v791_v9 = vunpack.c.l.bf16 %v905_v59  ;;  %v664_v10 = vunpack.c.h.bf16 %v874_v50 }
  0x2b   :  { %560 = vst [vmem:[%s1476_s4 + $0xb8] sm:$0xff] %v496_v0  ;;  %v497_v12 = vmax.f32 %v433_v2, 0.0  ;;  %v434_v13 = vadd.f32 %v784_v49, %v242_v4  ;;  %v244_v14 = vadd.f32 %v961_v3, %v176_v5  ;;  %v792_v15 = vunpack.c.h.bf16 %v905_v59  ;;  %v910_v5 = vld [vmem:[%s1475_s3 + $0x98] sm:$0xff]  }
  0x2c   :  { %v435_v16 = vadd.f32 %v787_v54, %v243_v7  ;;  %v245_v17 = vadd.f32 %v961_v3, %v177_v8  ;;  %v178_v18 = vmul.f32 %v956_v1, %v664_v10  ;;  %v667_v19 = vunpack.c.l.bf16 %v875_v6 }
  0x2d   :  { %561 = vst [vmem:[%s1476_s4 + $0xc0] sm:$0xff] %v497_v12  ;;  %v498_v21 = vmax.f32 %v434_v13, 0.0  ;;  %v436_v22 = vadd.f32 %v788_v62, %v244_v14  ;;  %v795_v23 = vunpack.c.l.bf16 %v906_v11  ;;  %v668_v24 = vunpack.c.h.bf16 %v875_v6  ;;  %v879_v62 = vld [vmem:[%s1472_s0 + $0x98] sm:$0xff]   ;;  %v880_v14 = vld [vmem:[%s1472_s0 + $0xa0] sm:$0xff]  }
  0x2e   :  { %v499_v26 = vmax.f32 %v435_v16, 0.0  ;;  %v437_v27 = vadd.f32 %v791_v9, %v245_v17  ;;  %v246_v28 = vadd.f32 %v961_v3, %v178_v18  ;;  %v179_v29 = vmul.f32 %v956_v1, %v667_v19  ;;  %v911_v19 = vld [vmem:[%s1475_s3 + $0xa0] sm:$0xff]  }
  0x2f   :  { %562 = vst [vmem:[%s1476_s4 + $0xc8] sm:$0xff] %v498_v21  ;;  %v500_v30 = vmax.f32 %v436_v22, 0.0  ;;  %v180_v31 = vmul.f32 %v956_v1, %v668_v24  ;;  %v796_v32 = vunpack.c.h.bf16 %v906_v11  ;;  %v671_v33 = vunpack.c.l.bf16 %v876_v20 }
  0x30   :  { %563 = vst [vmem:[%s1476_s4 + $0xd0] sm:$0xff] %v499_v26  ;;  %v501_v36 = vmax.f32 %v437_v27, 0.0  ;;  %v438_v37 = vadd.f32 %v792_v15, %v246_v28  ;;  %v247_v38 = vadd.f32 %v961_v3, %v179_v29  ;;  %v799_v39 = vunpack.c.l.bf16 %v907_v25  ;;  %v881_v28 = vld [vmem:[%s1472_s0 + $0xa8] sm:$0xff]  }
  0x31   :  { %564 = vst [vmem:[%s1476_s4 + $0xd8] sm:$0xff] %v500_v30  ;;  %v248_v40 = vadd.f32 %v961_v3, %v180_v31  ;;  %v181_v41 = vmul.f32 %v956_v1, %v671_v33  ;;  %v672_v42 = vunpack.c.h.bf16 %v876_v20  ;;  %v800_v43 = vunpack.c.h.bf16 %v907_v25  ;;  %v912_v29 = vld [vmem:[%s1475_s3 + $0xa8] sm:$0xff]  }
  0x32   :  { %565 = vst [vmem:[%s1476_s4 + $0xe0] sm:$0xff] %v501_v36  ;;  %v502_v45 = vmax.f32 %v438_v37, 0.0  ;;  %v439_v46 = vadd.f32 %v795_v23, %v247_v38  ;;  %v675_v47 = vunpack.c.l.bf16 %v877_v34  ;;  %v803_v48 = vunpack.c.l.bf16 %v908_v35  ;;  %v882_v38 = vld [vmem:[%s1472_s0 + $0xb0] sm:$0xff]  }
  0x33   :  { %v440_v49 = vadd.f32 %v796_v32, %v248_v40  ;;  %v249_v50 = vadd.f32 %v961_v3, %v181_v41  ;;  %v182_v51 = vmul.f32 %v956_v1, %v672_v42  ;;  %v676_v52 = vunpack.c.h.bf16 %v877_v34 }
  0x34   :  { %566 = vst [vmem:[%s1476_s4 + $0xe8] sm:$0xff] %v502_v45  ;;  %v503_v54 = vmax.f32 %v439_v46, 0.0  ;;  %v183_v55 = vmul.f32 %v956_v1, %v675_v47  ;;  %v804_v56 = vunpack.c.h.bf16 %v908_v35  ;;  %v679_v57 = vunpack.c.l.bf16 %v878_v44  ;;  %v913_v47 = vld [vmem:[%s1475_s3 + $0xb0] sm:$0xff]  }
  0x35   :  { %v504_v58 = vmax.f32 %v440_v49, 0.0  ;;  %v441_v59 = vadd.f32 %v799_v39, %v249_v50  ;;  %v250_v60 = vadd.f32 %v961_v3, %v182_v51  ;;  %v184_v61 = vmul.f32 %v956_v1, %v676_v52 }
  0x36   :  { %567 = vst [vmem:[%s1476_s4 + $0xf0] sm:$0xff] %v503_v54  ;;  %v251_v63 = vadd.f32 %v961_v3, %v183_v55  ;;  %v185_v0 = vmul.f32 %v956_v1, %v679_v57  ;;  %v807_v2 = vunpack.c.l.bf16 %v909_v53  ;;  %v680_v4 = vunpack.c.h.bf16 %v878_v44 }
  0x37   :  { %568 = vst [vmem:[%s1476_s4 + $0xf8] sm:$0xff] %v504_v58  ;;  %v505_v6 = vmax.f32 %v441_v59, 0.0  ;;  %v442_v7 = vadd.f32 %v800_v43, %v250_v60  ;;  %v252_v8 = vadd.f32 %v961_v3, %v184_v61  ;;  %v808_v9 = vunpack.c.h.bf16 %v909_v53  ;;  %v914_v61 = vld [vmem:[%s1475_s3 + $0xb8] sm:$0xff]  }
  0x38   :  { %v443_v10 = vadd.f32 %v803_v48, %v251_v63  ;;  %v253_v11 = vadd.f32 %v961_v3, %v185_v0  ;;  %v186_v12 = vmul.f32 %v956_v1, %v680_v4  ;;  %v683_v13 = vunpack.c.l.bf16 %v879_v62 }
  0x39   :  { %569 = vst [vmem:[%s1476_s4 + $0x100] sm:$0xff] %v505_v6  ;;  %v506_v15 = vmax.f32 %v442_v7, 0.0  ;;  %v444_v16 = vadd.f32 %v804_v56, %v252_v8  ;;  %v811_v17 = vunpack.c.l.bf16 %v910_v5  ;;  %v684_v18 = vunpack.c.h.bf16 %v879_v62  ;;  %v883_v56 = vld [vmem:[%s1472_s0 + $0xb8] sm:$0xff]   ;;  %v884_v8 = vld [vmem:[%s1472_s0 + $0xc0] sm:$0xff]  }
  0x3a   :  { %v507_v20 = vmax.f32 %v443_v10, 0.0  ;;  %v445_v21 = vadd.f32 %v807_v2, %v253_v11  ;;  %v254_v22 = vadd.f32 %v961_v3, %v186_v12  ;;  %v187_v23 = vmul.f32 %v956_v1, %v683_v13  ;;  %v915_v13 = vld [vmem:[%s1475_s3 + $0xc0] sm:$0xff]  }
  0x3b   :  { %570 = vst [vmem:[%s1476_s4 + $0x108] sm:$0xff] %v506_v15  ;;  %v508_v24 = vmax.f32 %v444_v16, 0.0  ;;  %v188_v25 = vmul.f32 %v956_v1, %v684_v18  ;;  %v812_v26 = vunpack.c.h.bf16 %v910_v5  ;;  %v687_v27 = vunpack.c.l.bf16 %v880_v14 }
  0x3c   :  { %571 = vst [vmem:[%s1476_s4 + $0x110] sm:$0xff] %v507_v20  ;;  %v509_v30 = vmax.f32 %v445_v21, 0.0  ;;  %v446_v31 = vadd.f32 %v808_v9, %v254_v22  ;;  %v255_v32 = vadd.f32 %v961_v3, %v187_v23  ;;  %v815_v33 = vunpack.c.l.bf16 %v911_v19  ;;  %v885_v22 = vld [vmem:[%s1472_s0 + $0xc8] sm:$0xff]  }
  0x3d   :  { %572 = vst [vmem:[%s1476_s4 + $0x118] sm:$0xff] %v508_v24  ;;  %v256_v34 = vadd.f32 %v961_v3, %v188_v25  ;;  %v189_v35 = vmul.f32 %v956_v1, %v687_v27  ;;  %v688_v36 = vunpack.c.h.bf16 %v880_v14  ;;  %v816_v37 = vunpack.c.h.bf16 %v911_v19  ;;  %v916_v23 = vld [vmem:[%s1475_s3 + $0xc8] sm:$0xff]  }
  0x3e   :  { %573 = vst [vmem:[%s1476_s4 + $0x120] sm:$0xff] %v509_v30  ;;  %v510_v39 = vmax.f32 %v446_v31, 0.0  ;;  %v447_v40 = vadd.f32 %v811_v17, %v255_v32  ;;  %v691_v41 = vunpack.c.l.bf16 %v881_v28  ;;  %v819_v42 = vunpack.c.l.bf16 %v912_v29  ;;  %v886_v32 = vld [vmem:[%s1472_s0 + $0xd0] sm:$0xff]  }
  0x3f   :  { %v448_v43 = vadd.f32 %v812_v26, %v256_v34  ;;  %v257_v44 = vadd.f32 %v961_v3, %v189_v35  ;;  %v190_v45 = vmul.f32 %v956_v1, %v688_v36  ;;  %v692_v46 = vunpack.c.h.bf16 %v881_v28 }
  0x40   :  { %574 = vst [vmem:[%s1476_s4 + $0x128] sm:$0xff] %v510_v39  ;;  %v511_v48 = vmax.f32 %v447_v40, 0.0  ;;  %v191_v49 = vmul.f32 %v956_v1, %v691_v41  ;;  %v820_v50 = vunpack.c.h.bf16 %v912_v29  ;;  %v695_v51 = vunpack.c.l.bf16 %v882_v38  ;;  %v917_v41 = vld [vmem:[%s1475_s3 + $0xd0] sm:$0xff]  }
  0x41   :  { %v512_v52 = vmax.f32 %v448_v43, 0.0  ;;  %v449_v53 = vadd.f32 %v815_v33, %v257_v44  ;;  %v258_v54 = vadd.f32 %v961_v3, %v190_v45  ;;  %v192_v55 = vmul.f32 %v956_v1, %v692_v46 }
  0x42   :  { %575 = vst [vmem:[%s1476_s4 + $0x130] sm:$0xff] %v511_v48  ;;  %v259_v57 = vadd.f32 %v961_v3, %v191_v49  ;;  %v193_v58 = vmul.f32 %v956_v1, %v695_v51  ;;  %v823_v59 = vunpack.c.l.bf16 %v913_v47  ;;  %v696_v60 = vunpack.c.h.bf16 %v882_v38 }
  0x43   :  { %576 = vst [vmem:[%s1476_s4 + $0x138] sm:$0xff] %v512_v52  ;;  %v513_v62 = vmax.f32 %v449_v53, 0.0  ;;  %v450_v63 = vadd.f32 %v816_v37, %v258_v54  ;;  %v260_v0 = vadd.f32 %v961_v3, %v192_v55  ;;  %v824_v2 = vunpack.c.h.bf16 %v913_v47  ;;  %v918_v55 = vld [vmem:[%s1475_s3 + $0xd8] sm:$0xff]  }
  0x44   :  { %v451_v4 = vadd.f32 %v819_v42, %v259_v57  ;;  %v261_v5 = vadd.f32 %v961_v3, %v193_v58  ;;  %v194_v6 = vmul.f32 %v956_v1, %v696_v60  ;;  %v699_v7 = vunpack.c.l.bf16 %v883_v56 }
  0x45   :  { %577 = vst [vmem:[%s1476_s4 + $0x140] sm:$0xff] %v513_v62  ;;  %v514_v9 = vmax.f32 %v450_v63, 0.0  ;;  %v452_v10 = vadd.f32 %v820_v50, %v260_v0  ;;  %v827_v11 = vunpack.c.l.bf16 %v914_v61  ;;  %v700_v12 = vunpack.c.h.bf16 %v883_v56  ;;  %v887_v50 = vld [vmem:[%s1472_s0 + $0xd8] sm:$0xff]   ;;  %v888_v0 = vld [vmem:[%s1472_s0 + $0xe0] sm:$0xff]  }
  0x46   :  { %v515_v14 = vmax.f32 %v451_v4, 0.0  ;;  %v453_v15 = vadd.f32 %v823_v59, %v261_v5  ;;  %v262_v16 = vadd.f32 %v961_v3, %v194_v6  ;;  %v195_v17 = vmul.f32 %v956_v1, %v699_v7  ;;  %v919_v7 = vld [vmem:[%s1475_s3 + $0xe0] sm:$0xff]  }
  0x47   :  { %578 = vst [vmem:[%s1476_s4 + $0x148] sm:$0xff] %v514_v9  ;;  %v516_v18 = vmax.f32 %v452_v10, 0.0  ;;  %v196_v19 = vmul.f32 %v956_v1, %v700_v12  ;;  %v828_v20 = vunpack.c.h.bf16 %v914_v61  ;;  %v703_v21 = vunpack.c.l.bf16 %v884_v8 }
  0x48   :  { %579 = vst [vmem:[%s1476_s4 + $0x150] sm:$0xff] %v515_v14  ;;  %v517_v24 = vmax.f32 %v453_v15, 0.0  ;;  %v454_v25 = vadd.f32 %v824_v2, %v262_v16  ;;  %v263_v26 = vadd.f32 %v961_v3, %v195_v17  ;;  %v831_v27 = vunpack.c.l.bf16 %v915_v13  ;;  %v889_v16 = vld [vmem:[%s1472_s0 + $0xe8] sm:$0xff]  }
  0x49   :  { %580 = vst [vmem:[%s1476_s4 + $0x158] sm:$0xff] %v516_v18  ;;  %v264_v28 = vadd.f32 %v961_v3, %v196_v19  ;;  %v197_v29 = vmul.f32 %v956_v1, %v703_v21  ;;  %v704_v30 = vunpack.c.h.bf16 %v884_v8  ;;  %v832_v31 = vunpack.c.h.bf16 %v915_v13  ;;  %v920_v17 = vld [vmem:[%s1475_s3 + $0xe8] sm:$0xff]  }
  0x4a   :  { %581 = vst [vmem:[%s1476_s4 + $0x160] sm:$0xff] %v517_v24  ;;  %v518_v33 = vmax.f32 %v454_v25, 0.0  ;;  %v455_v34 = vadd.f32 %v827_v11, %v263_v26  ;;  %v707_v35 = vunpack.c.l.bf16 %v885_v22  ;;  %v835_v36 = vunpack.c.l.bf16 %v916_v23  ;;  %v890_v26 = vld [vmem:[%s1472_s0 + $0xf0] sm:$0xff]  }
  0x4b   :  { %v456_v37 = vadd.f32 %v828_v20, %v264_v28  ;;  %v265_v38 = vadd.f32 %v961_v3, %v197_v29  ;;  %v198_v39 = vmul.f32 %v956_v1, %v704_v30  ;;  %v708_v40 = vunpack.c.h.bf16 %v885_v22 }
  0x4c   :  { %582 = vst [vmem:[%s1476_s4 + $0x168] sm:$0xff] %v518_v33  ;;  %v519_v42 = vmax.f32 %v455_v34, 0.0  ;;  %v199_v43 = vmul.f32 %v956_v1, %v707_v35  ;;  %v836_v44 = vunpack.c.h.bf16 %v916_v23  ;;  %v711_v45 = vunpack.c.l.bf16 %v886_v32  ;;  %v921_v35 = vld [vmem:[%s1475_s3 + $0xf0] sm:$0xff]  }
  0x4d   :  { %v520_v46 = vmax.f32 %v456_v37, 0.0  ;;  %v457_v47 = vadd.f32 %v831_v27, %v265_v38  ;;  %v266_v48 = vadd.f32 %v961_v3, %v198_v39  ;;  %v200_v49 = vmul.f32 %v956_v1, %v708_v40 }
  0x4e   :  { %583 = vst [vmem:[%s1476_s4 + $0x170] sm:$0xff] %v519_v42  ;;  %v267_v51 = vadd.f32 %v961_v3, %v199_v43  ;;  %v201_v52 = vmul.f32 %v956_v1, %v711_v45  ;;  %v839_v53 = vunpack.c.l.bf16 %v917_v41  ;;  %v712_v54 = vunpack.c.h.bf16 %v886_v32 }
  0x4f   :  { %584 = vst [vmem:[%s1476_s4 + $0x178] sm:$0xff] %v520_v46  ;;  %v521_v56 = vmax.f32 %v457_v47, 0.0  ;;  %v458_v57 = vadd.f32 %v832_v31, %v266_v48  ;;  %v268_v58 = vadd.f32 %v961_v3, %v200_v49  ;;  %v840_v59 = vunpack.c.h.bf16 %v917_v41  ;;  %v922_v49 = vld [vmem:[%s1475_s3 + $0xf8] sm:$0xff]  }
  0x50   :  { %v459_v60 = vadd.f32 %v835_v36, %v267_v51  ;;  %v269_v61 = vadd.f32 %v961_v3, %v201_v52  ;;  %v202_v62 = vmul.f32 %v956_v1, %v712_v54  ;;  %v715_v63 = vunpack.c.l.bf16 %v887_v50 }
  0x51   :  { %585 = vst [vmem:[%s1476_s4 + $0x180] sm:$0xff] %v521_v56  ;;  %v522_v2 = vmax.f32 %v458_v57, 0.0  ;;  %v460_v4 = vadd.f32 %v836_v44, %v268_v58  ;;  %v843_v5 = vunpack.c.l.bf16 %v918_v55  ;;  %v716_v6 = vunpack.c.h.bf16 %v887_v50  ;;  %v891_v44 = vld [vmem:[%s1472_s0 + $0xf8] sm:$0xff]  }
  0x52   :  { %v523_v8 = vmax.f32 %v459_v60, 0.0  ;;  %v461_v9 = vadd.f32 %v839_v53, %v269_v61  ;;  %v270_v10 = vadd.f32 %v961_v3, %v202_v62  ;;  %v203_v11 = vmul.f32 %v956_v1, %v715_v63 }
  0x53   :  { %586 = vst [vmem:[%s1476_s4 + $0x188] sm:$0xff] %v522_v2  ;;  %v524_v12 = vmax.f32 %v460_v4, 0.0  ;;  %v204_v13 = vmul.f32 %v956_v1, %v716_v6  ;;  %v844_v14 = vunpack.c.h.bf16 %v918_v55  ;;  %v719_v15 = vunpack.c.l.bf16 %v888_v0 }
  0x54   :  { %587 = vst [vmem:[%s1476_s4 + $0x190] sm:$0xff] %v523_v8  ;;  %v525_v18 = vmax.f32 %v461_v9, 0.0  ;;  %v462_v19 = vadd.f32 %v840_v59, %v270_v10  ;;  %v271_v20 = vadd.f32 %v961_v3, %v203_v11  ;;  %v847_v21 = vunpack.c.l.bf16 %v919_v7 }
  0x55   :  { %588 = vst [vmem:[%s1476_s4 + $0x198] sm:$0xff] %v524_v12  ;;  %v272_v22 = vadd.f32 %v961_v3, %v204_v13  ;;  %v205_v23 = vmul.f32 %v956_v1, %v719_v15  ;;  %v720_v24 = vunpack.c.h.bf16 %v888_v0  ;;  %v848_v25 = vunpack.c.h.bf16 %v919_v7 }
  0x56   :  { %589 = vst [vmem:[%s1476_s4 + $0x1a0] sm:$0xff] %v525_v18  ;;  %v526_v27 = vmax.f32 %v462_v19, 0.0  ;;  %v463_v28 = vadd.f32 %v843_v5, %v271_v20  ;;  %v723_v29 = vunpack.c.l.bf16 %v889_v16  ;;  %v851_v30 = vunpack.c.l.bf16 %v920_v17 }
  0x57   :  { %v464_v31 = vadd.f32 %v844_v14, %v272_v22  ;;  %v273_v32 = vadd.f32 %v961_v3, %v205_v23  ;;  %v206_v33 = vmul.f32 %v956_v1, %v720_v24  ;;  %v724_v34 = vunpack.c.h.bf16 %v889_v16 }
  0x58   :  { %590 = vst [vmem:[%s1476_s4 + $0x1a8] sm:$0xff] %v526_v27  ;;  %v527_v36 = vmax.f32 %v463_v28, 0.0  ;;  %v207_v37 = vmul.f32 %v956_v1, %v723_v29  ;;  %v852_v38 = vunpack.c.h.bf16 %v920_v17  ;;  %v727_v39 = vunpack.c.l.bf16 %v890_v26 }
  0x59   :  { %v528_v40 = vmax.f32 %v464_v31, 0.0  ;;  %v465_v41 = vadd.f32 %v847_v21, %v273_v32  ;;  %v274_v42 = vadd.f32 %v961_v3, %v206_v33  ;;  %v208_v43 = vmul.f32 %v956_v1, %v724_v34 }
  0x5a   :  { %591 = vst [vmem:[%s1476_s4 + $0x1b0] sm:$0xff] %v527_v36  ;;  %v275_v45 = vadd.f32 %v961_v3, %v207_v37  ;;  %v209_v46 = vmul.f32 %v956_v1, %v727_v39  ;;  %v855_v47 = vunpack.c.l.bf16 %v921_v35  ;;  %v728_v48 = vunpack.c.h.bf16 %v890_v26 }
  0x5b   :  { %592 = vst [vmem:[%s1476_s4 + $0x1b8] sm:$0xff] %v528_v40  ;;  %v529_v50 = vmax.f32 %v465_v41, 0.0  ;;  %v466_v51 = vadd.f32 %v848_v25, %v274_v42  ;;  %v276_v52 = vadd.f32 %v961_v3, %v208_v43  ;;  %v856_v53 = vunpack.c.h.bf16 %v921_v35 }
  0x5c   :  { %v467_v54 = vadd.f32 %v851_v30, %v275_v45  ;;  %v277_v55 = vadd.f32 %v961_v3, %v209_v46  ;;  %v210_v56 = vmul.f32 %v956_v1, %v728_v48  ;;  %v731_v57 = vunpack.c.l.bf16 %v891_v44 }
  0x5d   :  { %593 = vst [vmem:[%s1476_s4 + $0x1c0] sm:$0xff] %v529_v50  ;;  %v530_v58 = vmax.f32 %v466_v51, 0.0  ;;  %v468_v59 = vadd.f32 %v852_v38, %v276_v52  ;;  %v859_v60 = vunpack.c.l.bf16 %v922_v49  ;;  %v732_v61 = vunpack.c.h.bf16 %v891_v44 }
  0x5e   :  { %v531_v62 = vmax.f32 %v467_v54, 0.0  ;;  %v469_v63 = vadd.f32 %v855_v47, %v277_v55  ;;  %v278_v0 = vadd.f32 %v961_v3, %v210_v56  ;;  %v211_v2 = vmul.f32 %v956_v1, %v731_v57 }
  0x5f   :  { %594 = vst [vmem:[%s1476_s4 + $0x1c8] sm:$0xff] %v530_v58  ;;  %v532_v4 = vmax.f32 %v468_v59, 0.0  ;;  %v212_v5 = vmul.f32 %v956_v1, %v732_v61  ;;  %v860_v6 = vunpack.c.h.bf16 %v922_v49 }
  0x60   :  { %595 = vst [vmem:[%s1476_s4 + $0x1d0] sm:$0xff] %v531_v62  ;;  %v533_v7 = vmax.f32 %v469_v63, 0.0  ;;  %v470_v8 = vadd.f32 %v856_v53, %v278_v0  ;;  %v279_v9 = vadd.f32 %v961_v3, %v211_v2 }
  0x61   :  { %596 = vst [vmem:[%s1476_s4 + $0x1d8] sm:$0xff] %v532_v4  ;;  %v280_v10 = vadd.f32 %v961_v3, %v212_v5 }
  0x62   :  { %597 = vst [vmem:[%s1476_s4 + $0x1e0] sm:$0xff] %v533_v7  ;;  %v534_v1 = vmax.f32 %v470_v8, 0.0  ;;  %v471_v11 = vadd.f32 %v859_v60, %v279_v9 }
  0x63   :  { %v472_v12 = vadd.f32 %v860_v6, %v280_v10 }
  0x64   :  { %598 = vst [vmem:[%s1476_s4 + $0x1e8] sm:$0xff] %v534_v1  ;;  %v535_v13 = vmax.f32 %v471_v11, 0.0 }
  0x65   :  { %v536_v14 = vmax.f32 %v472_v12, 0.0 }
  0x66   :  { %599 = vst [vmem:[%s1476_s4 + $0x1f0] sm:$0xff] %v535_v13 }
  0x67   :  { %600 = vst [vmem:[%s1476_s4 + $0x1f8] sm:$0xff] %v536_v14 }

// kernel: bottleneck_forward.5
= control target key start
LH: loop header
LB: loop body
LE: loop exit
PB: predicated region body
PF: predicated region fallthrough
CT: control target
= control target key end

     0   :  { %s3203_s27 = smov 0   ;;  %s3205_s28 = smov 0   ;;  %s3980_s0 = inlined_call_operand.vmem [shape: bf16[2,16,16,128], index: 0, kind: input, shape index: {}, may-alias: {0,1,2}]   ;;  %s3981_s1 = inlined_call_operand.vmem [shape: bf16[2,16,16,128], index: 1, kind: input, shape index: {}, may-alias: {0,1,2}]   ;;  %s3982_s2 = inlined_call_operand.vmem [shape: bf16[2,16,16,128], index: 2, kind: input, shape index: {}, may-alias: {0,1,2}]   ;;  %s3983_s3 = inlined_call_operand.vmem [shape: f32[1,128], index: 3, kind: input, shape index: {}]   ;;  %s3984_s4 = inlined_call_operand.vmem [shape: f32[1,128], index: 4, kind: input, shape index: {}]   ;;  %s3985_s5 = inlined_call_operand.vmem [shape: bf16[3,384,128], index: 5, kind: input, shape index: {}]   ;;  %s3986_s6 = inlined_call_operand.vmem [shape: bf16[512,128], index: 6, kind: output, shape index: {0}]   ;;  %s3987_s7 = inlined_call_operand.vmem [shape: f32[4,1,128], index: 7, kind: output, shape index: {1}]   ;;  %s3988_s8 = inlined_call_operand.vmem [shape: f32[4,1,128], index: 8, kind: output, shape index: {2}]  }
   0x1   :  { %s3207_s29 = smov 0   ;;  %s3209_s30 = smov 0  }
   0x2   :  { %s3211_s9 = smov 0  }
   0x3 LB: > { %s28_s10 = sadd.s32 1, %s3148_s29  ;;  %s31_s11 = sadd.s32 1, %s3152_s30  ;;  %s3156_s9 = sphi %s3211_s9, %s19_s9   ;;  %s3152_s30 = sphi %s3209_s30, %s3995_s30   ;;  %s3148_s29 = sphi %s3207_s29, %s3994_s29   ;;  %s3144_s28 = sphi %s3205_s28, %s3993_s28   ;;  %s3140_s27 = sphi %s3203_s27, %s3992_s27  }
   0x4   : > { %p29_p0 = scmp.ge.s32.totalorder %s28_s10, 2  ;;  %p2463_p1 = scmp.ge.s32.totalorder %s3156_s9, 1 }
   0x5   : > { %p363_p2 = scmp.lt.s32.totalorder %s3156_s9, 5 }
   0x6   : > { %s3997_s10 = smov (%p29_p0, %s28_s10), 0  ;;  %s3999_s11 = smov (!%p29_p0, %s31_s11), %s3152_s30 }
   0x7   : > { %p364_p3 = pnand %p2463_p1, %p363_p2  ;;  %p33_p4 = scmp.ge.s32.totalorder %s3999_s11, 2 }
   0x8   : > { %s3241_s14 = sshll.u32 (!%p364_p3), %s3140_s27, 3  ;;  %p441_p5 = scmp.lt.s32.totalorder (!%p364_p3), %s3144_s28, 1 }
   0x9   : > { %s4001_s11 = smov (%p33_p4, %s3999_s11), 0  ;;  %367 = sbr.rel (%p364_p3) target bundleno = 489 (0x1e9), region = 44 }
   0xa   : > { %p443_p6 = scmp.lt.s32.totalorder (!%p364_p3), %s3241_s14, 15  ;;  %s3253_s20 = sadd.s32 (!%p364_p3), 4294967295, %s3241_s14 }
   0xb   : > { %p453_p7 = scmp.gt.s32.totalorder (!%p364_p3), %s3253_s20, 0  ;;  %p2470_p8 = scmp.lt.s32.totalorder (!%p364_p3), %s3253_s20, 15 }
   0xc   : > { %p528_p9 = scmp.gt.s32.totalorder (!%p364_p3), %s3140_s27, 0  ;;  %s2883_s22 = sadd.s32 (!%p364_p3), 8, %s3241_s14 }
   0xd   : > { %p3801_p10 = scmp.lt.s32.totalorder (!%p364_p3), %s2883_s22, 15  ;;  %p624_p11 = scmp.lt.s32.totalorder (!%p364_p3), %s3140_s27, 1 }
   0xe   : > { %v2891_v0 = vld [vmem:[%s3985_s5 + $0x38] sm:$0xff]  ;;  %v2890_v1 = vld [vmem:[%s3985_s5 + $0x30] sm:$0xff]  ;;  %s442_s17 = scalar_select %p441_p5, %s3144_s28, 1  ;;  %v2889_v2 = vld [vmem:[%s3985_s5 + $0x28] sm:$0xff]  ;;  %vm790_vm0 = vcmask 1040384   ;;  %vm934_vm4 = vcmask 1046528  }
   0xf   : > { %3050 = vmatpush.bf16.msra.mxu1 %v2891_v0  ;;  %3051 = vmatpush.bf16.msra.mxu2 %v2891_v0  ;;  %s444_s18 = scalar_select %p443_p6, %s3241_s14, 15  ;;  %v3270_v3 = vld [vmem:[%s3983_s3] ss:$0 sm:$0xff]  ;;  %v2887_v27 = vld [vmem:[%s3985_s5 + $0x18] sm:$0xff]  ;;  %vm791_vm1 = vsmask.f32 256 }
  0x10   : > { %3052 = vmatpush.bf16.msra.mxu3 %v2891_v0  ;;  %1159 = vmatpush.bf16.msra.mxu0 %v2891_v0  ;;  %s3250_s19 = sshll.u32 %s442_s17, 5  ;;  %v2888_v7 = vld [vmem:[%s3985_s5 + $0x20] sm:$0xff]  ;;  %v2886_v45 = vld [vmem:[%s3985_s5 + $0x10] sm:$0xff]  ;;  %v2885_v62 = vld [vmem:[%s3985_s5 + $0x8] sm:$0xff]  ;;  %vm813_vm3 = vsmask.f32 7424 }
  0x11   : > { %s2465_s21 = sshll.u32 %s444_s18, 1  ;;  %v3284_v8 = vld [vmem:[%s3984_s4] ss:$0 sm:$0xff]  ;;  %vm3339_vm2 = vmand %vm790_vm0, %vm791_vm1  ;;  %s4005_s22 = smov (!%p3801_p10, %s2883_s22), 15 }
  0x12   : > { %s447_s24 = sadd.s32 %s3250_s19, %s2465_s21  ;;  %s4007_s22 = smov (!%p3801_p10, %s4005_s22), 15 }
  0x13   : > { %3053 = vmatpush.bf16.msra.mxu1 %v2890_v1  ;;  %3054 = vmatpush.bf16.msra.mxu2 %v2890_v1  ;;  %s2467_s25 = sshll.u32 %s447_s24, 2  ;;  %s2482_s14 = sshll.u32 %s4007_s22, 1 }
  0x14   : > { %3055 = vmatpush.bf16.msra.mxu3 %v2890_v1  ;;  %1160 = vmatpush.bf16.msra.mxu0 %v2890_v1  ;;  %s3265_s13 = scalar_lea.vmem %s3980_s0, %s2467_s25 }
  0x15   : > { %v3036_v4 = vld [vmem:[%s3265_s13 + $0x8] sm:$0xff]   ;;  %v3038_v5 = vld [vmem:[%s3265_s13 + $0x18] sm:$0xff]   ;;  %s454_s17 = scalar_select %p453_p7, %s3253_s20, 0  ;;  %v3037_v13 = vld [vmem:[%s3265_s13 + $0x10] sm:$0xff]  }
  0x16   : > { %v3040_v6 = vld [vmem:[%s3265_s13 + $0x28] sm:$0xff]   ;;  %v2966_v9 = vunpack.c.l.bf16 %v3036_v4  ;;  %v2967_v10 = vunpack.c.h.bf16 %v3036_v4  ;;  %v2974_v11 = vunpack.c.l.bf16 %v3038_v5  ;;  %v2975_v12 = vunpack.c.h.bf16 %v3038_v5  ;;  %s529_s24 = scalar_select %p528_p9, 1, 0  ;;  %v3296_v22 = vld [vmem:[%s3265_s13 + $0x20] sm:$0xff]  }
  0x17   : > { %3056 = vmatpush.bf16.msra.mxu1 %v2889_v2  ;;  %3057 = vmatpush.bf16.msra.mxu2 %v2889_v2  ;;  %v2982_v14 = vunpack.c.l.bf16 %v3040_v6  ;;  %v2983_v15 = vunpack.c.h.bf16 %v3040_v6  ;;  %s4003_s17 = smov (!%p2470_p8, %s454_s17), 15  ;;  %v2970_v16 = vunpack.c.l.bf16 %v3037_v13  ;;  %v2971_v17 = vunpack.c.h.bf16 %v3037_v13 }
  0x18   : > { %3058 = vmatpush.bf16.msra.mxu3 %v2889_v2  ;;  %1161 = vmatpush.bf16.msra.mxu0 %v2889_v2  ;;  %v568_v18 = vmul.f32 %v3270_v3, %v2966_v9  ;;  %v569_v19 = vmul.f32 %v3270_v3, %v2967_v10  ;;  %v572_v20 = vmul.f32 %v3270_v3, %v2974_v11  ;;  %s530_s25 = scvt.s32.f32 %s529_s24  ;;  %s2475_s20 = sshll.u32 %s4003_s17, 1  ;;  %v2978_v35 = vunpack.c.l.bf16 %v3296_v22 }
  0x19   : > { %v573_v21 = vmul.f32 %v3270_v3, %v2975_v12  ;;  %v576_v23 = vmul.f32 %v3270_v3, %v2982_v14  ;;  %v577_v24 = vmul.f32 %v3270_v3, %v2983_v15  ;;  %v570_v25 = vmul.f32 %v3270_v3, %v2970_v16  ;;  %s461_s15 = sadd.s32 %s2475_s20, %s3250_s19  ;;  %s478_s24 = sadd.s32 %s2482_s14, %s3250_s19 }
  0x1a   : > { %v571_v26 = vmul.f32 %v3270_v3, %v2971_v17  ;;  %v584_v28 = vadd.f32 %v3284_v8, %v568_v18  ;;  %v585_v29 = vadd.f32 %v3284_v8, %v569_v19  ;;  %v588_v30 = vadd.f32 %v3284_v8, %v572_v20  ;;  %s2477_s16 = sshll.u32 %s461_s15, 2  ;;  %v2884_v17 = vld [vmem:[%s3985_s5] sm:$0xff] }
  0x1b   : > { %3059 = vmatpush.bf16.msra.mxu1 %v2888_v7  ;;  %3060 = vmatpush.bf16.msra.mxu2 %v2888_v7  ;;  %v3309_v31 = vstv %s530_s25  ;;  %v589_v32 = vadd.f32 %v3284_v8, %v573_v21  ;;  %v592_v33 = vadd.f32 %v3284_v8, %v576_v23  ;;  %v593_v34 = vadd.f32 %v3284_v8, %v577_v24  ;;  %s463_s21 = scalar_lea.vmem %s3981_s1, %s2477_s16  ;;  %s2484_s25 = sshll.u32 %s478_s24, 2 }
  0x1c   : > { %3061 = vmatpush.bf16.msra.mxu3 %v2888_v7  ;;  %1162 = vmatpush.bf16.msra.mxu0 %v2888_v7  ;;  %v600_v36 = vmax.f32 %v584_v28, 0.0  ;;  %v601_v37 = vmax.f32 %v585_v29, 0.0  ;;  %v604_v38 = vmax.f32 %v588_v30, 0.0  ;;  %v586_v39 = vadd.f32 %v3284_v8, %v570_v25  ;;  %v2957_v43 = vld [vmem:[%s463_s21] sm:$0xff]   ;;  %v2907_v29 = vld [vmem:[%s3985_s5 + $0xb8] sm:$0xff]  ;;  %s480_s12 = scalar_lea.vmem %s3982_s2, %s2484_s25  ;;  %s2485_s21 = sshll.u32 %s3144_s28, 1 }
  0x1d   : > { %v605_v40 = vmax.f32 %v589_v32, 0.0  ;;  %v608_v41 = vmax.f32 %v592_v33, 0.0  ;;  %v609_v42 = vmax.f32 %v593_v34, 0.0  ;;  %v587_v44 = vadd.f32 %v3284_v8, %v571_v26  ;;  %v2915_v30 = vld [vmem:[%s3985_s5 + $0xf8] sm:$0xff]  ;;  %s625_s16 = scalar_select %p624_p11, 1, 0 }
  0x1e   : > { %v634_v46 = vpack.c.bf16 %v600_v36, %v600_v36  ;;  %v635_v47 = vpack.c.bf16 %v601_v37, %v601_v37  ;;  %v638_v48 = vpack.c.bf16 %v604_v38, %v604_v38  ;;  %v2958_v49 = vunpack.c.l.bf16 %v2957_v43  ;;  %v3041_v38 = vld [vmem:[%s3265_s13 + $0x30] sm:$0xff]   ;;  %s3911_s22 = sadd.s32 %s3140_s27, %s2485_s21 }
  0x1f   : > { %3062 = vmatpush.bf16.msra.mxu1 %v2887_v27  ;;  %3063 = vmatpush.bf16.msra.mxu2 %v2887_v27  ;;  %v639_v50 = vpack.c.bf16 %v605_v40, %v605_v40  ;;  %v642_v51 = vpack.c.bf16 %v608_v41, %v608_v41  ;;  %v643_v52 = vpack.c.bf16 %v609_v42, %v609_v42  ;;  %v2959_v53 = vunpack.c.h.bf16 %v2957_v43  ;;  %v2961_v43 = vld [vmem:[%s3265_s13] sm:$0xff]   ;;  %s626_s18 = scvt.s32.f32 %s625_s16  ;;  %s2486_s23 = sshll.u32 %s3911_s22, 4 }
  0x20   : > { %3064 = vmatpush.bf16.msra.mxu3 %v2887_v27  ;;  %1163 = vmatpush.bf16.msra.mxu0 %v2887_v27  ;;  %v674_v54 = vunpack.c.l.b16 %v634_v46  ;;  %v675_v55 = vunpack.c.l.b16 %v635_v47  ;;  %v678_v56 = vunpack.c.l.b16 %v638_v48  ;;  %v518_v57 = vmul.f32 %v3270_v3, %v2958_v49  ;;  %v2923_v46 = vld [vmem:[%s3985_s5 + $0x138] sm:$0xff]  ;;  %p488_p12 = scmp.lt.s32.totalorder %s2486_s23, 63  ;;  %p497_p13 = scmp.lt.s32.totalorder %s3911_s22, 3 }
  0x21   : > { %v679_v58 = vunpack.c.l.b16 %v639_v50  ;;  %v682_v59 = vunpack.c.l.b16 %v642_v51  ;;  %v683_v60 = vunpack.c.l.b16 %v643_v52  ;;  %v519_v61 = vmul.f32 %v3270_v3, %v2959_v53  ;;  %v2906_v50 = vld [vmem:[%s3985_s5 + $0xb0] sm:$0xff] }
  0x22   : > { %v692_v63 = vpack.c.b16 %v675_v55, %v674_v54  ;;  %v524_v0 = vadd.f32 %v3284_v8, %v518_v57  ;;  %v602_v1 = vmax.f32 %v586_v39, 0.0  ;;  %v603_v2 = vmax.f32 %v587_v44, 0.0  ;;  %v2914_v51 = vld [vmem:[%s3985_s5 + $0xf0] sm:$0xff]  ;;  %s4009_s23 = smov (!%p488_p12, %s2486_s23), 63  ;;  %s4011_s22 = smov (!%p497_p13, %s3911_s22), 3 }
  0x23   : > { %3065 = vmatpush.bf16.msra.mxu1 %v2886_v45  ;;  %3066 = vmatpush.bf16.msra.mxu2 %v2886_v45  ;;  %v694_v4 = vpack.c.b16 %v679_v58, %v678_v56  ;;  %v696_v5 = vpack.c.b16 %v683_v60, %v682_v59  ;;  %v525_v6 = vadd.f32 %v3284_v8, %v519_v61  ;;  %v2979_v7 = vunpack.c.h.bf16 %v3296_v22  ;;  %v2898_v58 = vld [vmem:[%s3985_s5 + $0x70] sm:$0xff]  ;;  %s2487_s27 = sshll.u32 %s4009_s23, 2  ;;  %s499_s26 = scalar_lea.vmem %s3987_s7, %s4011_s22 }
  0x24   : > { %3067 = vmatpush.bf16.msra.mxu3 %v2886_v45  ;;  %1164 = vmatpush.bf16.msra.mxu0 %v2886_v45  ;;  %v715_v9 = vshrl.u32 %v692_v63, 16  ;;  %v718_v10 = vshll.u32 %v692_v63, 16  ;;  %v526_v11 = vmax.f32 %v524_v0, 0.0  ;;  %v636_v12 = vpack.c.bf16 %v602_v1, %v602_v1  ;;  %s3921_s24 = scalar_lea.vmem %s3986_s6, %s2487_s27  ;;  %s506_s15 = scalar_lea.vmem %s3988_s8, %s4011_s22 }
  0x25   : > { %v729_v13 = vshrl.u32 %v694_v4, 16  ;;  %v732_v14 = vshll.u32 %v694_v4, 16  ;;  %v743_v15 = vshrl.u32 %v696_v5, 16  ;;  %v746_v16 = vshll.u32 %v696_v5, 16 }
  0x26   : > { %v3334_v18 = vrot.slane %v715_v9, 7  ;;  %v527_v19 = vmax.f32 %v525_v6, 0.0  ;;  %v532_v20 = vmul.f32 %v3309_v31, %v526_v11  ;;  %v637_v21 = vpack.c.bf16 %v603_v2, %v603_v2  ;;  %v2905_v6 = vld [vmem:[%s3985_s5 + $0xa8] sm:$0xff] }
  0x27   : > { %3068 = vmatpush.bf16.msra.mxu1 %v2885_v62  ;;  %3069 = vmatpush.bf16.msra.mxu2 %v2885_v62  ;;  %v3343_v24 = vrot.slane %v729_v13, 7  ;;  %v3345_v25 = vrot.slane %v743_v15, 7  ;;  %v676_v26 = vunpack.c.l.b16 %v636_v12  ;;  %v574_v27 = vmul.f32 %v3270_v3, %v2978_v35  ;;  %v2897_v15 = vld [vmem:[%s3985_s5 + $0x68] sm:$0xff] }
  0x28   : > { %3070 = vmatpush.bf16.msra.mxu3 %v2885_v62  ;;  %1165 = vmatpush.bf16.msra.mxu0 %v2885_v62  ;;  %v720_v28 = vor.u32 %v718_v10, %v3334_v18  ;;  %v533_v32 = vmul.f32 %v3309_v31, %v527_v19  ;;  %v630_v33 = vpack.c.bf16 %v532_v20, %v532_v20  ;;  %v677_v34 = vunpack.c.l.b16 %v637_v21  ;;  %v2899_v31 = vld [vmem:[%s3985_s5 + $0x78] sm:$0xff]  ;;  %v2922_v62 = vld [vmem:[%s3985_s5 + $0x130] sm:$0xff] }
  0x29   : > { %v734_v36 = vor.u32 %v732_v14, %v3343_v24  ;;  %v748_v22 = vor.u32 %v746_v16, %v3345_v25  ;;  %v575_v35 = vmul.f32 %v3270_v3, %v2979_v7  ;;  %v590_v37 = vadd.f32 %v3284_v8, %v574_v27  ;;  %v2913_v7 = vld [vmem:[%s3985_s5 + $0xe8] sm:$0xff] }
  0x2a   : > { %v3365_v39 = vsel %vm3339_vm2, 0, %v720_v28  ;;  %v631_v40 = vpack.c.bf16 %v533_v32, %v533_v32  ;;  %v670_v41 = vunpack.c.l.b16 %v630_v33  ;;  %v3370_v42 = vpack.c.b16 %v677_v34, %v676_v26  ;;  %v2912_v33 = vld [vmem:[%s3985_s5 + $0xe0] sm:$0xff] }
  0x2b   : > { %3071 = vmatpush.bf16.msra.mxu1 %v2884_v17  ;;  %3072 = vmatpush.bf16.msra.mxu2 %v2884_v17  ;;  %v3375_v44 = vsel %vm3339_vm2, 0, %v734_v36  ;;  %v3379_v45 = vsel %vm3339_vm2, 0, %v748_v22  ;;  %v591_v47 = vadd.f32 %v3284_v8, %v575_v35  ;;  %v606_v48 = vmax.f32 %v590_v37, 0.0 }
  0x2c   : > { %3073 = vmatpush.bf16.msra.mxu3 %v2884_v17  ;;  %1166 = vmatpush.bf16.msra.mxu0 %v2884_v17  ;;  %v671_v49 = vunpack.c.l.b16 %v631_v40  ;;  %v2986_v52 = vunpack.c.l.bf16 %v3041_v38  ;;  %v2987_v55 = vunpack.c.h.bf16 %v3041_v38  ;;  %v2962_v56 = vunpack.c.l.bf16 %v2961_v43  ;;  %v2896_v38 = vld [vmem:[%s3985_s5 + $0x60] sm:$0xff] }
  0x2d   : > { %v607_v53 = vmax.f32 %v591_v47, 0.0  ;;  %v640_v54 = vpack.c.bf16 %v606_v48, %v606_v48  ;;  %v722_v59 = vshrl.u32 %v3370_v42, 16  ;;  %v2963_v61 = vunpack.c.h.bf16 %v2961_v43  ;;  %v2903_v47 = vld [vmem:[%s3985_s5 + $0x98] sm:$0xff] }
  0x2e   : > { %1177 = vmatmul.bf16.vlgmr.msra.gmra.mxu1 %v3365_v39  ;;  %1187 = vmatmul.bf16.vlgmr.msra.gmra.mxu2 %v3375_v44  ;;  %v690_v57 = vpack.c.b16 %v671_v49, %v670_v41  ;;  %v578_v60 = vmul.f32 %v3270_v3, %v2986_v52  ;;  %v579_v1 = vmul.f32 %v3270_v3, %v2987_v55  ;;  %v725_v17 = vshll.u32 %v3370_v42, 16 }
  0x2f   : > { %1257 = vmatpush.bf16.msrb.mxu2 %v2907_v29  ;;  %1197 = vmatmul.bf16.vlgmr.msra.gmra.mxu3 %v3379_v45  ;;  %v641_v63 = vpack.c.bf16 %v607_v53, %v607_v53  ;;  %v680_v0 = vunpack.c.l.b16 %v640_v54  ;;  %v566_v2 = vmul.f32 %v3270_v3, %v2962_v56  ;;  %v567_v12 = vmul.f32 %v3270_v3, %v2963_v61  ;;  %v2921_v29 = vld [vmem:[%s3985_s5 + $0x128] sm:$0xff]  ;;  %v2911_v53 = vld [vmem:[%s3985_s5 + $0xd8] sm:$0xff]  ;;  %v2902_v61 = vld [vmem:[%s3985_s5 + $0x90] sm:$0xff] }
  0x30   : > { %1534 = vmatpush.bf16.msrb.mxu3 %v2915_v30  ;;  %1208 = vmatpush.bf16.msrb.mxu1 %v2899_v31  ;;  %v701_v4 = vshrl.u32 %v690_v57, 16  ;;  %v704_v5 = vshll.u32 %v690_v57, 16  ;;  %v594_v9 = vadd.f32 %v3284_v8, %v578_v60  ;;  %v595_v11 = vadd.f32 %v3284_v8, %v579_v1  ;;  %v2904_v30 = vld [vmem:[%s3985_s5 + $0xa0] sm:$0xff]  ;;  %v2895_v54 = vld [vmem:[%s3985_s5 + $0x58] sm:$0xff] }
  0x31   : > { %1583 = vmatpush.bf16.msrb.mxu0 %v2923_v46  ;;  %v681_v10 = vunpack.c.l.b16 %v641_v63  ;;  %v582_v13 = vadd.f32 %v3284_v8, %v566_v2  ;;  %v3419_v16 = vrot.slane %v722_v59, 7  ;;  %v583_v26 = vadd.f32 %v3284_v8, %v567_v12  ;;  %v2920_v46 = vld [vmem:[%s3985_s5 + $0x120] sm:$0xff]  ;;  %v2919_v60 = vld [vmem:[%s3985_s5 + $0x118] sm:$0xff]  ;;  %v2894_v2 = vld [vmem:[%s3985_s5 + $0x50] sm:$0xff] }
  0x32   : > { %v3414_v14 = vrot.slane %v701_v4, 7  ;;  %v610_v19 = vmax.f32 %v594_v9, 0.0  ;;  %v611_v21 = vmax.f32 %v595_v11, 0.0  ;;  %v2918_v9 = vld [vmem:[%s3985_s5 + $0x110] sm:$0xff] }
  0x33   : > { %1258 = vmatpush.bf16.msrb.mxu2 %v2906_v50  ;;  %v695_v20 = vpack.c.b16 %v681_v10, %v680_v0  ;;  %v598_v27 = vmax.f32 %v582_v13, 0.0  ;;  %v599_v35 = vmax.f32 %v583_v26, 0.0  ;;  %v727_v31 = vor.u32 %v725_v17, %v3419_v16  ;;  %v2901_v10 = vld [vmem:[%s3985_s5 + $0x88] sm:$0xff]  ;;  %v2900_v26 = vld [vmem:[%s3985_s5 + $0x80] sm:$0xff] }
  0x34   : > { %1535 = vmatpush.bf16.msrb.mxu3 %v2914_v51  ;;  %1209 = vmatpush.bf16.msrb.mxu1 %v2898_v58  ;;  %v706_v28 = vor.u32 %v704_v5, %v3414_v14  ;;  %v644_v32 = vpack.c.bf16 %v610_v19, %v610_v19  ;;  %v645_v22 = vpack.c.bf16 %v611_v21, %v611_v21  ;;  %v2910_v5 = vld [vmem:[%s3985_s5 + $0xd0] sm:$0xff]  ;;  %v2909_v19 = vld [vmem:[%s3985_s5 + $0xc8] sm:$0xff] }
  0x35   : > { %1584 = vmatpush.bf16.msrb.mxu0 %v2922_v62  ;;  %v736_v34 = vshrl.u32 %v695_v20, 16  ;;  %v739_v36 = vshll.u32 %v695_v20, 16  ;;  %v632_v41 = vpack.c.bf16 %v598_v27, %v598_v27  ;;  %v633_v48 = vpack.c.bf16 %v599_v35, %v599_v35  ;;  %v2917_v21 = vld [vmem:[%s3985_s5 + $0x108] sm:$0xff]  ;;  %v2939_v27 = vld [vmem:[%s3985_s5 + $0x1b8] sm:$0xff] }
  0x36   : > { %v3435_v37 = vsel %vm3339_vm2, 0, %v706_v28  ;;  %v684_v40 = vunpack.c.l.b16 %v644_v32  ;;  %v685_v43 = vunpack.c.l.b16 %v645_v22  ;;  %v3453_v52 = vsel %vm3339_vm2, 0, %v727_v31  ;;  %v2892_v28 = vld [vmem:[%s3985_s5 + $0x40] sm:$0xff]  ;;  %v2947_v35 = vld [vmem:[%s3985_s5 + $0x1f8] sm:$0xff] }
  0x37   : > { %1259 = vmatpush.bf16.msrb.mxu2 %v2905_v6  ;;  %1167 = vmatmul.bf16.vlgmr.msra.gmra.mxu0 %v3435_v37  ;;  %v3442_v42 = vrot.slane %v736_v34, 7  ;;  %v672_v49 = vunpack.c.l.b16 %v632_v41  ;;  %v673_v55 = vunpack.c.l.b16 %v633_v48  ;;  %v817_v63 = vshll.u32 %v3435_v37, 16  ;;  %v2908_v34 = vld [vmem:[%s3985_s5 + $0xc0] sm:$0xff]  ;;  %v2955_v41 = vld [vmem:[%s3985_s5 + $0x238] sm:$0xff] }
  0x38   : > { %1536 = vmatpush.bf16.msrb.mxu3 %v2913_v7  ;;  %1210 = vmatpush.bf16.msrb.mxu1 %v2897_v15  ;;  %v697_v51 = vpack.c.b16 %v685_v43, %v684_v40  ;;  %v803_v6 = vsel %vm3339_vm2, %v3414_v14, 0  ;;  %v815_v12 = vshrl.u32 %v3435_v37, 16  ;;  %v2893_v15 = vld [vmem:[%s3985_s5 + $0x48] sm:$0xff]  ;;  %v935_v32 = vrot.slane %v3435_v37, 1  ;;  %v2916_v22 = vld [vmem:[%s3985_s5 + $0x100] sm:$0xff]  ;;  %v2938_v43 = vld [vmem:[%s3985_s5 + $0x1b0] sm:$0xff] }
  0x39   : > { %1585 = vmatpush.bf16.msrb.mxu0 %v2921_v29  ;;  %v741_v50 = vor.u32 %v739_v36, %v3442_v42  ;;  %v691_v59 = vpack.c.b16 %v673_v55, %v672_v49  ;;  %v819_v13 = vrot.slane %v817_v63, 1  ;;  %v822_v17 = vshll.u32 %v803_v6, 16  ;;  %v2931_v36 = vld [vmem:[%s3985_s5 + $0x178] sm:$0xff]  ;;  %v2937_v55 = vld [vmem:[%s3985_s5 + $0x1a8] sm:$0xff] }
  0x3a   : > { %v750_v57 = vshrl.u32 %v697_v51, 16  ;;  %v753_v58 = vshll.u32 %v697_v51, 16  ;;  %v2954_v51 = vld [vmem:[%s3985_s5 + $0x230] sm:$0xff]  ;;  %v2953_v63 = vld [vmem:[%s3985_s5 + $0x228] sm:$0xff] }
  0x3b   : > { %1260 = vmatpush.bf16.msrb.mxu2 %v2904_v30  ;;  %v3463_v56 = vsel %vm3339_vm2, 0, %v741_v50  ;;  %v708_v0 = vshrl.u32 %v691_v59, 16  ;;  %v711_v1 = vshll.u32 %v691_v59, 16  ;;  %v820_v29 = vor.u32 %v819_v13, %v815_v12  ;;  %v2946_v50 = vld [vmem:[%s3985_s5 + $0x1f0] sm:$0xff] }
  0x3c   : > { %1537 = vmatpush.bf16.msrb.mxu3 %v2912_v33  ;;  %1211 = vmatpush.bf16.msrb.mxu1 %v2896_v38  ;;  %v3473_v62 = vrot.slane %v750_v57, 7  ;;  %v824_v30 = vrot.slane %v822_v17, 1  ;;  %v936_v33 = vrot.slane %v803_v6, 1  ;;  %v2945_v57 = vld [vmem:[%s3985_s5 + $0x1e8] sm:$0xff]  ;;  %v941_v13 = vrot.slane %v3365_v39, 1  ;;  %v2952_v17 = vld [vmem:[%s3985_s5 + $0x220] sm:$0xff] }
  0x3d   : > { %1586 = vmatpush.bf16.msrb.mxu0 %v2920_v46  ;;  %v710_v7 = vrot.slane %v708_v0, 7  ;;  %v2930_v46 = vld [vmem:[%s3985_s5 + $0x170] sm:$0xff]  ;;  %v841_v0 = vshll.u32 %v3365_v39, 16 }
  0x3e   : > { %1182 = vmatmul.bf16.gmra.mxu1 %v3453_v52  ;;  %1192 = vmatmul.bf16.gmra.mxu2 %v3463_v56  ;;  %v755_v4 = vor.u32 %v753_v58, %v3473_v62  ;;  %v825_v31 = vsel %vm813_vm3, %v820_v29, %v824_v30  ;;  %v937_v40 = vsel %vm934_vm4, %v935_v32, %v936_v33  ;;  %v2943_v32 = vld [vmem:[%s3985_s5 + $0x1d8] sm:$0xff] }
  0x3f   : > { %1261 = vmatpush.bf16.msrb.mxu2 %v2903_v47  ;;  %v713_v14 = vor.u32 %v711_v1, %v710_v7  ;;  %v804_v38 = vsel %vm3339_vm2, %v710_v7, 0  ;;  %v805_v1 = vsel %vm3339_vm2, %v3334_v18, 0  ;;  %v2936_v18 = vld [vmem:[%s3985_s5 + $0x1a0] sm:$0xff] }
  0x40   : > { %1538 = vmatpush.bf16.msrb.mxu3 %v2911_v53  ;;  %1212 = vmatpush.bf16.msrb.mxu1 %v2895_v54  ;;  %v3494_v11 = vsel %vm3339_vm2, 0, %v755_v4  ;;  %v834_v49 = vshll.u32 %v804_v38, 16  ;;  %v839_v4 = vshrl.u32 %v3365_v39, 16  ;;  %v846_v6 = vshll.u32 %v805_v1, 16 }
  0x41   : > { %1587 = vmatpush.bf16.msrb.mxu0 %v2919_v60  ;;  %1202 = vmatmul.bf16.gmra.mxu3 %v3494_v11  ;;  %v3506_v20 = vsel %vm3339_vm2, 0, %v713_v14  ;;  %v939_v60 = vrot.slane %v804_v38, 1  ;;  %v942_v14 = vrot.slane %v805_v1, 1  ;;  %v807_v38 = vsel %vm3339_vm2, %v3343_v24, 0  ;;  %v2934_v24 = vld [vmem:[%s3985_s5 + $0x190] sm:$0xff] }
  0x42   : > { %v829_v37 = vshll.u32 %v3506_v20, 16  ;;  %v827_v47 = vshrl.u32 %v3506_v20, 16  ;;  %v836_v54 = vrot.slane %v834_v49, 1  ;;  %v938_v59 = vrot.slane %v3506_v20, 1 }
  0x43   : > { %1262 = vmatpush.bf16.msrb.mxu2 %v2902_v61  ;;  %v2929_v61 = vld [vmem:[%s3985_s5 + $0x168] sm:$0xff] }
  0x44   : > { %1213 = vmatpush.bf16.msrb.mxu1 %v2894_v2  ;;  %1539 = vmatpush.bf16.msrb.mxu3 %v2910_v5  ;;  %v831_v48 = vrot.slane %v829_v37, 1  ;;  %v3575_v2 = vsel %vm934_vm4, %v938_v59, %v939_v60  ;;  %v843_v5 = vrot.slane %v841_v0, 1  ;;  %v865_v37 = vshll.u32 %v3375_v44, 16  ;;  %v3042_v59 = vld [vmem:[%s3265_s13 + $0x38] sm:$0xff]  }
  0x45   : > { %1588 = vmatpush.bf16.msrb.mxu0 %v2918_v9  ;;  %v848_v9 = vrot.slane %v846_v6, 1  ;;  %v875_v60 = vshrl.u32 %v3463_v56, 16  ;;  %v2990_v0 = vunpack.c.l.bf16 %v3042_v59  ;;  %v2991_v1 = vunpack.c.h.bf16 %v3042_v59 }
  0x46   : > { %v832_v53 = vor.u32 %v831_v48, %v827_v47  ;;  %v844_v7 = vor.u32 %v843_v5, %v839_v4  ;;  %v2942_v48 = vld [vmem:[%s3985_s5 + $0x1d0] sm:$0xff] }
  0x47   : > { %1263 = vmatpush.bf16.msrb.mxu2 %v2901_v10  ;;  %1172 = vmatmul.bf16.gmra.mxu0 %v3506_v20  ;;  %v2944_v10 = vld [vmem:[%s3985_s5 + $0x1e0] sm:$0xff]  ;;  %v581_v6 = vmul.f32 %v3270_v3, %v2991_v1 }
  0x48   : > { %1214 = vmatpush.bf16.msrb.mxu1 %v2893_v15  ;;  %1540 = vmatpush.bf16.msrb.mxu3 %v2909_v19  ;;  %v837_v58 = vsel %vm813_vm3, %v832_v53, %v836_v54  ;;  %v3587_v12 = vsel %vm813_vm3, %v844_v7, %v848_v9  ;;  %v2928_v15 = vld [vmem:[%s3985_s5 + $0x160] sm:$0xff]  ;;  %v853_v19 = vshll.u32 %v3453_v52, 16  ;;  %v2926_v53 = vld [vmem:[%s3985_s5 + $0x150] sm:$0xff]  ;;  %v2933_v9 = vld [vmem:[%s3985_s5 + $0x188] sm:$0xff] }
  0x49   : > { %1589 = vmatpush.bf16.msrb.mxu0 %v2917_v21  ;;  %v3602_v21 = vsel %vm934_vm4, %v941_v13, %v942_v14  ;;  %v2950_v54 = vld [vmem:[%s3985_s5 + $0x210] sm:$0xff]  ;;  %v597_v13 = vadd.f32 %v3284_v8, %v581_v6  ;;  %v950_v14 = vrot.slane %v3463_v56, 1 }
  0x4b   : > { %1264 = vmatpush.bf16.msrb.mxu2 %v2900_v26  ;;  %v851_v26 = vshrl.u32 %v3453_v52, 16 }
  0x4c   : > { %1215 = vmatpush.bf16.msrb.mxu1 %v2892_v28  ;;  %1541 = vmatpush.bf16.msrb.mxu3 %v2908_v34  ;;  %v944_v34 = vrot.slane %v3453_v52, 1 }
  0x4d   : > { %1590 = vmatpush.bf16.msrb.mxu0 %v2916_v22  ;;  %v2927_v22 = vld [vmem:[%s3985_s5 + $0x158] sm:$0xff] }
  0x4e   : > { %1265 = vmatmul.bf16.vlgmr.msrb.gmra.mxu2 %v937_v40  ;;  %v863_v40 = vshrl.u32 %v3375_v44, 16 }
  0x4f   : > { %1941 = vmatpush.bf16.msra.mxu2 %v2939_v27  ;;  %1216 = vmatmul.bf16.vlgmr.msrb.gmra.mxu1 %v825_v31  ;;  %v855_v27 = vrot.slane %v853_v19, 1  ;;  %v809_v19 = vsel %vm3339_vm2, %v3345_v25, 0 }
  0x50   : > { %1632 = vmatpush.bf16.msra.mxu1 %v2931_v36  ;;  %1990 = vmatpush.bf16.msra.mxu3 %v2947_v35  ;;  %v2951_v35 = vld [vmem:[%s3985_s5 + $0x218] sm:$0xff] }
  0x51   : > { %2039 = vmatpush.bf16.msra.mxu0 %v2955_v41  ;;  %1542 = vmatmul.bf16.vlgmr.msrb.gmra.mxu3 %v3506_v20  ;;  %v806_v20 = vsel %vm3339_vm2, %v3419_v16, 0  ;;  %v856_v29 = vor.u32 %v855_v27, %v851_v26  ;;  %v2935_v16 = vld [vmem:[%s3985_s5 + $0x198] sm:$0xff]  ;;  %v867_v41 = vrot.slane %v865_v37, 1  ;;  %v887_v27 = vshrl.u32 %v3379_v45, 16  ;;  %v2932_v37 = vld [vmem:[%s3985_s5 + $0x180] sm:$0xff] }
  0x52   : > { %v858_v28 = vshll.u32 %v806_v20, 16  ;;  %v945_v36 = vrot.slane %v806_v20, 1 }
  0x53   : > { %1942 = vmatpush.bf16.msra.mxu2 %v2938_v43  ;;  %v870_v43 = vshll.u32 %v807_v38, 16 }
  0x54   : > { %1633 = vmatpush.bf16.msra.mxu1 %v2930_v46  ;;  %1991 = vmatpush.bf16.msra.mxu3 %v2946_v50  ;;  %v860_v30 = vrot.slane %v858_v28, 1  ;;  %v3630_v31 = vsel %vm934_vm4, %v944_v34, %v945_v36  ;;  %v868_v46 = vor.u32 %v867_v41, %v863_v40  ;;  %v947_v50 = vrot.slane %v3375_v44, 1 }
  0x55   : > { %2040 = vmatpush.bf16.msra.mxu0 %v2954_v51  ;;  %v872_v47 = vrot.slane %v870_v43, 1  ;;  %v948_v51 = vrot.slane %v807_v38, 1  ;;  %v2940_v38 = vld [vmem:[%s3985_s5 + $0x1c0] sm:$0xff]  ;;  %v953_v41 = vrot.slane %v3379_v45, 1  ;;  %v954_v43 = vrot.slane %v809_v19, 1 }
  0x56   : > { %v3615_v33 = vsel %vm813_vm3, %v856_v29, %v860_v30  ;;  %v894_v29 = vshll.u32 %v809_v19, 16  ;;  %v2949_v30 = vld [vmem:[%s3985_s5 + $0x208] sm:$0xff] }
  0x57   : > { %1943 = vmatpush.bf16.msra.mxu2 %v2937_v55  ;;  %1591 = vmatmul.bf16.vlgmr.msrb.gmra.mxu0 %v837_v58  ;;  %v3643_v49 = vsel %vm813_vm3, %v868_v46, %v872_v47  ;;  %v877_v55 = vshll.u32 %v3463_v56, 16  ;;  %v2924_v46 = vld [vmem:[%s3985_s5 + $0x140] sm:$0xff]  ;;  %v901_v47 = vshll.u32 %v3494_v11, 16 }
  0x58   : > { %1992 = vmatpush.bf16.msra.mxu3 %v2945_v57  ;;  %1634 = vmatpush.bf16.msra.mxu1 %v2929_v61  ;;  %v808_v57 = vsel %vm3339_vm2, %v3442_v42, 0  ;;  %v580_v42 = vmul.f32 %v3270_v3, %v2990_v0  ;;  %v896_v34 = vrot.slane %v894_v29, 1 }
  0x59   : > { %2041 = vmatpush.bf16.msra.mxu0 %v2953_v63  ;;  %v879_v61 = vrot.slane %v877_v55, 1  ;;  %v882_v63 = vshll.u32 %v808_v57, 16  ;;  %v951_v3 = vrot.slane %v808_v57, 1  ;;  %v2948_v57 = vld [vmem:[%s3985_s5 + $0x200] sm:$0xff] }
  0x5b   : > { %1944 = vmatpush.bf16.msra.mxu2 %v2936_v18  ;;  %v880_v4 = vor.u32 %v879_v61, %v875_v60  ;;  %v884_v5 = vrot.slane %v882_v63, 1  ;;  %v2941_v18 = vld [vmem:[%s3985_s5 + $0x1c8] sm:$0xff]  ;;  %v3688_v26 = vsel %vm934_vm4, %v950_v14, %v951_v3 }
  0x5c   : > { %1993 = vmatpush.bf16.msra.mxu3 %v2944_v10  ;;  %1635 = vmatpush.bf16.msra.mxu1 %v2928_v15  ;;  %v596_v10 = vadd.f32 %v3284_v8, %v580_v42  ;;  %v2925_v15 = vld [vmem:[%s3985_s5 + $0x148] sm:$0xff]  ;;  %v613_v8 = vmax.f32 %v597_v13, 0.0 }
  0x5d   : > { %2042 = vmatpush.bf16.msra.mxu0 %v2952_v17  ;;  %v3668_v7 = vsel %vm813_vm3, %v880_v4, %v884_v5  ;;  %v889_v17 = vshll.u32 %v3379_v45, 16 }
  0x5e   : > { %1270 = vmatmul.bf16.gmra.mxu2 %v3575_v2  ;;  %v612_v20 = vmax.f32 %v596_v10, 0.0  ;;  %v647_v25 = vpack.c.bf16 %v613_v8, %v613_v8 }
  0x5f   : > { %1221 = vmatmul.bf16.gmra.mxu1 %v837_v58  ;;  %1945 = vmatpush.bf16.msra.mxu2 %v2935_v16  ;;  %v3658_v58 = vsel %vm934_vm4, %v947_v50, %v948_v51  ;;  %v891_v28 = vrot.slane %v889_v17, 1  ;;  %v3718_v51 = vsel %vm934_vm4, %v953_v41, %v954_v43 }
  0x60   : > { %1994 = vmatpush.bf16.msra.mxu3 %v2943_v32  ;;  %1636 = vmatpush.bf16.msra.mxu1 %v2927_v22  ;;  %v646_v16 = vpack.c.bf16 %v612_v20, %v612_v20  ;;  %v687_v22 = vunpack.c.l.b16 %v647_v25 }
  0x61   : > { %1547 = vmatmul.bf16.gmra.mxu3 %v3365_v39  ;;  %2043 = vmatpush.bf16.msra.mxu0 %v2951_v35  ;;  %v892_v32 = vor.u32 %v891_v28, %v887_v27 }
  0x62   : > { %v686_v36 = vunpack.c.l.b16 %v646_v16 }
  0x63   : > { %1946 = vmatpush.bf16.msra.mxu2 %v2934_v24  ;;  %v3698_v35 = vsel %vm813_vm3, %v892_v32, %v896_v34  ;;  %v810_v24 = vsel %vm3339_vm2, %v3473_v62, 0 }
  0x64   : > { %1995 = vmatpush.bf16.msra.mxu3 %v2942_v48  ;;  %1637 = vmatpush.bf16.msra.mxu1 %v2926_v53  ;;  %v698_v40 = vpack.c.b16 %v687_v22, %v686_v36  ;;  %v899_v53 = vshrl.u32 %v3494_v11, 16  ;;  %v906_v55 = vshll.u32 %v810_v24, 16 }
  0x65   : > { %2044 = vmatpush.bf16.msra.mxu0 %v2950_v54  ;;  %v903_v54 = vrot.slane %v901_v47, 1 }
  0x66   : > { %v757_v48 = vshrl.u32 %v698_v40, 16  ;;  %v760_v59 = vshll.u32 %v698_v40, 16  ;;  %v908_v61 = vrot.slane %v906_v55, 1 }
  0x67   : > { %1596 = vmatmul.bf16.gmra.mxu0 %v3587_v12  ;;  %1947 = vmatpush.bf16.msra.mxu2 %v2933_v9  ;;  %v904_v60 = vor.u32 %v903_v54, %v899_v53  ;;  %v956_v9 = vrot.slane %v3494_v11, 1 }
  0x68   : > { %1996 = vmatpush.bf16.msra.mxu3 %v2941_v18  ;;  %1638 = vmatpush.bf16.msra.mxu1 %v2925_v15  ;;  %v759_v62 = vrot.slane %v757_v48, 7  ;;  %v957_v18 = vrot.slane %v810_v24, 1 }
  0x69   : > { %2045 = vmatpush.bf16.msra.mxu0 %v2949_v30  ;;  %v3734_v42 = vsel %vm813_vm3, %v904_v60, %v908_v61 }
  0x6a   : > { %v762_v1 = vor.u32 %v760_v59, %v759_v62  ;;  %v3747_v14 = vsel %vm3339_vm2, %v759_v62, 0  ;;  %v3752_v15 = vsel %vm934_vm4, %v956_v9, %v957_v18 }
  0x6b   : > { %1948 = vmatpush.bf16.msra.mxu2 %v2932_v37  ;;  %v1330_v27 = vshll.u32 %v3747_v14, 16 }
  0x6c   : > { %1997 = vmatpush.bf16.msra.mxu3 %v2940_v38  ;;  %1639 = vmatpush.bf16.msra.mxu1 %v2924_v46  ;;  %v3738_v6 = vsel %vm3339_vm2, 0, %v762_v1 }
  0x6d   : > { %2046 = vmatpush.bf16.msra.mxu0 %v2948_v57  ;;  %v1325_v13 = vshll.u32 %v3738_v6, 16  ;;  %v1323_v20 = vshrl.u32 %v3738_v6, 16  ;;  %v1332_v29 = vrot.slane %v1330_v27, 1 }
  0x6e   : > { %1275 = vmatmul.bf16.gmra.mxu2 %v3602_v21 }
  0x6f   : > { %1226 = vmatmul.bf16.gmra.mxu1 %v3587_v12  ;;  %v1327_v8 = vrot.slane %v1325_v13, 1 }
  0x71   : > { %1552 = vmatmul.bf16.gmra.mxu3 %v3453_v52  ;;  %v1328_v28 = vor.u32 %v1327_v8, %v1323_v20 }
  0x73   : > { %v3766_v32 = vsel %vm813_vm3, %v1328_v28, %v1332_v29 }
  0x77   : > { %1601 = vmatmul.bf16.gmra.mxu0 %v3615_v33 }
  0x7e   : > { %1280 = vmatmul.bf16.gmra.mxu2 %v3630_v31 }
  0x7f   : > { %1231 = vmatmul.bf16.gmra.mxu1 %v3615_v33 }
  0x81   : > { %1557 = vmatmul.bf16.gmra.mxu3 %v3375_v44 }
  0x87   : > { %1606 = vmatmul.bf16.gmra.mxu0 %v3643_v49 }
  0x8e   : > { %1285 = vmatmul.bf16.gmra.mxu2 %v3658_v58 }
  0x8f   : > { %1236 = vmatmul.bf16.gmra.mxu1 %v3643_v49 }
  0x91   : > { %1562 = vmatmul.bf16.gmra.mxu3 %v3463_v56 }
  0x97   : > { %1611 = vmatmul.bf16.gmra.mxu0 %v3668_v7 }
  0x9e   : > { %1290 = vmatmul.bf16.gmra.mxu2 %v3688_v26 }
  0x9f   : > { %1241 = vmatmul.bf16.gmra.mxu1 %v3668_v7 }
  0xa1   : > { %1567 = vmatmul.bf16.gmra.mxu3 %v3379_v45 }
  0xa7   : > { %1616 = vmatmul.bf16.gmra.mxu0 %v3698_v35 }
  0xab   : > { %v3715_v50 = vpop.f32.mrf.mxu1 }
  0xae   : > { %1295 = vmatmul.bf16.gmra.mxu2 %v3718_v51 }
  0xaf   : > { %1246 = vmatmul.bf16.gmra.mxu1 %v3698_v35 }
  0xb1   : > { %v3726_v63 = vpop.f32.mrf.mxu2  ;;  %1572 = vmatmul.bf16.gmra.mxu3 %v3494_v11 }
  0xb2   : > { %v3728_v0 = vpop.f32.mrf.mxu3 }
  0xb3   : > { %v3731_v4 = vpop.f32.mrf.mxu1 }
  0xb4   : > { %v1168_v5 = vpop.f32.mrf.mxu0 }
  0xb7   : > { %1621 = vmatmul.bf16.gmra.mxu0 %v3734_v42 }
  0xb9   : > { %v3742_v10 = vpop.f32.mrf.mxu2 }
  0xba   : > { %v3754_v17 = vpop.f32.mrf.mxu3 }
  0xbb   : > { %v3749_v3 = vpop.f32.mrf.mxu1 }
  0xbc   : > { %v1170_v19 = vpop.f32.mrf.mxu0 }
  0xbe   : > { %1300 = vmatmul.bf16.gmra.mxu2 %v3752_v15 }
  0xbf   : > { %1251 = vmatmul.bf16.gmra.mxu1 %v3734_v42 }
  0xc1   : > { %v3760_v30 = vpop.f32.mrf.mxu2  ;;  %1577 = vmatmul.bf16.gmra.mxu3 %v3738_v6 }
  0xc3   : > { %v3763_v16 = vpop.f32.mrf.mxu1 }
  0xc4   : > { %v1173_v25 = vpop.f32.mrf.mxu0  ;;  %v3768_v34 = vpop.f32.mrf.mxu3 }
  0xc7   : > { %1626 = vmatmul.bf16.gmra.mxu0 %v3766_v32 }
  0xc9   : > { %v3771_v36 = vpop.f32.mrf.mxu2 }
  0xcc   : > { %v1217_v22 = vpop.f32.mrf.mxu1  ;;  %v1175_v38 = vpop.f32.mrf.mxu0 }
  0xcd   : > { %v1218_v37 = vadd.f32 %v1217_v22, %v1168_v5  ;;  %v3773_v40 = vpop.f32.mrf.mxu3 }
  0xce   : > { %1949 = vmatmul.bf16.vlgmr.msra.gmra.mxu2 %v3365_v39 }
  0xcf   : > { %1640 = vmatmul.bf16.vlgmr.msra.gmra.mxu1 %v3575_v2 }
  0xd1   : > { %v1266_v41 = vpop.f32.mrf.mxu2  ;;  %1998 = vmatmul.bf16.vlgmr.msra.gmra.mxu3 %v3587_v12 }
  0xd2   : > { %v3777_v43 = vadd.f32 %v1266_v41, %v1218_v37 }
  0xd4   : > { %v1219_v46 = vpop.f32.mrf.mxu1  ;;  %v1592_v24 = vpop.f32.mrf.mxu0 }
  0xd5   : > { %v1220_v47 = vadd.f32 %v1219_v46, %v1170_v19  ;;  %v1543_v48 = vpop.f32.mrf.mxu3 }
  0xd6   : > { %v3780_v53 = vadd.f32 %v1592_v24, %v1543_v48 }
  0xd7   : > { %2047 = vmatmul.bf16.vlgmr.msra.gmra.mxu0 %v3602_v21 }
  0xd9   : > { %v1268_v54 = vpop.f32.mrf.mxu2 }
  0xda   : > { %v3783_v55 = vadd.f32 %v1268_v54, %v1220_v47 }
  0xdc   : > { %v1222_v57 = vpop.f32.mrf.mxu1  ;;  %v1594_v62 = vpop.f32.mrf.mxu0 }
  0xdd   : > { %v1223_v2 = vadd.f32 %v1222_v57, %v1173_v25  ;;  %v1545_v39 = vpop.f32.mrf.mxu3 }
  0xde   : > { %1954 = vmatmul.bf16.gmra.mxu2 %v3453_v52  ;;  %v3787_v12 = vadd.f32 %v1594_v62, %v1545_v39 }
  0xdf   : > { %1645 = vmatmul.bf16.gmra.mxu1 %v3602_v21 }
  0xe1   : > { %v1271_v59 = vpop.f32.mrf.mxu2  ;;  %2003 = vmatmul.bf16.gmra.mxu3 %v3615_v33 }
  0xe2   : > { %v3789_v60 = vadd.f32 %v1271_v59, %v1223_v2 }
  0xe4   : > { %v1224_v61 = vpop.f32.mrf.mxu1  ;;  %v1597_v5 = vpop.f32.mrf.mxu0 }
  0xe5   : > { %v1225_v1 = vadd.f32 %v1224_v61, %v1175_v38  ;;  %v1548_v9 = vpop.f32.mrf.mxu3 }
  0xe6   : > { %v3792_v18 = vadd.f32 %v1597_v5, %v1548_v9  ;;  %v3117_v9 = vld [vmem:[%s3984_s4] ss:$0 sm:$0xff] }
  0xe7   : > { %2052 = vmatmul.bf16.gmra.mxu0 %v3630_v31 }
  0xe9   : > { %v1273_v13 = vpop.f32.mrf.mxu2 }
  0xea   : > { %v3795_v19 = vadd.f32 %v1273_v13, %v1225_v1 }
  0xec   : > { %v1227_v21 = vpop.f32.mrf.mxu1  ;;  %v1599_v20 = vpop.f32.mrf.mxu0 }
  0xed   : > { %v1228_v52 = vadd.f32 %v1227_v21, %v3715_v50  ;;  %v1550_v8 = vpop.f32.mrf.mxu3 }
  0xee   : > { %1959 = vmatmul.bf16.gmra.mxu2 %v3375_v44  ;;  %v3805_v33 = vadd.f32 %v1599_v20, %v1550_v8 }
  0xef   : > { %1650 = vmatmul.bf16.gmra.mxu1 %v3630_v31 }
  0xf1   : > { %v1276_v27 = vpop.f32.mrf.mxu2  ;;  %2008 = vmatmul.bf16.gmra.mxu3 %v3643_v49 }
  0xf2   : > { %v3807_v28 = vadd.f32 %v1276_v27, %v1228_v52 }
  0xf4   : > { %v1229_v50 = vpop.f32.mrf.mxu1  ;;  %v1602_v44 = vpop.f32.mrf.mxu0 }
  0xf5   : > { %v1230_v31 = vadd.f32 %v1229_v50, %v3731_v4  ;;  %v1553_v29 = vpop.f32.mrf.mxu3 }
  0xf6   : > { %v3815_v25 = vadd.f32 %v1602_v44, %v1553_v29  ;;  %v627_v29 = vstv %s626_s18 }
  0xf7   : > { %2057 = vmatmul.bf16.gmra.mxu0 %v3658_v58 }
  0xf9   : > { %v1278_v22 = vpop.f32.mrf.mxu2 }
  0xfa   : > { %v3818_v37 = vadd.f32 %v1278_v22, %v1230_v31 }
  0xfc   : > { %v1232_v38 = vpop.f32.mrf.mxu1  ;;  %v1604_v46 = vpop.f32.mrf.mxu0 }
  0xfd   : > { %v1233_v41 = vadd.f32 %v1232_v38, %v3749_v3  ;;  %v1555_v49 = vpop.f32.mrf.mxu3 }
  0xfe   : > { %1964 = vmatmul.bf16.gmra.mxu2 %v3463_v56  ;;  %v3824_v4 = vadd.f32 %v1604_v46, %v1555_v49 }
  0xff   : > { %1655 = vmatmul.bf16.gmra.mxu1 %v3658_v58  ;;  %v2993_v58 = vld [vmem:[%s480_s12] sm:$0xff]  }
 0x100   : > { %v2994_v2 = vunpack.c.l.bf16 %v2993_v58  ;;  %v2995_v62 = vunpack.c.h.bf16 %v2993_v58 }
 0x101   : > { %v1281_v47 = vpop.f32.mrf.mxu2  ;;  %2013 = vmatmul.bf16.gmra.mxu3 %v3668_v7  ;;  %v3116_v7 = vld [vmem:[%s3983_s3] ss:$0 sm:$0xff] }
 0x102   : > { %v3826_v24 = vadd.f32 %v1281_v47, %v1233_v41  ;;  %v618_v59 = vmul.f32 %v3116_v7, %v2994_v2  ;;  %v619_v61 = vmul.f32 %v3116_v7, %v2995_v62 }
 0x104   : > { %v1234_v48 = vpop.f32.mrf.mxu1  ;;  %v1607_v54 = vpop.f32.mrf.mxu0  ;;  %v620_v13 = vadd.f32 %v3117_v9, %v618_v59  ;;  %v621_v21 = vadd.f32 %v3117_v9, %v619_v61 }
 0x105   : > { %v1235_v3 = vadd.f32 %v1234_v48, %v3763_v16  ;;  %v1558_v57 = vpop.f32.mrf.mxu3 }
 0x106   : > { %v3834_v56 = vadd.f32 %v1607_v54, %v1558_v57  ;;  %v622_v50 = vmax.f32 %v620_v13, 0.0  ;;  %v623_v31 = vmax.f32 %v621_v21, 0.0 }
 0x107   : > { %2062 = vmatmul.bf16.gmra.mxu0 %v3688_v26 }
 0x108   : > { %v628_v41 = vmul.f32 %v627_v29, %v622_v50  ;;  %v629_v46 = vmul.f32 %v627_v29, %v623_v31 }
 0x109   : > { %v1283_v39 = vpop.f32.mrf.mxu2 }
 0x10a   : > { %v3840_v1 = vadd.f32 %v1283_v39, %v1235_v3  ;;  %v648_v47 = vpack.c.bf16 %v628_v41, %v628_v41  ;;  %v649_v48 = vpack.c.bf16 %v629_v46, %v629_v46 }
 0x10c   : > { %v1237_v16 = vpop.f32.mrf.mxu1  ;;  %v1609_v5 = vpop.f32.mrf.mxu0  ;;  %v688_v58 = vunpack.c.l.b16 %v648_v47 }
 0x10d   : > { %v1560_v52 = vpop.f32.mrf.mxu3  ;;  %v1238_v8 = vadd.f32 %v1237_v16, %v3726_v63 }
 0x10e   : > { %1969 = vmatmul.bf16.gmra.mxu2 %v3379_v45  ;;  %v3847_v20 = vadd.f32 %v1609_v5, %v1560_v52 }
 0x10f   : > { %1660 = vmatmul.bf16.gmra.mxu1 %v3688_v26 }
 0x111   : > { %v1286_v27 = vpop.f32.mrf.mxu2  ;;  %2018 = vmatmul.bf16.gmra.mxu3 %v3698_v35  ;;  %v689_v35 = vunpack.c.l.b16 %v649_v48 }
 0x112   : > { %v3850_v44 = vadd.f32 %v1286_v27, %v1238_v8 }
 0x114   : > { %v1239_v22 = vpop.f32.mrf.mxu1  ;;  %v1612_v38 = vpop.f32.mrf.mxu0 }
 0x115   : > { %v1563_v26 = vpop.f32.mrf.mxu3  ;;  %v1240_v45 = vadd.f32 %v1239_v22, %v3742_v10  ;;  %v699_v10 = vpack.c.b16 %v689_v35, %v688_v58  ;;  %v1337_v22 = vrot.slane %v3738_v6, 1 }
 0x116   : > { %v3853_v49 = vadd.f32 %v1612_v38, %v1563_v26 }
 0x117   : > { %2067 = vmatmul.bf16.gmra.mxu0 %v3718_v51  ;;  %v764_v5 = vshrl.u32 %v699_v10, 16  ;;  %v767_v52 = vshll.u32 %v699_v10, 16 }
 0x119   : > { %v1288_v63 = vpop.f32.mrf.mxu2  ;;  %v766_v21 = vrot.slane %v764_v5, 7 }
 0x11a   : > { %v3857_v3 = vadd.f32 %v1288_v63, %v1240_v45 }
 0x11b   : > { %v769_v50 = vor.u32 %v767_v52, %v766_v21 }
 0x11c   : > { %v1242_v54 = vpop.f32.mrf.mxu1  ;;  %v1614_v57 = vpop.f32.mrf.mxu0 }
 0x11d   : > { %v1565_v2 = vpop.f32.mrf.mxu3  ;;  %v1243_v39 = vadd.f32 %v1242_v54, %v3760_v30  ;;  %v802_v41 = vsel %vm3339_vm2, 0, %v769_v50 }
 0x11e   : > { %1974 = vmatmul.bf16.gmra.mxu2 %v3494_v11  ;;  %v3861_v62 = vadd.f32 %v1614_v57, %v1565_v2  ;;  %v1730_v48 = vshrl.u32 %v802_v41, 16 }
 0x11f   : > { %1665 = vmatmul.bf16.gmra.mxu1 %v3718_v51 }
 0x121   : > { %v1291_v7 = vpop.f32.mrf.mxu2  ;;  %2023 = vmatmul.bf16.gmra.mxu3 %v3734_v42 }
 0x122   : > { %v3864_v59 = vadd.f32 %v1291_v7, %v1243_v39 }
 0x124   : > { %v1244_v61 = vpop.f32.mrf.mxu1  ;;  %v1617_v16 = vpop.f32.mrf.mxu0 }
 0x125   : > { %v1568_v9 = vpop.f32.mrf.mxu3  ;;  %v1245_v11 = vadd.f32 %v1244_v61, %v3771_v36  ;;  %v1338_v36 = vrot.slane %v3747_v14, 1 }
 0x126   : > { %v3867_v13 = vadd.f32 %v1617_v16, %v1568_v9 }
 0x127   : > { %2072 = vmatmul.bf16.gmra.mxu0 %v3752_v15  ;;  %v1339_v63 = vsel %vm934_vm4, %v1337_v22, %v1338_v36 }
 0x129   : > { %v1293_v51 = vpop.f32.mrf.mxu2 }
 0x12a   : > { %v3871_v30 = vadd.f32 %v1293_v51, %v1245_v11 }
 0x12c   : > { %v1247_v8 = vpop.f32.mrf.mxu1  ;;  %v1619_v27 = vpop.f32.mrf.mxu0 }
 0x12d   : > { %v1570_v31 = vpop.f32.mrf.mxu3  ;;  %v1248_v29 = vadd.f32 %v1247_v8, %v3728_v0  ;;  %v812_v0 = vsel %vm3339_vm2, %v766_v21, 0 }
 0x12e   : > { %1979 = vmatmul.bf16.gmra.mxu2 %v3738_v6  ;;  %v3875_v42 = vadd.f32 %v1619_v27, %v1570_v31  ;;  %v1737_v57 = vshll.u32 %v812_v0, 16  ;;  %v1745_v5 = vrot.slane %v812_v0, 1 }
 0x12f   : > { %1670 = vmatmul.bf16.gmra.mxu1 %v3752_v15  ;;  %v1732_v15 = vshll.u32 %v802_v41, 16 }
 0x130   : > { %v1739_v39 = vrot.slane %v1737_v57, 1 }
 0x131   : > { %v1296_v38 = vpop.f32.mrf.mxu2  ;;  %2028 = vmatmul.bf16.gmra.mxu3 %v3766_v32  ;;  %v1734_v54 = vrot.slane %v1732_v15, 1 }
 0x132   : > { %v3882_v46 = vadd.f32 %v1296_v38, %v1248_v29 }
 0x133   : > { %v1735_v2 = vor.u32 %v1734_v54, %v1730_v48 }
 0x134   : > { %v1249_v26 = vpop.f32.mrf.mxu1  ;;  %v1622_v45 = vpop.f32.mrf.mxu0 }
 0x135   : > { %v1573_v47 = vpop.f32.mrf.mxu3  ;;  %v1250_v14 = vadd.f32 %v1249_v26, %v3754_v17  ;;  %v1740_v16 = vsel %vm813_vm3, %v1735_v2, %v1739_v39  ;;  %v1744_v17 = vrot.slane %v802_v41, 1 }
 0x136   : > { %v3888_v6 = vadd.f32 %v1622_v45, %v1573_v47 }
 0x137   : > { %2077 = vmatmul.bf16.gmra.mxu0 %v1339_v63  ;;  %v1746_v52 = vsel %vm934_vm4, %v1744_v17, %v1745_v5 }
 0x139   : > { %v1298_v58 = vpop.f32.mrf.mxu2 }
 0x13a   : > { %v3891_v35 = vadd.f32 %v1298_v58, %v1250_v14 }
 0x13c   : > { %v1252_v32 = vpop.f32.mrf.mxu1  ;;  %v1624_v7 = vpop.f32.mrf.mxu0 }
 0x13d   : > { %v1575_v10 = vpop.f32.mrf.mxu3  ;;  %v1253_v61 = vadd.f32 %v1252_v32, %v3768_v34 }
 0x13e   : > { %1984 = vmatmul.bf16.gmra.mxu2 %v802_v41  ;;  %v3893_v23 = vadd.f32 %v1624_v7, %v1575_v10 }
 0x13f   : > { %1675 = vmatmul.bf16.gmra.mxu1 %v1339_v63 }
 0x141   : > { %v1301_v9 = vpop.f32.mrf.mxu2  ;;  %2033 = vmatmul.bf16.gmra.mxu3 %v1740_v16 }
 0x142   : > { %v3897_v11 = vadd.f32 %v1301_v9, %v1253_v61 }
 0x144   : > { %v1254_v51 = vpop.f32.mrf.mxu1  ;;  %v1627_v21 = vpop.f32.mrf.mxu0 }
 0x145   : > { %v1578_v8 = vpop.f32.mrf.mxu3  ;;  %v1255_v34 = vadd.f32 %v1254_v51, %v3773_v40 }
 0x146   : > { %v3900_v27 = vadd.f32 %v1627_v21, %v1578_v8 }
 0x147   : > { %2082 = vmatmul.bf16.gmra.mxu0 %v1746_v52 }
 0x149   : > { %v1303_v50 = vpop.f32.mrf.mxu2 }
 0x14a   : > { %v3903_v31 = vadd.f32 %v1303_v50, %v1255_v34 }
 0x14c   : > { %v1641_v29 = vpop.f32.mrf.mxu1  ;;  %v1629_v36 = vpop.f32.mrf.mxu0 }
 0x14d   : > { %v1642_v22 = vadd.f32 %v1641_v29, %v3780_v53  ;;  %v1580_v38 = vpop.f32.mrf.mxu3 }
 0x14e   : > { %v3907_v26 = vadd.f32 %v1629_v36, %v1580_v38 }
 0x14f   : > { %v1697_v41 = vadd.f32 %v1642_v22, %v3777_v43 }
 0x151   : > { %v1950_v15 = vpop.f32.mrf.mxu2 }
 0x154   : > { %v1643_v45 = vpop.f32.mrf.mxu1  ;;  %v2048_v63 = vpop.f32.mrf.mxu0 }
 0x155   : > { %v1644_v40 = vadd.f32 %v1643_v45, %v3787_v12  ;;  %v1999_v0 = vpop.f32.mrf.mxu3 }
 0x156   : > { %v2000_v53 = vadd.f32 %v1999_v0, %v1950_v15 }
 0x157   : > { %v1698_v47 = vadd.f32 %v1644_v40, %v3783_v55 }
 0x158   : > { %v2049_v14 = vadd.f32 %v2048_v63, %v2000_v53 }
 0x159   : > { %v1952_v48 = vpop.f32.mrf.mxu2 }
 0x15a   : > { %v2104_v57 = vadd.f32 %v2049_v14, %v1697_v41 }
 0x15c   : > { %v1646_v43 = vpop.f32.mrf.mxu1  ;;  %v2050_v58 = vpop.f32.mrf.mxu0  ;;  %v2152_v12 = vpack.c.bf16 %v2104_v57, %v2104_v57 }
 0x15d   : > { %v1647_v54 = vadd.f32 %v1646_v43, %v3792_v18  ;;  %v2001_v32 = vpop.f32.mrf.mxu3 }
 0x15e   : > { %v2002_v39 = vadd.f32 %v2001_v32, %v1952_v48  ;;  %v2184_v16 = vunpack.c.l.bf16 %v2152_v12 }
 0x15f   : > { %v1699_v2 = vadd.f32 %v1647_v54, %v3789_v60 }
 0x160   : > { %v2051_v7 = vadd.f32 %v2050_v58, %v2002_v39  ;;  %v2222_v8 = vmul.f32 %v2184_v16, %v2184_v16 }
 0x161   : > { %v1955_v10 = vpop.f32.mrf.mxu2 }
 0x162   : > { %v2105_v55 = vadd.f32 %v2051_v7, %v1698_v47 }
 0x164   : > { %v1648_v61 = vpop.f32.mrf.mxu1  ;;  %v2153_v17 = vpack.c.bf16 %v2105_v55, %v2105_v55  ;;  %v2999_v5 = vpack.c.bf16 %v2105_v55, %v2104_v57  ;;  %v2053_v9 = vpop.f32.mrf.mxu0 }
 0x165   : > { %v1649_v18 = vadd.f32 %v1648_v61, %v3805_v33  ;;  %v2004_v60 = vpop.f32.mrf.mxu3 }
 0x166   : > { %3000 = vst [vmem:[%s3921_s24] sm:$0xff] %v2999_v5   ;;  %v2185_v21 = vunpack.c.l.bf16 %v2153_v17  ;;  %v2005_v52 = vadd.f32 %v2004_v60, %v1955_v10 }
 0x167   : > { %v1700_v51 = vadd.f32 %v1649_v18, %v3795_v19 }
 0x168   : > { %v2200_v34 = vadd.f32 %v2185_v21, %v2184_v16  ;;  %v2223_v50 = vmul.f32 %v2185_v21, %v2185_v21  ;;  %v2054_v29 = vadd.f32 %v2053_v9, %v2005_v52 }
 0x169   : > { %v1957_v22 = vpop.f32.mrf.mxu2 }
 0x16a   : > { %v2238_v36 = vadd.f32 %v2223_v50, %v2222_v8  ;;  %v2106_v38 = vadd.f32 %v2054_v29, %v1699_v2 }
 0x16c   : > { %v1651_v41 = vpop.f32.mrf.mxu1  ;;  %v2154_v15 = vpack.c.bf16 %v2106_v38, %v2106_v38  ;;  %v2055_v45 = vpop.f32.mrf.mxu0 }
 0x16d   : > { %v1652_v33 = vadd.f32 %v1651_v41, %v3815_v25  ;;  %v2006_v40 = vpop.f32.mrf.mxu3 }
 0x16e   : > { %v2186_v19 = vunpack.c.l.bf16 %v2154_v15  ;;  %v2007_v0 = vadd.f32 %v2006_v40, %v1957_v22 }
 0x16f   : > { %v1701_v63 = vadd.f32 %v1652_v33, %v3807_v28 }
 0x170   : > { %v2201_v47 = vadd.f32 %v2200_v34, %v2186_v19  ;;  %v2224_v53 = vmul.f32 %v2186_v19, %v2186_v19  ;;  %v2056_v14 = vadd.f32 %v2055_v45, %v2007_v0 }
 0x171   : > { %v1960_v48 = vpop.f32.mrf.mxu2 }
 0x172   : > { %v2239_v43 = vadd.f32 %v2238_v36, %v2224_v53  ;;  %v2107_v54 = vadd.f32 %v2056_v14, %v1700_v51 }
 0x174   : > { %v1653_v57 = vpop.f32.mrf.mxu1  ;;  %v2155_v32 = vpack.c.bf16 %v2107_v54, %v2107_v54  ;;  %v3004_v2 = vpack.c.bf16 %v2107_v54, %v2106_v38  ;;  %v2058_v25 = vpop.f32.mrf.mxu0 }
 0x175   : > { %v1654_v58 = vadd.f32 %v1653_v57, %v3824_v4  ;;  %v2009_v39 = vpop.f32.mrf.mxu3 }
 0x176   : > { %3043 = vst [vmem:[%s3921_s24 + $0x8] sm:$0xff] %v3004_v2   ;;  %v2187_v28 = vunpack.c.l.bf16 %v2155_v32  ;;  %v2010_v7 = vadd.f32 %v2009_v39, %v1960_v48 }
 0x177   : > { %v1702_v12 = vadd.f32 %v1654_v58, %v3818_v37 }
 0x178   : > { %v2202_v10 = vadd.f32 %v2201_v47, %v2187_v28  ;;  %v2225_v55 = vmul.f32 %v2187_v28, %v2187_v28  ;;  %v2059_v61 = vadd.f32 %v2058_v25, %v2010_v7 }
 0x179   : > { %v1962_v18 = vpop.f32.mrf.mxu2 }
 0x17a   : > { %v2240_v16 = vadd.f32 %v2239_v43, %v2225_v55  ;;  %v2108_v17 = vadd.f32 %v2059_v61, %v1701_v63 }
 0x17c   : > { %v1656_v5 = vpop.f32.mrf.mxu1  ;;  %v2156_v60 = vpack.c.bf16 %v2108_v17, %v2108_v17  ;;  %v2060_v4 = vpop.f32.mrf.mxu0 }
 0x17d   : > { %v1657_v9 = vadd.f32 %v1656_v5, %v3834_v56  ;;  %v2011_v51 = vpop.f32.mrf.mxu3 }
 0x17e   : > { %v2188_v52 = vunpack.c.l.bf16 %v2156_v60  ;;  %v2012_v37 = vadd.f32 %v2011_v51, %v1962_v18 }
 0x17f   : > { %v1703_v21 = vadd.f32 %v1657_v9, %v3826_v24 }
 0x180   : > { %v2203_v8 = vadd.f32 %v2202_v10, %v2188_v52  ;;  %v2226_v34 = vmul.f32 %v2188_v52, %v2188_v52  ;;  %v2061_v50 = vadd.f32 %v2060_v4, %v2012_v37 }
 0x181   : > { %v1965_v29 = vpop.f32.mrf.mxu2 }
 0x182   : > { %v2241_v22 = vadd.f32 %v2240_v16, %v2226_v34  ;;  %v2109_v36 = vadd.f32 %v2061_v50, %v1702_v12 }
 0x184   : > { %v1658_v38 = vpop.f32.mrf.mxu1  ;;  %v2157_v33 = vpack.c.bf16 %v2109_v36, %v2109_v36  ;;  %v3009_v15 = vpack.c.bf16 %v2109_v36, %v2108_v17  ;;  %v2063_v56 = vpop.f32.mrf.mxu0 }
 0x185   : > { %v1659_v41 = vadd.f32 %v1658_v38, %v3847_v20  ;;  %v2014_v45 = vpop.f32.mrf.mxu3 }
 0x186   : > { %3044 = vst [vmem:[%s3921_s24 + $0x10] sm:$0xff] %v3009_v15   ;;  %v2189_v24 = vunpack.c.l.bf16 %v2157_v33  ;;  %v2015_v63 = vadd.f32 %v2014_v45, %v1965_v29 }
 0x187   : > { %v1704_v40 = vadd.f32 %v1659_v41, %v3840_v1 }
 0x188   : > { %v2204_v19 = vadd.f32 %v2203_v8, %v2189_v24  ;;  %v2227_v0 = vmul.f32 %v2189_v24, %v2189_v24  ;;  %v2064_v47 = vadd.f32 %v2063_v56, %v2015_v63 }
 0x189   : > { %v1967_v53 = vpop.f32.mrf.mxu2 }
 0x18a   : > { %v2242_v14 = vadd.f32 %v2241_v22, %v2227_v0  ;;  %v2110_v48 = vadd.f32 %v2064_v47, %v1703_v21 }
 0x18c   : > { %v1661_v43 = vpop.f32.mrf.mxu1  ;;  %v2158_v57 = vpack.c.bf16 %v2110_v48, %v2110_v48  ;;  %v2065_v20 = vpop.f32.mrf.mxu0 }
 0x18d   : > { %v1662_v54 = vadd.f32 %v1661_v43, %v3853_v49  ;;  %v2016_v58 = vpop.f32.mrf.mxu3 }
 0x18e   : > { %v2190_v2 = vunpack.c.l.bf16 %v2158_v57  ;;  %v2017_v1 = vadd.f32 %v2016_v58, %v1967_v53 }
 0x18f   : > { %v1705_v32 = vadd.f32 %v1662_v54, %v3850_v44 }
 0x190   : > { %v2205_v25 = vadd.f32 %v2204_v19, %v2190_v2  ;;  %v2228_v39 = vmul.f32 %v2190_v2, %v2190_v2  ;;  %v2066_v12 = vadd.f32 %v2065_v20, %v2017_v1 }
 0x191   : > { %v1970_v28 = vpop.f32.mrf.mxu2 }
 0x192   : > { %v2243_v7 = vadd.f32 %v2242_v14, %v2228_v39  ;;  %v2111_v10 = vadd.f32 %v2066_v12, %v1704_v40 }
 0x194   : > { %v1663_v55 = vpop.f32.mrf.mxu1  ;;  %v2159_v18 = vpack.c.bf16 %v2111_v10, %v2111_v10  ;;  %v3014_v16 = vpack.c.bf16 %v2111_v10, %v2110_v48  ;;  %v2068_v49 = vpop.f32.mrf.mxu0 }
 0x195   : > { %v1664_v61 = vadd.f32 %v1663_v55, %v3861_v62  ;;  %v2019_v17 = vpop.f32.mrf.mxu3 }
 0x196   : > { %3045 = vst [vmem:[%s3921_s24 + $0x18] sm:$0xff] %v3014_v16   ;;  %v2191_v44 = vunpack.c.l.bf16 %v2159_v18  ;;  %v2020_v9 = vadd.f32 %v2019_v17, %v1970_v28 }
 0x197   : > { %v1706_v5 = vadd.f32 %v1664_v61, %v3857_v3 }
 0x198   : > { %v2206_v60 = vadd.f32 %v2205_v25, %v2191_v44  ;;  %v2229_v4 = vmul.f32 %v2191_v44, %v2191_v44  ;;  %v2069_v51 = vadd.f32 %v2068_v49, %v2020_v9 }
 0x199   : > { %v1972_v21 = vpop.f32.mrf.mxu2 }
 0x19a   : > { %v2244_v52 = vadd.f32 %v2243_v7, %v2229_v4  ;;  %v2112_v37 = vadd.f32 %v2069_v51, %v1705_v32 }
 0x19c   : > { %v1666_v8 = vpop.f32.mrf.mxu1  ;;  %v2160_v50 = vpack.c.bf16 %v2112_v37, %v2112_v37  ;;  %v2070_v62 = vpop.f32.mrf.mxu0 }
 0x19d   : > { %v1667_v34 = vadd.f32 %v1666_v8, %v3867_v13  ;;  %v2021_v29 = vpop.f32.mrf.mxu3 }
 0x19e   : > { %v2192_v36 = vunpack.c.l.bf16 %v2160_v50  ;;  %v2022_v3 = vadd.f32 %v2021_v29, %v1972_v21 }
 0x19f   : > { %v1707_v22 = vadd.f32 %v1667_v34, %v3864_v59 }
 0x1a0   : > { %v2207_v38 = vadd.f32 %v2206_v60, %v2192_v36  ;;  %v2230_v41 = vmul.f32 %v2192_v36, %v2192_v36  ;;  %v2071_v33 = vadd.f32 %v2070_v62, %v2022_v3 }
 0x1a1   : > { %v1975_v15 = vpop.f32.mrf.mxu2 }
 0x1a2   : > { %v2245_v56 = vadd.f32 %v2244_v52, %v2230_v41  ;;  %v2113_v45 = vadd.f32 %v2071_v33, %v1706_v5 }
 0x1a4   : > { %v1668_v40 = vpop.f32.mrf.mxu1  ;;  %v2161_v63 = vpack.c.bf16 %v2113_v45, %v2113_v45  ;;  %v3019_v19 = vpack.c.bf16 %v2113_v45, %v2112_v37  ;;  %v2073_v13 = vpop.f32.mrf.mxu0 }
 0x1a5   : > { %v1669_v24 = vadd.f32 %v1668_v40, %v3875_v42  ;;  %v2024_v0 = vpop.f32.mrf.mxu3 }
 0x1a6   : > { %3046 = vst [vmem:[%s3921_s24 + $0x20] sm:$0xff] %v3019_v19   ;;  %v2193_v59 = vunpack.c.l.bf16 %v2161_v63  ;;  %v2025_v53 = vadd.f32 %v2024_v0, %v1975_v15 }
 0x1a7   : > { %v1708_v47 = vadd.f32 %v1669_v24, %v3871_v30 }
 0x1a8   : > { %v2208_v14 = vadd.f32 %v2207_v38, %v2193_v59  ;;  %v2231_v48 = vmul.f32 %v2193_v59, %v2193_v59  ;;  %v2074_v43 = vadd.f32 %v2073_v13, %v2025_v53 }
 0x1a9   : > { %v1977_v54 = vpop.f32.mrf.mxu2 }
 0x1aa   : > { %v2246_v57 = vadd.f32 %v2245_v56, %v2231_v48  ;;  %v2114_v20 = vadd.f32 %v2074_v43, %v1707_v22 }
 0x1ac   : > { %v1671_v58 = vpop.f32.mrf.mxu1  ;;  %v2162_v2 = vpack.c.bf16 %v2114_v20, %v2114_v20  ;;  %v2075_v42 = vpop.f32.mrf.mxu0 }
 0x1ad   : > { %v1672_v32 = vadd.f32 %v1671_v58, %v3888_v6  ;;  %v2026_v1 = vpop.f32.mrf.mxu3 }
 0x1ae   : > { %v2194_v39 = vunpack.c.l.bf16 %v2162_v2  ;;  %v2027_v30 = vadd.f32 %v2026_v1, %v1977_v54 }
 0x1af   : > { %v1709_v25 = vadd.f32 %v1672_v32, %v3882_v46 }
 0x1b0   : > { %v2209_v12 = vadd.f32 %v2208_v14, %v2194_v39  ;;  %v2232_v28 = vmul.f32 %v2194_v39, %v2194_v39  ;;  %v2076_v7 = vadd.f32 %v2075_v42, %v2027_v30 }
 0x1b1   : > { %v1980_v10 = vpop.f32.mrf.mxu2 }
 0x1b2   : > { %v2247_v55 = vadd.f32 %v2246_v57, %v2232_v28  ;;  %v2115_v61 = vadd.f32 %v2076_v7, %v1708_v47 }
 0x1b4   : > { %v1673_v18 = vpop.f32.mrf.mxu1  ;;  %v2163_v49 = vpack.c.bf16 %v2115_v61, %v2115_v61  ;;  %v3024_v17 = vpack.c.bf16 %v2115_v61, %v2114_v20  ;;  %v2078_v6 = vpop.f32.mrf.mxu0 }
 0x1b5   : > { %v1674_v16 = vadd.f32 %v1673_v18, %v3893_v23  ;;  %v2029_v5 = vpop.f32.mrf.mxu3 }
 0x1b6   : > { %3047 = vst [vmem:[%s3921_s24 + $0x28] sm:$0xff] %v3024_v17   ;;  %v2195_v46 = vunpack.c.l.bf16 %v2163_v49  ;;  %v2030_v9 = vadd.f32 %v2029_v5, %v1980_v10 }
 0x1b7   : > { %v1710_v44 = vadd.f32 %v1674_v16, %v3891_v35 }
 0x1b8   : > { %v2210_v60 = vadd.f32 %v2209_v12, %v2195_v46  ;;  %v2233_v4 = vmul.f32 %v2195_v46, %v2195_v46  ;;  %v2079_v51 = vadd.f32 %v2078_v6, %v2030_v9 }
 0x1b9   : > { %v1982_v21 = vpop.f32.mrf.mxu2 }
 0x1ba   : > { %v2248_v52 = vadd.f32 %v2247_v55, %v2233_v4  ;;  %v2116_v37 = vadd.f32 %v2079_v51, %v1709_v25 }
 0x1bc   : > { %v1676_v8 = vpop.f32.mrf.mxu1  ;;  %v2164_v50 = vpack.c.bf16 %v2116_v37, %v2116_v37  ;;  %v2080_v23 = vpop.f32.mrf.mxu0 }
 0x1bd   : > { %v1677_v34 = vadd.f32 %v1676_v8, %v3900_v27  ;;  %v2031_v62 = vpop.f32.mrf.mxu3 }
 0x1be   : > { %v2196_v22 = vunpack.c.l.bf16 %v2164_v50  ;;  %v2032_v35 = vadd.f32 %v2031_v62, %v1982_v21 }
 0x1bf   : > { %v1711_v29 = vadd.f32 %v1677_v34, %v3897_v11 }
 0x1c0   : > { %v2211_v36 = vadd.f32 %v2210_v60, %v2196_v22  ;;  %v2234_v3 = vmul.f32 %v2196_v22, %v2196_v22  ;;  %v2081_v38 = vadd.f32 %v2080_v23, %v2032_v35 }
 0x1c1   : > { %v1985_v41 = vpop.f32.mrf.mxu2 }
 0x1c2   : > { %v2249_v33 = vadd.f32 %v2248_v52, %v2234_v3  ;;  %v2117_v15 = vadd.f32 %v2081_v38, %v1710_v44 }
 0x1c4   : > { %v1678_v56 = vpop.f32.mrf.mxu1  ;;  %v2165_v40 = vpack.c.bf16 %v2117_v15, %v2117_v15  ;;  %v3029_v24 = vpack.c.bf16 %v2117_v15, %v2116_v37  ;;  %v2083_v27 = vpop.f32.mrf.mxu0 }
 0x1c5   : > { %v1679_v45 = vadd.f32 %v1678_v56, %v3907_v26  ;;  %v2034_v63 = vpop.f32.mrf.mxu3 }
 0x1c6   : > { %3048 = vst [vmem:[%s3921_s24 + $0x30] sm:$0xff] %v3029_v24   ;;  %v2197_v11 = vunpack.c.l.bf16 %v2165_v40  ;;  %v2035_v13 = vadd.f32 %v2034_v63, %v1985_v41 }
 0x1c7   : > { %v1712_v19 = vadd.f32 %v1679_v45, %v3903_v31 }
 0x1c8   : > { %v2212_v0 = vadd.f32 %v2211_v36, %v2197_v11  ;;  %v2235_v47 = vmul.f32 %v2197_v11, %v2197_v11  ;;  %v2084_v59 = vadd.f32 %v2083_v27, %v2035_v13 }
 0x1c9   : > { %v1987_v48 = vpop.f32.mrf.mxu2 }
 0x1ca   : > { %v2250_v53 = vadd.f32 %v2249_v33, %v2235_v47  ;;  %v2118_v14 = vadd.f32 %v2084_v59, %v1711_v29 }
 0x1cc   : > { %v2166_v43 = vpack.c.bf16 %v2118_v14, %v2118_v14  ;;  %v2085_v20 = vpop.f32.mrf.mxu0 }
 0x1cd   : > { %v2036_v54 = vpop.f32.mrf.mxu3 }
 0x1ce   : > { %v2198_v57 = vunpack.c.l.bf16 %v2166_v43  ;;  %v2037_v26 = vadd.f32 %v2036_v54, %v1987_v48 }
 0x1d0   : > { %v2213_v58 = vadd.f32 %v2212_v0, %v2198_v57  ;;  %v2236_v32 = vmul.f32 %v2198_v57, %v2198_v57  ;;  %v2086_v2 = vadd.f32 %v2085_v20, %v2037_v26 }
 0x1d2   : > { %v2251_v31 = vadd.f32 %v2250_v53, %v2236_v32  ;;  %v2119_v42 = vadd.f32 %v2086_v2, %v1712_v19 }
 0x1d4   : > { %v2167_v1 = vpack.c.bf16 %v2119_v42, %v2119_v42  ;;  %v3034_v25 = vpack.c.bf16 %v2119_v42, %v2118_v14 }
 0x1d6   : > { %3049 = vst [vmem:[%s3921_s24 + $0x38] sm:$0xff] %v3034_v25   ;;  %v2199_v39 = vunpack.c.l.bf16 %v2167_v1 }
 0x1d8   : > { %v2214_v30 = vadd.f32 %v2213_v58, %v2199_v39  ;;  %v2237_v12 = vmul.f32 %v2199_v39, %v2199_v39 }
 0x1da   : > { %v2215_v28 = vrot.slane %v2214_v30, 4  ;;  %v2252_v7 = vadd.f32 %v2251_v31, %v2237_v12 }
 0x1dc   : > { %v2216_v10 = vadd.f32 %v2215_v28, %v2214_v30  ;;  %v2253_v55 = vrot.slane %v2252_v7, 4 }
 0x1de   : > { %v2217_v61 = vrot.slane %v2216_v10, 2  ;;  %v2254_v18 = vadd.f32 %v2253_v55, %v2252_v7 }
 0x1e0   : > { %v2218_v16 = vadd.f32 %v2217_v61, %v2216_v10  ;;  %v2255_v49 = vrot.slane %v2254_v18, 2 }
 0x1e2   : > { %v2219_v17 = vrot.slane %v2218_v16, 1  ;;  %v2256_v6 = vadd.f32 %v2255_v49, %v2254_v18 }
 0x1e4   : > { %v2220_v5 = vadd.f32 %v2219_v17, %v2218_v16  ;;  %v2257_v44 = vrot.slane %v2256_v6, 1 }
 0x1e6   : > { %2221 = vst [vmem:[%s499_s26] sm:$0x1] %v2220_v5  ;;  %v2258_v46 = vadd.f32 %v2257_v44, %v2256_v6 }
 0x1e8   : > { %2259 = vst [vmem:[%s506_s15] sm:$0x1] %v2258_v46 }
 0x1e9 PF: > { %s19_s9 = sadd.s32 1, %s3156_s9   ;;  %s3992_s27 = smov %s3148_s29 }
 0x1ea   : > { %p16_p0 = scmp.ge.s32.totalorder %s19_s9, 6   ;;  %s3993_s28 = smov %s3152_s30 }
 0x1eb   : > { %s3994_s29 = smov %s3997_s10  ;;  %s3995_s30 = smov %s4001_s11 }
 0x1ec   :  { %18 = sbr.rel (!%p16_p0) target bundleno = 3 (0x3), region = 106 }

</bundles_post_ra>
